<compile_context>
chip_gen: v7x
topology: tpu7x:2x2x1
jax: 0.10.0
libtpu: 0.0.40
codegen_flags: <defaults>
</compile_context>

<pallas_src>
import math

import jax
import jax.numpy as jnp
import numpy as np
from jax.experimental import pallas as pl
from jax.experimental.pallas import tpu as pltpu

# ---- module hyper-parameters (from the PyTorch script) ----
HIDDEN_SIZE = 2
INPUT_SIZE = 1
NUM_LAYERS = 1      # forward below assumes num_layers == 1 (as configured)
OUTPUT_SIZE = 1
NUM_GATES = 4       # PyTorch gate order: input, forget, cell(g), output


def lstm_kernel(x_ref, wih_ref, whh_ref, b_ref, wfc_ref, bfc_ref, o_ref):
    """Whole LSTM recurrence + final Linear inside one kernel invocation.

    x_ref   : (B, T, I)   batch-first input block
    wih_ref : (G, I, H)   per-gate input weights,    wih[g,i,j] = W_ih[g*H+j, i]
    whh_ref : (G, H, H)   per-gate recurrent weights whh[g,k,j] = W_hh[g*H+j, k]
    b_ref   : (G, 1, H)   per-gate fused bias (b_ih + b_hh)
    wfc_ref : (H, 1, O)   fc weight,                 wfc[k,0,o] = fc.weight[o,k]
    bfc_ref : (1, 1, O)   fc bias
    o_ref   : (B, 1, O)   output block
    """
    B, T, I = x_ref.shape
    G, _, H = wih_ref.shape

    x = x_ref[...]
    wih = wih_ref[...]
    whh = whh_ref[...]
    b = b_ref[...]

    # Rank-preserving row views of the weights, hoisted out of every loop.
    wih_rows = [[wih[g:g + 1, i:i + 1, :] for i in range(I)] for g in range(G)]
    whh_rows = [[whh[g:g + 1, k:k + 1, :] for k in range(H)] for g in range(G)]
    b_rows = [b[g:g + 1, :, :] for g in range(G)]

    # ---- Phase 1 (hoisted out of the recurrence): input projection + bias
    # for every timestep. With I == 1 this is a pure VPU broadcast MAC, so the
    # serial loop below only carries the H-wide recurrent update.
    gx = []                                            # gx[t][g] : (B, 1, H)
    for t in range(T):
        x_t = x[:, t:t + 1, :]                         # (B, 1, I) static slice
        per_gate = []
        for g in range(G):
            p = b_rows[g]                              # (1, 1, H) -> broadcasts
            for i in range(I):
                p = p + x_t[:, :, i:i + 1] * wih_rows[g][i]
            per_gate.append(p)                         # (B, 1, H)
        gx.append(per_gate)

    # ---- Phase 2: serial recurrence, fully unrolled (T is small and static).
    h = jnp.zeros((B, 1, H), jnp.float32)
    c = jnp.zeros((B, 1, H), jnp.float32)
    for t in range(T):
        hk = [h[:, :, k:k + 1] for k in range(H)]      # (B, 1, 1) lane slices
        pre = []
        for g in range(G):
            p = gx[t][g]
            for k in range(H):                         # h @ W_hh^T as VPU MACs
                p = p + hk[k] * whh_rows[g][k]
            pre.append(p)                              # per-gate (B, 1, H)
        i_gate = jax.nn.sigmoid(pre[0])
        f_gate = jax.nn.sigmoid(pre[1])
        g_gate = jnp.tanh(pre[2])
        o_gate = jax.nn.sigmoid(pre[3])
        c = f_gate * c + i_gate * g_gate
        h = o_gate * jnp.tanh(c)

    # ---- Phase 3: final Linear  out = h @ fc.weight^T + fc.bias  (VPU MACs).
    wfc = wfc_ref[...]                                 # (H, 1, O)
    out = bfc_ref[...]                                 # (1, 1, O) -> broadcasts
    for k in range(H):
        out = out + h[:, :, k:k + 1] * wfc[k:k + 1, :, :]
    # O=1 makes this a narrow masked store -- negligible here; a scaled model
    # should present a lane-dense output slab instead.
    o_ref[...] = out


def lstm_model_forward(x, params, *, batch_block=None):
    """x: (B, T, I) float32, batch_first (same convention as the PyTorch module)."""
    w_ih, w_hh, b_ih, b_hh, w_fc, b_fc = params
    B, T, I = x.shape
    H = w_hh.shape[1]
    O = w_fc.shape[0]
    G = NUM_GATES
    if batch_block is None:
        batch_block = B                    # single program at these tiny sizes
    assert B % batch_block == 0

    x = x.astype(jnp.float32)
    # Per-gate weight layout (gate index on a leading, non-lane axis), weights
    # pre-transposed so the kernel only needs broadcast multiply-adds.
    wih_g = jnp.transpose(w_ih.reshape(G, H, I), (0, 2, 1)).astype(jnp.float32)  # (G, I, H)
    whh_g = jnp.transpose(w_hh.reshape(G, H, H), (0, 2, 1)).astype(jnp.float32)  # (G, H, H)
    b_g = (b_ih + b_hh).reshape(G, 1, H).astype(jnp.float32)                     # (G, 1, H)
    wfc_3 = jnp.transpose(w_fc).reshape(H, 1, O).astype(jnp.float32)             # (H, 1, O)
    bfc_3 = b_fc.reshape(1, 1, O).astype(jnp.float32)                            # (1, 1, O)

    out = pl.pallas_call(
        lstm_kernel,
        out_shape=jax.ShapeDtypeStruct((B, 1, O), jnp.float32),
        grid=(B // batch_block,),          # independent batch rows
        in_specs=[
            pl.BlockSpec((batch_block, T, I), lambda i: (i, 0, 0)),
            pl.BlockSpec((G, I, H), lambda i: (0, 0, 0)),
            pl.BlockSpec((G, H, H), lambda i: (0, 0, 0)),
            pl.BlockSpec((G, 1, H), lambda i: (0, 0, 0)),
            pl.BlockSpec((H, 1, O), lambda i: (0, 0, 0)),
            pl.BlockSpec((1, 1, O), lambda i: (0, 0, 0)),
        ],
        out_specs=pl.BlockSpec((batch_block, 1, O), lambda i: (i, 0, 0)),
        compiler_params=pltpu.CompilerParams(
            dimension_semantics=("parallel",)),  # shardable across v7x's 2 TCs
    )(x, wih_g, whh_g, b_g, wfc_3, bfc_3)
    return out.reshape(B, O)               # metadata-only reshape outside kernel


def init_params(key, input_size, hidden_size, output_size):
    """Same shapes / uniform(-1/sqrt(H), 1/sqrt(H)) scheme as nn.LSTM / nn.Linear."""
    k = jax.random.split(key, 6)
    s = 1.0 / math.sqrt(hidden_size)
    w_ih = jax.random.uniform(k[0], (4 * hidden_size, input_size), jnp.float32, -s, s)
    w_hh = jax.random.uniform(k[1], (4 * hidden_size, hidden_size), jnp.float32, -s, s)
    b_ih = jax.random.uniform(k[2], (4 * hidden_size,), jnp.float32, -s, s)
    b_hh = jax.random.uniform(k[3], (4 * hidden_size,), jnp.float32, -s, s)
    w_fc = jax.random.uniform(k[4], (output_size, hidden_size), jnp.float32, -s, s)
    b_fc = jax.random.uniform(k[5], (output_size,), jnp.float32, -s, s)
    return (w_ih, w_hh, b_ih, b_hh, w_fc, b_fc)


def reference_forward(x, params):
    """Pure-JAX reference matching PyTorch semantics (for verification)."""
    w_ih, w_hh, b_ih, b_hh, w_fc, b_fc = params
    B, T, _ = x.shape
    H = w_hh.shape[1]
    h = jnp.zeros((B, H), jnp.float32)
    c = jnp.zeros((B, H), jnp.float32)
    for t in range(T):
        gates = x[:, t, :] @ w_ih.T + h @ w_hh.T + b_ih + b_hh
        i_g = jax.nn.sigmoid(gates[:, 0 * H:1 * H])
        f_g = jax.nn.sigmoid(gates[:, 1 * H:2 * H])
        g_g = jnp.tanh(gates[:, 2 * H:3 * H])
        o_g = jax.nn.sigmoid(gates[:, 3 * H:4 * H])
        c = f_g * c + i_g * g_g
        h = o_g * jnp.tanh(c)
    return h @ w_fc.T + b_fc


if __name__ == "__main__":
    key = jax.random.PRNGKey(0)
    pkey, xkey = jax.random.split(key)

    params = init_params(pkey, INPUT_SIZE, HIDDEN_SIZE, OUTPUT_SIZE)

    batch, seq = 4, 8
    x = jax.random.normal(xkey, (batch, seq, INPUT_SIZE), jnp.float32)

    out = lstm_model_forward(x, params)
    out = jax.block_until_ready(out)

    ref = reference_forward(x, params)
    assert out.shape == (batch, OUTPUT_SIZE)
    np.testing.assert_allclose(np.asarray(out), np.asarray(ref),
                               rtol=1e-5, atol=1e-5)
    print("KERNEL_OK")
</pallas_src>

<mosaic_0001>
module attributes {stable_mosaic.version = 11 : i64} {
  func.func @lstm_kernel(%arg0: i32, %arg1: memref<4x8x1xf32, #tpu.memory_space<vmem>>, %arg2: memref<4x1x2xf32, #tpu.memory_space<vmem>>, %arg3: memref<4x2x2xf32, #tpu.memory_space<vmem>>, %arg4: memref<4x1x2xf32, #tpu.memory_space<vmem>>, %arg5: memref<2x1x1xf32, #tpu.memory_space<vmem>>, %arg6: memref<1x1x1xf32, #tpu.memory_space<vmem>>, %arg7: memref<4x1x1xf32, #tpu.memory_space<vmem>>) attributes {dimension_semantics = [#tpu.dimension_semantics<parallel>], iteration_bounds = array<i64: 1>, scalar_prefetch = 0 : i64, scratch_operands = 0 : i64, tpu.core_type = #tpu.core_type<tc>, window_params = [{transform_indices = @transform_0, window_bounds = array<i64: 4, 8, 1>}, {pipeline_mode = #tpu.pipeline_mode<synchronous>, transform_indices = @transform_1, window_bounds = array<i64: 4, 1, 2>}, {pipeline_mode = #tpu.pipeline_mode<synchronous>, transform_indices = @transform_2, window_bounds = array<i64: 4, 2, 2>}, {pipeline_mode = #tpu.pipeline_mode<synchronous>, transform_indices = @transform_3, window_bounds = array<i64: 4, 1, 2>}, {pipeline_mode = #tpu.pipeline_mode<synchronous>, transform_indices = @transform_4, window_bounds = array<i64: 2, 1, 1>}, {pipeline_mode = #tpu.pipeline_mode<synchronous>, transform_indices = @transform_5, window_bounds = array<i64: 1, 1, 1>}, {transform_indices = @transform_6, window_bounds = array<i64: 4, 1, 1>}]} {
    %c0 = arith.constant 0 : index
    %c0_0 = arith.constant 0 : index
    %c0_1 = arith.constant 0 : index
    %0 = vector.load %arg1[%c0, %c0_0, %c0_1] : memref<4x8x1xf32, #tpu.memory_space<vmem>>, vector<4x8x1xf32>
    %c0_2 = arith.constant 0 : index
    %c0_3 = arith.constant 0 : index
    %c0_4 = arith.constant 0 : index
    %1 = vector.load %arg2[%c0_2, %c0_3, %c0_4] : memref<4x1x2xf32, #tpu.memory_space<vmem>>, vector<4x1x2xf32>
    %c0_5 = arith.constant 0 : index
    %c0_6 = arith.constant 0 : index
    %c0_7 = arith.constant 0 : index
    %2 = vector.load %arg3[%c0_5, %c0_6, %c0_7] : memref<4x2x2xf32, #tpu.memory_space<vmem>>, vector<4x2x2xf32>
    %c0_8 = arith.constant 0 : index
    %c0_9 = arith.constant 0 : index
    %c0_10 = arith.constant 0 : index
    %3 = vector.load %arg4[%c0_8, %c0_9, %c0_10] : memref<4x1x2xf32, #tpu.memory_space<vmem>>, vector<4x1x2xf32>
    %4 = vector.extract_strided_slice %1 {offsets = [0, 0, 0], sizes = [1, 1, 2], strides = [1, 1, 1]} : vector<4x1x2xf32> to vector<1x1x2xf32>
    %5 = vector.extract_strided_slice %1 {offsets = [1, 0, 0], sizes = [1, 1, 2], strides = [1, 1, 1]} : vector<4x1x2xf32> to vector<1x1x2xf32>
    %6 = vector.extract_strided_slice %1 {offsets = [2, 0, 0], sizes = [1, 1, 2], strides = [1, 1, 1]} : vector<4x1x2xf32> to vector<1x1x2xf32>
    %7 = vector.extract_strided_slice %1 {offsets = [3, 0, 0], sizes = [1, 1, 2], strides = [1, 1, 1]} : vector<4x1x2xf32> to vector<1x1x2xf32>
    %8 = vector.extract_strided_slice %2 {offsets = [0, 0, 0], sizes = [1, 1, 2], strides = [1, 1, 1]} : vector<4x2x2xf32> to vector<1x1x2xf32>
    %9 = vector.extract_strided_slice %2 {offsets = [0, 1, 0], sizes = [1, 1, 2], strides = [1, 1, 1]} : vector<4x2x2xf32> to vector<1x1x2xf32>
    %10 = vector.extract_strided_slice %2 {offsets = [1, 0, 0], sizes = [1, 1, 2], strides = [1, 1, 1]} : vector<4x2x2xf32> to vector<1x1x2xf32>
    %11 = vector.extract_strided_slice %2 {offsets = [1, 1, 0], sizes = [1, 1, 2], strides = [1, 1, 1]} : vector<4x2x2xf32> to vector<1x1x2xf32>
    %12 = vector.extract_strided_slice %2 {offsets = [2, 0, 0], sizes = [1, 1, 2], strides = [1, 1, 1]} : vector<4x2x2xf32> to vector<1x1x2xf32>
    %13 = vector.extract_strided_slice %2 {offsets = [2, 1, 0], sizes = [1, 1, 2], strides = [1, 1, 1]} : vector<4x2x2xf32> to vector<1x1x2xf32>
    %14 = vector.extract_strided_slice %2 {offsets = [3, 0, 0], sizes = [1, 1, 2], strides = [1, 1, 1]} : vector<4x2x2xf32> to vector<1x1x2xf32>
    %15 = vector.extract_strided_slice %2 {offsets = [3, 1, 0], sizes = [1, 1, 2], strides = [1, 1, 1]} : vector<4x2x2xf32> to vector<1x1x2xf32>
    %16 = vector.extract_strided_slice %3 {offsets = [0, 0, 0], sizes = [1, 1, 2], strides = [1, 1, 1]} : vector<4x1x2xf32> to vector<1x1x2xf32>
    %17 = vector.extract_strided_slice %3 {offsets = [1, 0, 0], sizes = [1, 1, 2], strides = [1, 1, 1]} : vector<4x1x2xf32> to vector<1x1x2xf32>
    %18 = vector.extract_strided_slice %3 {offsets = [2, 0, 0], sizes = [1, 1, 2], strides = [1, 1, 1]} : vector<4x1x2xf32> to vector<1x1x2xf32>
    %19 = vector.extract_strided_slice %3 {offsets = [3, 0, 0], sizes = [1, 1, 2], strides = [1, 1, 1]} : vector<4x1x2xf32> to vector<1x1x2xf32>
    %20 = vector.extract_strided_slice %0 {offsets = [0, 0, 0], sizes = [4, 1, 1], strides = [1, 1, 1]} : vector<4x8x1xf32> to vector<4x1x1xf32>
    %21 = vector.broadcast %20 : vector<4x1x1xf32> to vector<4x1x2xf32>
    %22 = vector.broadcast %4 : vector<1x1x2xf32> to vector<4x1x2xf32>
    %23 = arith.mulf %21, %22 : vector<4x1x2xf32>
    %24 = vector.broadcast %16 : vector<1x1x2xf32> to vector<4x1x2xf32>
    %25 = arith.addf %24, %23 : vector<4x1x2xf32>
    %26 = vector.broadcast %20 : vector<4x1x1xf32> to vector<4x1x2xf32>
    %27 = vector.broadcast %5 : vector<1x1x2xf32> to vector<4x1x2xf32>
    %28 = arith.mulf %26, %27 : vector<4x1x2xf32>
    %29 = vector.broadcast %17 : vector<1x1x2xf32> to vector<4x1x2xf32>
    %30 = arith.addf %29, %28 : vector<4x1x2xf32>
    %31 = vector.broadcast %20 : vector<4x1x1xf32> to vector<4x1x2xf32>
    %32 = vector.broadcast %6 : vector<1x1x2xf32> to vector<4x1x2xf32>
    %33 = arith.mulf %31, %32 : vector<4x1x2xf32>
    %34 = vector.broadcast %18 : vector<1x1x2xf32> to vector<4x1x2xf32>
    %35 = arith.addf %34, %33 : vector<4x1x2xf32>
    %36 = vector.broadcast %20 : vector<4x1x1xf32> to vector<4x1x2xf32>
    %37 = vector.broadcast %7 : vector<1x1x2xf32> to vector<4x1x2xf32>
    %38 = arith.mulf %36, %37 : vector<4x1x2xf32>
    %39 = vector.broadcast %19 : vector<1x1x2xf32> to vector<4x1x2xf32>
    %40 = arith.addf %39, %38 : vector<4x1x2xf32>
    %41 = vector.extract_strided_slice %0 {offsets = [0, 1, 0], sizes = [4, 1, 1], strides = [1, 1, 1]} : vector<4x8x1xf32> to vector<4x1x1xf32>
    %42 = vector.broadcast %41 : vector<4x1x1xf32> to vector<4x1x2xf32>
    %43 = vector.broadcast %4 : vector<1x1x2xf32> to vector<4x1x2xf32>
    %44 = arith.mulf %42, %43 : vector<4x1x2xf32>
    %45 = vector.broadcast %16 : vector<1x1x2xf32> to vector<4x1x2xf32>
    %46 = arith.addf %45, %44 : vector<4x1x2xf32>
    %47 = vector.broadcast %41 : vector<4x1x1xf32> to vector<4x1x2xf32>
    %48 = vector.broadcast %5 : vector<1x1x2xf32> to vector<4x1x2xf32>
    %49 = arith.mulf %47, %48 : vector<4x1x2xf32>
    %50 = vector.broadcast %17 : vector<1x1x2xf32> to vector<4x1x2xf32>
    %51 = arith.addf %50, %49 : vector<4x1x2xf32>
    %52 = vector.broadcast %41 : vector<4x1x1xf32> to vector<4x1x2xf32>
    %53 = vector.broadcast %6 : vector<1x1x2xf32> to vector<4x1x2xf32>
    %54 = arith.mulf %52, %53 : vector<4x1x2xf32>
    %55 = vector.broadcast %18 : vector<1x1x2xf32> to vector<4x1x2xf32>
    %56 = arith.addf %55, %54 : vector<4x1x2xf32>
    %57 = vector.broadcast %41 : vector<4x1x1xf32> to vector<4x1x2xf32>
    %58 = vector.broadcast %7 : vector<1x1x2xf32> to vector<4x1x2xf32>
    %59 = arith.mulf %57, %58 : vector<4x1x2xf32>
    %60 = vector.broadcast %19 : vector<1x1x2xf32> to vector<4x1x2xf32>
    %61 = arith.addf %60, %59 : vector<4x1x2xf32>
    %62 = vector.extract_strided_slice %0 {offsets = [0, 2, 0], sizes = [4, 1, 1], strides = [1, 1, 1]} : vector<4x8x1xf32> to vector<4x1x1xf32>
    %63 = vector.broadcast %62 : vector<4x1x1xf32> to vector<4x1x2xf32>
    %64 = vector.broadcast %4 : vector<1x1x2xf32> to vector<4x1x2xf32>
    %65 = arith.mulf %63, %64 : vector<4x1x2xf32>
    %66 = vector.broadcast %16 : vector<1x1x2xf32> to vector<4x1x2xf32>
    %67 = arith.addf %66, %65 : vector<4x1x2xf32>
    %68 = vector.broadcast %62 : vector<4x1x1xf32> to vector<4x1x2xf32>
    %69 = vector.broadcast %5 : vector<1x1x2xf32> to vector<4x1x2xf32>
    %70 = arith.mulf %68, %69 : vector<4x1x2xf32>
    %71 = vector.broadcast %17 : vector<1x1x2xf32> to vector<4x1x2xf32>
    %72 = arith.addf %71, %70 : vector<4x1x2xf32>
    %73 = vector.broadcast %62 : vector<4x1x1xf32> to vector<4x1x2xf32>
    %74 = vector.broadcast %6 : vector<1x1x2xf32> to vector<4x1x2xf32>
    %75 = arith.mulf %73, %74 : vector<4x1x2xf32>
    %76 = vector.broadcast %18 : vector<1x1x2xf32> to vector<4x1x2xf32>
    %77 = arith.addf %76, %75 : vector<4x1x2xf32>
    %78 = vector.broadcast %62 : vector<4x1x1xf32> to vector<4x1x2xf32>
    %79 = vector.broadcast %7 : vector<1x1x2xf32> to vector<4x1x2xf32>
    %80 = arith.mulf %78, %79 : vector<4x1x2xf32>
    %81 = vector.broadcast %19 : vector<1x1x2xf32> to vector<4x1x2xf32>
    %82 = arith.addf %81, %80 : vector<4x1x2xf32>
    %83 = vector.extract_strided_slice %0 {offsets = [0, 3, 0], sizes = [4, 1, 1], strides = [1, 1, 1]} : vector<4x8x1xf32> to vector<4x1x1xf32>
    %84 = vector.broadcast %83 : vector<4x1x1xf32> to vector<4x1x2xf32>
    %85 = vector.broadcast %4 : vector<1x1x2xf32> to vector<4x1x2xf32>
    %86 = arith.mulf %84, %85 : vector<4x1x2xf32>
    %87 = vector.broadcast %16 : vector<1x1x2xf32> to vector<4x1x2xf32>
    %88 = arith.addf %87, %86 : vector<4x1x2xf32>
    %89 = vector.broadcast %83 : vector<4x1x1xf32> to vector<4x1x2xf32>
    %90 = vector.broadcast %5 : vector<1x1x2xf32> to vector<4x1x2xf32>
    %91 = arith.mulf %89, %90 : vector<4x1x2xf32>
    %92 = vector.broadcast %17 : vector<1x1x2xf32> to vector<4x1x2xf32>
    %93 = arith.addf %92, %91 : vector<4x1x2xf32>
    %94 = vector.broadcast %83 : vector<4x1x1xf32> to vector<4x1x2xf32>
    %95 = vector.broadcast %6 : vector<1x1x2xf32> to vector<4x1x2xf32>
    %96 = arith.mulf %94, %95 : vector<4x1x2xf32>
    %97 = vector.broadcast %18 : vector<1x1x2xf32> to vector<4x1x2xf32>
    %98 = arith.addf %97, %96 : vector<4x1x2xf32>
    %99 = vector.broadcast %83 : vector<4x1x1xf32> to vector<4x1x2xf32>
    %100 = vector.broadcast %7 : vector<1x1x2xf32> to vector<4x1x2xf32>
    %101 = arith.mulf %99, %100 : vector<4x1x2xf32>
    %102 = vector.broadcast %19 : vector<1x1x2xf32> to vector<4x1x2xf32>
    %103 = arith.addf %102, %101 : vector<4x1x2xf32>
    %104 = vector.extract_strided_slice %0 {offsets = [0, 4, 0], sizes = [4, 1, 1], strides = [1, 1, 1]} : vector<4x8x1xf32> to vector<4x1x1xf32>
    %105 = vector.broadcast %104 : vector<4x1x1xf32> to vector<4x1x2xf32>
    %106 = vector.broadcast %4 : vector<1x1x2xf32> to vector<4x1x2xf32>
    %107 = arith.mulf %105, %106 : vector<4x1x2xf32>
    %108 = vector.broadcast %16 : vector<1x1x2xf32> to vector<4x1x2xf32>
    %109 = arith.addf %108, %107 : vector<4x1x2xf32>
    %110 = vector.broadcast %104 : vector<4x1x1xf32> to vector<4x1x2xf32>
    %111 = vector.broadcast %5 : vector<1x1x2xf32> to vector<4x1x2xf32>
    %112 = arith.mulf %110, %111 : vector<4x1x2xf32>
    %113 = vector.broadcast %17 : vector<1x1x2xf32> to vector<4x1x2xf32>
    %114 = arith.addf %113, %112 : vector<4x1x2xf32>
    %115 = vector.broadcast %104 : vector<4x1x1xf32> to vector<4x1x2xf32>
    %116 = vector.broadcast %6 : vector<1x1x2xf32> to vector<4x1x2xf32>
    %117 = arith.mulf %115, %116 : vector<4x1x2xf32>
    %118 = vector.broadcast %18 : vector<1x1x2xf32> to vector<4x1x2xf32>
    %119 = arith.addf %118, %117 : vector<4x1x2xf32>
    %120 = vector.broadcast %104 : vector<4x1x1xf32> to vector<4x1x2xf32>
    %121 = vector.broadcast %7 : vector<1x1x2xf32> to vector<4x1x2xf32>
    %122 = arith.mulf %120, %121 : vector<4x1x2xf32>
    %123 = vector.broadcast %19 : vector<1x1x2xf32> to vector<4x1x2xf32>
    %124 = arith.addf %123, %122 : vector<4x1x2xf32>
    %125 = vector.extract_strided_slice %0 {offsets = [0, 5, 0], sizes = [4, 1, 1], strides = [1, 1, 1]} : vector<4x8x1xf32> to vector<4x1x1xf32>
    %126 = vector.broadcast %125 : vector<4x1x1xf32> to vector<4x1x2xf32>
    %127 = vector.broadcast %4 : vector<1x1x2xf32> to vector<4x1x2xf32>
    %128 = arith.mulf %126, %127 : vector<4x1x2xf32>
    %129 = vector.broadcast %16 : vector<1x1x2xf32> to vector<4x1x2xf32>
    %130 = arith.addf %129, %128 : vector<4x1x2xf32>
    %131 = vector.broadcast %125 : vector<4x1x1xf32> to vector<4x1x2xf32>
    %132 = vector.broadcast %5 : vector<1x1x2xf32> to vector<4x1x2xf32>
    %133 = arith.mulf %131, %132 : vector<4x1x2xf32>
    %134 = vector.broadcast %17 : vector<1x1x2xf32> to vector<4x1x2xf32>
    %135 = arith.addf %134, %133 : vector<4x1x2xf32>
    %136 = vector.broadcast %125 : vector<4x1x1xf32> to vector<4x1x2xf32>
    %137 = vector.broadcast %6 : vector<1x1x2xf32> to vector<4x1x2xf32>
    %138 = arith.mulf %136, %137 : vector<4x1x2xf32>
    %139 = vector.broadcast %18 : vector<1x1x2xf32> to vector<4x1x2xf32>
    %140 = arith.addf %139, %138 : vector<4x1x2xf32>
    %141 = vector.broadcast %125 : vector<4x1x1xf32> to vector<4x1x2xf32>
    %142 = vector.broadcast %7 : vector<1x1x2xf32> to vector<4x1x2xf32>
    %143 = arith.mulf %141, %142 : vector<4x1x2xf32>
    %144 = vector.broadcast %19 : vector<1x1x2xf32> to vector<4x1x2xf32>
    %145 = arith.addf %144, %143 : vector<4x1x2xf32>
    %146 = vector.extract_strided_slice %0 {offsets = [0, 6, 0], sizes = [4, 1, 1], strides = [1, 1, 1]} : vector<4x8x1xf32> to vector<4x1x1xf32>
    %147 = vector.broadcast %146 : vector<4x1x1xf32> to vector<4x1x2xf32>
    %148 = vector.broadcast %4 : vector<1x1x2xf32> to vector<4x1x2xf32>
    %149 = arith.mulf %147, %148 : vector<4x1x2xf32>
    %150 = vector.broadcast %16 : vector<1x1x2xf32> to vector<4x1x2xf32>
    %151 = arith.addf %150, %149 : vector<4x1x2xf32>
    %152 = vector.broadcast %146 : vector<4x1x1xf32> to vector<4x1x2xf32>
    %153 = vector.broadcast %5 : vector<1x1x2xf32> to vector<4x1x2xf32>
    %154 = arith.mulf %152, %153 : vector<4x1x2xf32>
    %155 = vector.broadcast %17 : vector<1x1x2xf32> to vector<4x1x2xf32>
    %156 = arith.addf %155, %154 : vector<4x1x2xf32>
    %157 = vector.broadcast %146 : vector<4x1x1xf32> to vector<4x1x2xf32>
    %158 = vector.broadcast %6 : vector<1x1x2xf32> to vector<4x1x2xf32>
    %159 = arith.mulf %157, %158 : vector<4x1x2xf32>
    %160 = vector.broadcast %18 : vector<1x1x2xf32> to vector<4x1x2xf32>
    %161 = arith.addf %160, %159 : vector<4x1x2xf32>
    %162 = vector.broadcast %146 : vector<4x1x1xf32> to vector<4x1x2xf32>
    %163 = vector.broadcast %7 : vector<1x1x2xf32> to vector<4x1x2xf32>
    %164 = arith.mulf %162, %163 : vector<4x1x2xf32>
    %165 = vector.broadcast %19 : vector<1x1x2xf32> to vector<4x1x2xf32>
    %166 = arith.addf %165, %164 : vector<4x1x2xf32>
    %167 = vector.extract_strided_slice %0 {offsets = [0, 7, 0], sizes = [4, 1, 1], strides = [1, 1, 1]} : vector<4x8x1xf32> to vector<4x1x1xf32>
    %168 = vector.broadcast %167 : vector<4x1x1xf32> to vector<4x1x2xf32>
    %169 = vector.broadcast %4 : vector<1x1x2xf32> to vector<4x1x2xf32>
    %170 = arith.mulf %168, %169 : vector<4x1x2xf32>
    %171 = vector.broadcast %16 : vector<1x1x2xf32> to vector<4x1x2xf32>
    %172 = arith.addf %171, %170 : vector<4x1x2xf32>
    %173 = vector.broadcast %167 : vector<4x1x1xf32> to vector<4x1x2xf32>
    %174 = vector.broadcast %5 : vector<1x1x2xf32> to vector<4x1x2xf32>
    %175 = arith.mulf %173, %174 : vector<4x1x2xf32>
    %176 = vector.broadcast %17 : vector<1x1x2xf32> to vector<4x1x2xf32>
    %177 = arith.addf %176, %175 : vector<4x1x2xf32>
    %178 = vector.broadcast %167 : vector<4x1x1xf32> to vector<4x1x2xf32>
    %179 = vector.broadcast %6 : vector<1x1x2xf32> to vector<4x1x2xf32>
    %180 = arith.mulf %178, %179 : vector<4x1x2xf32>
    %181 = vector.broadcast %18 : vector<1x1x2xf32> to vector<4x1x2xf32>
    %182 = arith.addf %181, %180 : vector<4x1x2xf32>
    %183 = vector.broadcast %167 : vector<4x1x1xf32> to vector<4x1x2xf32>
    %184 = vector.broadcast %7 : vector<1x1x2xf32> to vector<4x1x2xf32>
    %185 = arith.mulf %183, %184 : vector<4x1x2xf32>
    %186 = vector.broadcast %19 : vector<1x1x2xf32> to vector<4x1x2xf32>
    %187 = arith.addf %186, %185 : vector<4x1x2xf32>
    %cst = arith.constant 0.000000e+00 : f32
    %188 = vector.broadcast %cst : f32 to vector<4x1x2xf32>
    %cst_11 = arith.constant 0.000000e+00 : f32
    %189 = vector.broadcast %cst_11 : f32 to vector<4x1x2xf32>
    %190 = vector.extract_strided_slice %188 {offsets = [0, 0, 0], sizes = [4, 1, 1], strides = [1, 1, 1]} : vector<4x1x2xf32> to vector<4x1x1xf32>
    %191 = vector.extract_strided_slice %188 {offsets = [0, 0, 1], sizes = [4, 1, 1], strides = [1, 1, 1]} : vector<4x1x2xf32> to vector<4x1x1xf32>
    %192 = vector.broadcast %190 : vector<4x1x1xf32> to vector<4x1x2xf32>
    %193 = vector.broadcast %8 : vector<1x1x2xf32> to vector<4x1x2xf32>
    %194 = arith.mulf %192, %193 : vector<4x1x2xf32>
    %195 = arith.addf %25, %194 : vector<4x1x2xf32>
    %196 = vector.broadcast %191 : vector<4x1x1xf32> to vector<4x1x2xf32>
    %197 = vector.broadcast %9 : vector<1x1x2xf32> to vector<4x1x2xf32>
    %198 = arith.mulf %196, %197 : vector<4x1x2xf32>
    %199 = arith.addf %195, %198 : vector<4x1x2xf32>
    %200 = vector.broadcast %190 : vector<4x1x1xf32> to vector<4x1x2xf32>
    %201 = vector.broadcast %10 : vector<1x1x2xf32> to vector<4x1x2xf32>
    %202 = arith.mulf %200, %201 : vector<4x1x2xf32>
    %203 = arith.addf %30, %202 : vector<4x1x2xf32>
    %204 = vector.broadcast %191 : vector<4x1x1xf32> to vector<4x1x2xf32>
    %205 = vector.broadcast %11 : vector<1x1x2xf32> to vector<4x1x2xf32>
    %206 = arith.mulf %204, %205 : vector<4x1x2xf32>
    %207 = arith.addf %203, %206 : vector<4x1x2xf32>
    %208 = vector.broadcast %190 : vector<4x1x1xf32> to vector<4x1x2xf32>
    %209 = vector.broadcast %12 : vector<1x1x2xf32> to vector<4x1x2xf32>
    %210 = arith.mulf %208, %209 : vector<4x1x2xf32>
    %211 = arith.addf %35, %210 : vector<4x1x2xf32>
    %212 = vector.broadcast %191 : vector<4x1x1xf32> to vector<4x1x2xf32>
    %213 = vector.broadcast %13 : vector<1x1x2xf32> to vector<4x1x2xf32>
    %214 = arith.mulf %212, %213 : vector<4x1x2xf32>
    %215 = arith.addf %211, %214 : vector<4x1x2xf32>
    %216 = vector.broadcast %190 : vector<4x1x1xf32> to vector<4x1x2xf32>
    %217 = vector.broadcast %14 : vector<1x1x2xf32> to vector<4x1x2xf32>
    %218 = arith.mulf %216, %217 : vector<4x1x2xf32>
    %219 = arith.addf %40, %218 : vector<4x1x2xf32>
    %220 = vector.broadcast %191 : vector<4x1x1xf32> to vector<4x1x2xf32>
    %221 = vector.broadcast %15 : vector<1x1x2xf32> to vector<4x1x2xf32>
    %222 = arith.mulf %220, %221 : vector<4x1x2xf32>
    %223 = arith.addf %219, %222 : vector<4x1x2xf32>
    %224 = arith.negf %199 : vector<4x1x2xf32>
    %225 = math.exp %224 : vector<4x1x2xf32>
    %cst_12 = arith.constant 1.000000e+00 : f32
    %226 = vector.broadcast %cst_12 : f32 to vector<4x1x2xf32>
    %227 = arith.addf %226, %225 : vector<4x1x2xf32>
    %228 = arith.divf %226, %227 : vector<4x1x2xf32>
    %229 = arith.negf %207 : vector<4x1x2xf32>
    %230 = math.exp %229 : vector<4x1x2xf32>
    %cst_13 = arith.constant 1.000000e+00 : f32
    %231 = vector.broadcast %cst_13 : f32 to vector<4x1x2xf32>
    %232 = arith.addf %231, %230 : vector<4x1x2xf32>
    %233 = arith.divf %231, %232 : vector<4x1x2xf32>
    %234 = math.tanh %215 : vector<4x1x2xf32>
    %235 = arith.negf %223 : vector<4x1x2xf32>
    %236 = math.exp %235 : vector<4x1x2xf32>
    %cst_14 = arith.constant 1.000000e+00 : f32
    %237 = vector.broadcast %cst_14 : f32 to vector<4x1x2xf32>
    %238 = arith.addf %237, %236 : vector<4x1x2xf32>
    %239 = arith.divf %237, %238 : vector<4x1x2xf32>
    %240 = arith.mulf %233, %189 : vector<4x1x2xf32>
    %241 = arith.mulf %228, %234 : vector<4x1x2xf32>
    %242 = arith.addf %240, %241 : vector<4x1x2xf32>
    %243 = math.tanh %242 : vector<4x1x2xf32>
    %244 = arith.mulf %239, %243 : vector<4x1x2xf32>
    %245 = vector.extract_strided_slice %244 {offsets = [0, 0, 0], sizes = [4, 1, 1], strides = [1, 1, 1]} : vector<4x1x2xf32> to vector<4x1x1xf32>
    %246 = vector.extract_strided_slice %244 {offsets = [0, 0, 1], sizes = [4, 1, 1], strides = [1, 1, 1]} : vector<4x1x2xf32> to vector<4x1x1xf32>
    %247 = vector.broadcast %245 : vector<4x1x1xf32> to vector<4x1x2xf32>
    %248 = vector.broadcast %8 : vector<1x1x2xf32> to vector<4x1x2xf32>
    %249 = arith.mulf %247, %248 : vector<4x1x2xf32>
    %250 = arith.addf %46, %249 : vector<4x1x2xf32>
    %251 = vector.broadcast %246 : vector<4x1x1xf32> to vector<4x1x2xf32>
    %252 = vector.broadcast %9 : vector<1x1x2xf32> to vector<4x1x2xf32>
    %253 = arith.mulf %251, %252 : vector<4x1x2xf32>
    %254 = arith.addf %250, %253 : vector<4x1x2xf32>
    %255 = vector.broadcast %245 : vector<4x1x1xf32> to vector<4x1x2xf32>
    %256 = vector.broadcast %10 : vector<1x1x2xf32> to vector<4x1x2xf32>
    %257 = arith.mulf %255, %256 : vector<4x1x2xf32>
    %258 = arith.addf %51, %257 : vector<4x1x2xf32>
    %259 = vector.broadcast %246 : vector<4x1x1xf32> to vector<4x1x2xf32>
    %260 = vector.broadcast %11 : vector<1x1x2xf32> to vector<4x1x2xf32>
    %261 = arith.mulf %259, %260 : vector<4x1x2xf32>
    %262 = arith.addf %258, %261 : vector<4x1x2xf32>
    %263 = vector.broadcast %245 : vector<4x1x1xf32> to vector<4x1x2xf32>
    %264 = vector.broadcast %12 : vector<1x1x2xf32> to vector<4x1x2xf32>
    %265 = arith.mulf %263, %264 : vector<4x1x2xf32>
    %266 = arith.addf %56, %265 : vector<4x1x2xf32>
    %267 = vector.broadcast %246 : vector<4x1x1xf32> to vector<4x1x2xf32>
    %268 = vector.broadcast %13 : vector<1x1x2xf32> to vector<4x1x2xf32>
    %269 = arith.mulf %267, %268 : vector<4x1x2xf32>
    %270 = arith.addf %266, %269 : vector<4x1x2xf32>
    %271 = vector.broadcast %245 : vector<4x1x1xf32> to vector<4x1x2xf32>
    %272 = vector.broadcast %14 : vector<1x1x2xf32> to vector<4x1x2xf32>
    %273 = arith.mulf %271, %272 : vector<4x1x2xf32>
    %274 = arith.addf %61, %273 : vector<4x1x2xf32>
    %275 = vector.broadcast %246 : vector<4x1x1xf32> to vector<4x1x2xf32>
    %276 = vector.broadcast %15 : vector<1x1x2xf32> to vector<4x1x2xf32>
    %277 = arith.mulf %275, %276 : vector<4x1x2xf32>
    %278 = arith.addf %274, %277 : vector<4x1x2xf32>
    %279 = arith.negf %254 : vector<4x1x2xf32>
    %280 = math.exp %279 : vector<4x1x2xf32>
    %cst_15 = arith.constant 1.000000e+00 : f32
    %281 = vector.broadcast %cst_15 : f32 to vector<4x1x2xf32>
    %282 = arith.addf %281, %280 : vector<4x1x2xf32>
    %283 = arith.divf %281, %282 : vector<4x1x2xf32>
    %284 = arith.negf %262 : vector<4x1x2xf32>
    %285 = math.exp %284 : vector<4x1x2xf32>
    %cst_16 = arith.constant 1.000000e+00 : f32
    %286 = vector.broadcast %cst_16 : f32 to vector<4x1x2xf32>
    %287 = arith.addf %286, %285 : vector<4x1x2xf32>
    %288 = arith.divf %286, %287 : vector<4x1x2xf32>
    %289 = math.tanh %270 : vector<4x1x2xf32>
    %290 = arith.negf %278 : vector<4x1x2xf32>
    %291 = math.exp %290 : vector<4x1x2xf32>
    %cst_17 = arith.constant 1.000000e+00 : f32
    %292 = vector.broadcast %cst_17 : f32 to vector<4x1x2xf32>
    %293 = arith.addf %292, %291 : vector<4x1x2xf32>
    %294 = arith.divf %292, %293 : vector<4x1x2xf32>
    %295 = arith.mulf %288, %242 : vector<4x1x2xf32>
    %296 = arith.mulf %283, %289 : vector<4x1x2xf32>
    %297 = arith.addf %295, %296 : vector<4x1x2xf32>
    %298 = math.tanh %297 : vector<4x1x2xf32>
    %299 = arith.mulf %294, %298 : vector<4x1x2xf32>
    %300 = vector.extract_strided_slice %299 {offsets = [0, 0, 0], sizes = [4, 1, 1], strides = [1, 1, 1]} : vector<4x1x2xf32> to vector<4x1x1xf32>
    %301 = vector.extract_strided_slice %299 {offsets = [0, 0, 1], sizes = [4, 1, 1], strides = [1, 1, 1]} : vector<4x1x2xf32> to vector<4x1x1xf32>
    %302 = vector.broadcast %300 : vector<4x1x1xf32> to vector<4x1x2xf32>
    %303 = vector.broadcast %8 : vector<1x1x2xf32> to vector<4x1x2xf32>
    %304 = arith.mulf %302, %303 : vector<4x1x2xf32>
    %305 = arith.addf %67, %304 : vector<4x1x2xf32>
    %306 = vector.broadcast %301 : vector<4x1x1xf32> to vector<4x1x2xf32>
    %307 = vector.broadcast %9 : vector<1x1x2xf32> to vector<4x1x2xf32>
    %308 = arith.mulf %306, %307 : vector<4x1x2xf32>
    %309 = arith.addf %305, %308 : vector<4x1x2xf32>
    %310 = vector.broadcast %300 : vector<4x1x1xf32> to vector<4x1x2xf32>
    %311 = vector.broadcast %10 : vector<1x1x2xf32> to vector<4x1x2xf32>
    %312 = arith.mulf %310, %311 : vector<4x1x2xf32>
    %313 = arith.addf %72, %312 : vector<4x1x2xf32>
    %314 = vector.broadcast %301 : vector<4x1x1xf32> to vector<4x1x2xf32>
    %315 = vector.broadcast %11 : vector<1x1x2xf32> to vector<4x1x2xf32>
    %316 = arith.mulf %314, %315 : vector<4x1x2xf32>
    %317 = arith.addf %313, %316 : vector<4x1x2xf32>
    %318 = vector.broadcast %300 : vector<4x1x1xf32> to vector<4x1x2xf32>
    %319 = vector.broadcast %12 : vector<1x1x2xf32> to vector<4x1x2xf32>
    %320 = arith.mulf %318, %319 : vector<4x1x2xf32>
    %321 = arith.addf %77, %320 : vector<4x1x2xf32>
    %322 = vector.broadcast %301 : vector<4x1x1xf32> to vector<4x1x2xf32>
    %323 = vector.broadcast %13 : vector<1x1x2xf32> to vector<4x1x2xf32>
    %324 = arith.mulf %322, %323 : vector<4x1x2xf32>
    %325 = arith.addf %321, %324 : vector<4x1x2xf32>
    %326 = vector.broadcast %300 : vector<4x1x1xf32> to vector<4x1x2xf32>
    %327 = vector.broadcast %14 : vector<1x1x2xf32> to vector<4x1x2xf32>
    %328 = arith.mulf %326, %327 : vector<4x1x2xf32>
    %329 = arith.addf %82, %328 : vector<4x1x2xf32>
    %330 = vector.broadcast %301 : vector<4x1x1xf32> to vector<4x1x2xf32>
    %331 = vector.broadcast %15 : vector<1x1x2xf32> to vector<4x1x2xf32>
    %332 = arith.mulf %330, %331 : vector<4x1x2xf32>
    %333 = arith.addf %329, %332 : vector<4x1x2xf32>
    %334 = arith.negf %309 : vector<4x1x2xf32>
    %335 = math.exp %334 : vector<4x1x2xf32>
    %cst_18 = arith.constant 1.000000e+00 : f32
    %336 = vector.broadcast %cst_18 : f32 to vector<4x1x2xf32>
    %337 = arith.addf %336, %335 : vector<4x1x2xf32>
    %338 = arith.divf %336, %337 : vector<4x1x2xf32>
    %339 = arith.negf %317 : vector<4x1x2xf32>
    %340 = math.exp %339 : vector<4x1x2xf32>
    %cst_19 = arith.constant 1.000000e+00 : f32
    %341 = vector.broadcast %cst_19 : f32 to vector<4x1x2xf32>
    %342 = arith.addf %341, %340 : vector<4x1x2xf32>
    %343 = arith.divf %341, %342 : vector<4x1x2xf32>
    %344 = math.tanh %325 : vector<4x1x2xf32>
    %345 = arith.negf %333 : vector<4x1x2xf32>
    %346 = math.exp %345 : vector<4x1x2xf32>
    %cst_20 = arith.constant 1.000000e+00 : f32
    %347 = vector.broadcast %cst_20 : f32 to vector<4x1x2xf32>
    %348 = arith.addf %347, %346 : vector<4x1x2xf32>
    %349 = arith.divf %347, %348 : vector<4x1x2xf32>
    %350 = arith.mulf %343, %297 : vector<4x1x2xf32>
    %351 = arith.mulf %338, %344 : vector<4x1x2xf32>
    %352 = arith.addf %350, %351 : vector<4x1x2xf32>
    %353 = math.tanh %352 : vector<4x1x2xf32>
    %354 = arith.mulf %349, %353 : vector<4x1x2xf32>
    %355 = vector.extract_strided_slice %354 {offsets = [0, 0, 0], sizes = [4, 1, 1], strides = [1, 1, 1]} : vector<4x1x2xf32> to vector<4x1x1xf32>
    %356 = vector.extract_strided_slice %354 {offsets = [0, 0, 1], sizes = [4, 1, 1], strides = [1, 1, 1]} : vector<4x1x2xf32> to vector<4x1x1xf32>
    %357 = vector.broadcast %355 : vector<4x1x1xf32> to vector<4x1x2xf32>
    %358 = vector.broadcast %8 : vector<1x1x2xf32> to vector<4x1x2xf32>
    %359 = arith.mulf %357, %358 : vector<4x1x2xf32>
    %360 = arith.addf %88, %359 : vector<4x1x2xf32>
    %361 = vector.broadcast %356 : vector<4x1x1xf32> to vector<4x1x2xf32>
    %362 = vector.broadcast %9 : vector<1x1x2xf32> to vector<4x1x2xf32>
    %363 = arith.mulf %361, %362 : vector<4x1x2xf32>
    %364 = arith.addf %360, %363 : vector<4x1x2xf32>
    %365 = vector.broadcast %355 : vector<4x1x1xf32> to vector<4x1x2xf32>
    %366 = vector.broadcast %10 : vector<1x1x2xf32> to vector<4x1x2xf32>
    %367 = arith.mulf %365, %366 : vector<4x1x2xf32>
    %368 = arith.addf %93, %367 : vector<4x1x2xf32>
    %369 = vector.broadcast %356 : vector<4x1x1xf32> to vector<4x1x2xf32>
    %370 = vector.broadcast %11 : vector<1x1x2xf32> to vector<4x1x2xf32>
    %371 = arith.mulf %369, %370 : vector<4x1x2xf32>
    %372 = arith.addf %368, %371 : vector<4x1x2xf32>
    %373 = vector.broadcast %355 : vector<4x1x1xf32> to vector<4x1x2xf32>
    %374 = vector.broadcast %12 : vector<1x1x2xf32> to vector<4x1x2xf32>
    %375 = arith.mulf %373, %374 : vector<4x1x2xf32>
    %376 = arith.addf %98, %375 : vector<4x1x2xf32>
    %377 = vector.broadcast %356 : vector<4x1x1xf32> to vector<4x1x2xf32>
    %378 = vector.broadcast %13 : vector<1x1x2xf32> to vector<4x1x2xf32>
    %379 = arith.mulf %377, %378 : vector<4x1x2xf32>
    %380 = arith.addf %376, %379 : vector<4x1x2xf32>
    %381 = vector.broadcast %355 : vector<4x1x1xf32> to vector<4x1x2xf32>
    %382 = vector.broadcast %14 : vector<1x1x2xf32> to vector<4x1x2xf32>
    %383 = arith.mulf %381, %382 : vector<4x1x2xf32>
    %384 = arith.addf %103, %383 : vector<4x1x2xf32>
    %385 = vector.broadcast %356 : vector<4x1x1xf32> to vector<4x1x2xf32>
    %386 = vector.broadcast %15 : vector<1x1x2xf32> to vector<4x1x2xf32>
    %387 = arith.mulf %385, %386 : vector<4x1x2xf32>
    %388 = arith.addf %384, %387 : vector<4x1x2xf32>
    %389 = arith.negf %364 : vector<4x1x2xf32>
    %390 = math.exp %389 : vector<4x1x2xf32>
    %cst_21 = arith.constant 1.000000e+00 : f32
    %391 = vector.broadcast %cst_21 : f32 to vector<4x1x2xf32>
    %392 = arith.addf %391, %390 : vector<4x1x2xf32>
    %393 = arith.divf %391, %392 : vector<4x1x2xf32>
    %394 = arith.negf %372 : vector<4x1x2xf32>
    %395 = math.exp %394 : vector<4x1x2xf32>
    %cst_22 = arith.constant 1.000000e+00 : f32
    %396 = vector.broadcast %cst_22 : f32 to vector<4x1x2xf32>
    %397 = arith.addf %396, %395 : vector<4x1x2xf32>
    %398 = arith.divf %396, %397 : vector<4x1x2xf32>
    %399 = math.tanh %380 : vector<4x1x2xf32>
    %400 = arith.negf %388 : vector<4x1x2xf32>
    %401 = math.exp %400 : vector<4x1x2xf32>
    %cst_23 = arith.constant 1.000000e+00 : f32
    %402 = vector.broadcast %cst_23 : f32 to vector<4x1x2xf32>
    %403 = arith.addf %402, %401 : vector<4x1x2xf32>
    %404 = arith.divf %402, %403 : vector<4x1x2xf32>
    %405 = arith.mulf %398, %352 : vector<4x1x2xf32>
    %406 = arith.mulf %393, %399 : vector<4x1x2xf32>
    %407 = arith.addf %405, %406 : vector<4x1x2xf32>
    %408 = math.tanh %407 : vector<4x1x2xf32>
    %409 = arith.mulf %404, %408 : vector<4x1x2xf32>
    %410 = vector.extract_strided_slice %409 {offsets = [0, 0, 0], sizes = [4, 1, 1], strides = [1, 1, 1]} : vector<4x1x2xf32> to vector<4x1x1xf32>
    %411 = vector.extract_strided_slice %409 {offsets = [0, 0, 1], sizes = [4, 1, 1], strides = [1, 1, 1]} : vector<4x1x2xf32> to vector<4x1x1xf32>
    %412 = vector.broadcast %410 : vector<4x1x1xf32> to vector<4x1x2xf32>
    %413 = vector.broadcast %8 : vector<1x1x2xf32> to vector<4x1x2xf32>
    %414 = arith.mulf %412, %413 : vector<4x1x2xf32>
    %415 = arith.addf %109, %414 : vector<4x1x2xf32>
    %416 = vector.broadcast %411 : vector<4x1x1xf32> to vector<4x1x2xf32>
    %417 = vector.broadcast %9 : vector<1x1x2xf32> to vector<4x1x2xf32>
    %418 = arith.mulf %416, %417 : vector<4x1x2xf32>
    %419 = arith.addf %415, %418 : vector<4x1x2xf32>
    %420 = vector.broadcast %410 : vector<4x1x1xf32> to vector<4x1x2xf32>
    %421 = vector.broadcast %10 : vector<1x1x2xf32> to vector<4x1x2xf32>
    %422 = arith.mulf %420, %421 : vector<4x1x2xf32>
    %423 = arith.addf %114, %422 : vector<4x1x2xf32>
    %424 = vector.broadcast %411 : vector<4x1x1xf32> to vector<4x1x2xf32>
    %425 = vector.broadcast %11 : vector<1x1x2xf32> to vector<4x1x2xf32>
    %426 = arith.mulf %424, %425 : vector<4x1x2xf32>
    %427 = arith.addf %423, %426 : vector<4x1x2xf32>
    %428 = vector.broadcast %410 : vector<4x1x1xf32> to vector<4x1x2xf32>
    %429 = vector.broadcast %12 : vector<1x1x2xf32> to vector<4x1x2xf32>
    %430 = arith.mulf %428, %429 : vector<4x1x2xf32>
    %431 = arith.addf %119, %430 : vector<4x1x2xf32>
    %432 = vector.broadcast %411 : vector<4x1x1xf32> to vector<4x1x2xf32>
    %433 = vector.broadcast %13 : vector<1x1x2xf32> to vector<4x1x2xf32>
    %434 = arith.mulf %432, %433 : vector<4x1x2xf32>
    %435 = arith.addf %431, %434 : vector<4x1x2xf32>
    %436 = vector.broadcast %410 : vector<4x1x1xf32> to vector<4x1x2xf32>
    %437 = vector.broadcast %14 : vector<1x1x2xf32> to vector<4x1x2xf32>
    %438 = arith.mulf %436, %437 : vector<4x1x2xf32>
    %439 = arith.addf %124, %438 : vector<4x1x2xf32>
    %440 = vector.broadcast %411 : vector<4x1x1xf32> to vector<4x1x2xf32>
    %441 = vector.broadcast %15 : vector<1x1x2xf32> to vector<4x1x2xf32>
    %442 = arith.mulf %440, %441 : vector<4x1x2xf32>
    %443 = arith.addf %439, %442 : vector<4x1x2xf32>
    %444 = arith.negf %419 : vector<4x1x2xf32>
    %445 = math.exp %444 : vector<4x1x2xf32>
    %cst_24 = arith.constant 1.000000e+00 : f32
    %446 = vector.broadcast %cst_24 : f32 to vector<4x1x2xf32>
    %447 = arith.addf %446, %445 : vector<4x1x2xf32>
    %448 = arith.divf %446, %447 : vector<4x1x2xf32>
    %449 = arith.negf %427 : vector<4x1x2xf32>
    %450 = math.exp %449 : vector<4x1x2xf32>
    %cst_25 = arith.constant 1.000000e+00 : f32
    %451 = vector.broadcast %cst_25 : f32 to vector<4x1x2xf32>
    %452 = arith.addf %451, %450 : vector<4x1x2xf32>
    %453 = arith.divf %451, %452 : vector<4x1x2xf32>
    %454 = math.tanh %435 : vector<4x1x2xf32>
    %455 = arith.negf %443 : vector<4x1x2xf32>
    %456 = math.exp %455 : vector<4x1x2xf32>
    %cst_26 = arith.constant 1.000000e+00 : f32
    %457 = vector.broadcast %cst_26 : f32 to vector<4x1x2xf32>
    %458 = arith.addf %457, %456 : vector<4x1x2xf32>
    %459 = arith.divf %457, %458 : vector<4x1x2xf32>
    %460 = arith.mulf %453, %407 : vector<4x1x2xf32>
    %461 = arith.mulf %448, %454 : vector<4x1x2xf32>
    %462 = arith.addf %460, %461 : vector<4x1x2xf32>
    %463 = math.tanh %462 : vector<4x1x2xf32>
    %464 = arith.mulf %459, %463 : vector<4x1x2xf32>
    %465 = vector.extract_strided_slice %464 {offsets = [0, 0, 0], sizes = [4, 1, 1], strides = [1, 1, 1]} : vector<4x1x2xf32> to vector<4x1x1xf32>
    %466 = vector.extract_strided_slice %464 {offsets = [0, 0, 1], sizes = [4, 1, 1], strides = [1, 1, 1]} : vector<4x1x2xf32> to vector<4x1x1xf32>
    %467 = vector.broadcast %465 : vector<4x1x1xf32> to vector<4x1x2xf32>
    %468 = vector.broadcast %8 : vector<1x1x2xf32> to vector<4x1x2xf32>
    %469 = arith.mulf %467, %468 : vector<4x1x2xf32>
    %470 = arith.addf %130, %469 : vector<4x1x2xf32>
    %471 = vector.broadcast %466 : vector<4x1x1xf32> to vector<4x1x2xf32>
    %472 = vector.broadcast %9 : vector<1x1x2xf32> to vector<4x1x2xf32>
    %473 = arith.mulf %471, %472 : vector<4x1x2xf32>
    %474 = arith.addf %470, %473 : vector<4x1x2xf32>
    %475 = vector.broadcast %465 : vector<4x1x1xf32> to vector<4x1x2xf32>
    %476 = vector.broadcast %10 : vector<1x1x2xf32> to vector<4x1x2xf32>
    %477 = arith.mulf %475, %476 : vector<4x1x2xf32>
    %478 = arith.addf %135, %477 : vector<4x1x2xf32>
    %479 = vector.broadcast %466 : vector<4x1x1xf32> to vector<4x1x2xf32>
    %480 = vector.broadcast %11 : vector<1x1x2xf32> to vector<4x1x2xf32>
    %481 = arith.mulf %479, %480 : vector<4x1x2xf32>
    %482 = arith.addf %478, %481 : vector<4x1x2xf32>
    %483 = vector.broadcast %465 : vector<4x1x1xf32> to vector<4x1x2xf32>
    %484 = vector.broadcast %12 : vector<1x1x2xf32> to vector<4x1x2xf32>
    %485 = arith.mulf %483, %484 : vector<4x1x2xf32>
    %486 = arith.addf %140, %485 : vector<4x1x2xf32>
    %487 = vector.broadcast %466 : vector<4x1x1xf32> to vector<4x1x2xf32>
    %488 = vector.broadcast %13 : vector<1x1x2xf32> to vector<4x1x2xf32>
    %489 = arith.mulf %487, %488 : vector<4x1x2xf32>
    %490 = arith.addf %486, %489 : vector<4x1x2xf32>
    %491 = vector.broadcast %465 : vector<4x1x1xf32> to vector<4x1x2xf32>
    %492 = vector.broadcast %14 : vector<1x1x2xf32> to vector<4x1x2xf32>
    %493 = arith.mulf %491, %492 : vector<4x1x2xf32>
    %494 = arith.addf %145, %493 : vector<4x1x2xf32>
    %495 = vector.broadcast %466 : vector<4x1x1xf32> to vector<4x1x2xf32>
    %496 = vector.broadcast %15 : vector<1x1x2xf32> to vector<4x1x2xf32>
    %497 = arith.mulf %495, %496 : vector<4x1x2xf32>
    %498 = arith.addf %494, %497 : vector<4x1x2xf32>
    %499 = arith.negf %474 : vector<4x1x2xf32>
    %500 = math.exp %499 : vector<4x1x2xf32>
    %cst_27 = arith.constant 1.000000e+00 : f32
    %501 = vector.broadcast %cst_27 : f32 to vector<4x1x2xf32>
    %502 = arith.addf %501, %500 : vector<4x1x2xf32>
    %503 = arith.divf %501, %502 : vector<4x1x2xf32>
    %504 = arith.negf %482 : vector<4x1x2xf32>
    %505 = math.exp %504 : vector<4x1x2xf32>
    %cst_28 = arith.constant 1.000000e+00 : f32
    %506 = vector.broadcast %cst_28 : f32 to vector<4x1x2xf32>
    %507 = arith.addf %506, %505 : vector<4x1x2xf32>
    %508 = arith.divf %506, %507 : vector<4x1x2xf32>
    %509 = math.tanh %490 : vector<4x1x2xf32>
    %510 = arith.negf %498 : vector<4x1x2xf32>
    %511 = math.exp %510 : vector<4x1x2xf32>
    %cst_29 = arith.constant 1.000000e+00 : f32
    %512 = vector.broadcast %cst_29 : f32 to vector<4x1x2xf32>
    %513 = arith.addf %512, %511 : vector<4x1x2xf32>
    %514 = arith.divf %512, %513 : vector<4x1x2xf32>
    %515 = arith.mulf %508, %462 : vector<4x1x2xf32>
    %516 = arith.mulf %503, %509 : vector<4x1x2xf32>
    %517 = arith.addf %515, %516 : vector<4x1x2xf32>
    %518 = math.tanh %517 : vector<4x1x2xf32>
    %519 = arith.mulf %514, %518 : vector<4x1x2xf32>
    %520 = vector.extract_strided_slice %519 {offsets = [0, 0, 0], sizes = [4, 1, 1], strides = [1, 1, 1]} : vector<4x1x2xf32> to vector<4x1x1xf32>
    %521 = vector.extract_strided_slice %519 {offsets = [0, 0, 1], sizes = [4, 1, 1], strides = [1, 1, 1]} : vector<4x1x2xf32> to vector<4x1x1xf32>
    %522 = vector.broadcast %520 : vector<4x1x1xf32> to vector<4x1x2xf32>
    %523 = vector.broadcast %8 : vector<1x1x2xf32> to vector<4x1x2xf32>
    %524 = arith.mulf %522, %523 : vector<4x1x2xf32>
    %525 = arith.addf %151, %524 : vector<4x1x2xf32>
    %526 = vector.broadcast %521 : vector<4x1x1xf32> to vector<4x1x2xf32>
    %527 = vector.broadcast %9 : vector<1x1x2xf32> to vector<4x1x2xf32>
    %528 = arith.mulf %526, %527 : vector<4x1x2xf32>
    %529 = arith.addf %525, %528 : vector<4x1x2xf32>
    %530 = vector.broadcast %520 : vector<4x1x1xf32> to vector<4x1x2xf32>
    %531 = vector.broadcast %10 : vector<1x1x2xf32> to vector<4x1x2xf32>
    %532 = arith.mulf %530, %531 : vector<4x1x2xf32>
    %533 = arith.addf %156, %532 : vector<4x1x2xf32>
    %534 = vector.broadcast %521 : vector<4x1x1xf32> to vector<4x1x2xf32>
    %535 = vector.broadcast %11 : vector<1x1x2xf32> to vector<4x1x2xf32>
    %536 = arith.mulf %534, %535 : vector<4x1x2xf32>
    %537 = arith.addf %533, %536 : vector<4x1x2xf32>
    %538 = vector.broadcast %520 : vector<4x1x1xf32> to vector<4x1x2xf32>
    %539 = vector.broadcast %12 : vector<1x1x2xf32> to vector<4x1x2xf32>
    %540 = arith.mulf %538, %539 : vector<4x1x2xf32>
    %541 = arith.addf %161, %540 : vector<4x1x2xf32>
    %542 = vector.broadcast %521 : vector<4x1x1xf32> to vector<4x1x2xf32>
    %543 = vector.broadcast %13 : vector<1x1x2xf32> to vector<4x1x2xf32>
    %544 = arith.mulf %542, %543 : vector<4x1x2xf32>
    %545 = arith.addf %541, %544 : vector<4x1x2xf32>
    %546 = vector.broadcast %520 : vector<4x1x1xf32> to vector<4x1x2xf32>
    %547 = vector.broadcast %14 : vector<1x1x2xf32> to vector<4x1x2xf32>
    %548 = arith.mulf %546, %547 : vector<4x1x2xf32>
    %549 = arith.addf %166, %548 : vector<4x1x2xf32>
    %550 = vector.broadcast %521 : vector<4x1x1xf32> to vector<4x1x2xf32>
    %551 = vector.broadcast %15 : vector<1x1x2xf32> to vector<4x1x2xf32>
    %552 = arith.mulf %550, %551 : vector<4x1x2xf32>
    %553 = arith.addf %549, %552 : vector<4x1x2xf32>
    %554 = arith.negf %529 : vector<4x1x2xf32>
    %555 = math.exp %554 : vector<4x1x2xf32>
    %cst_30 = arith.constant 1.000000e+00 : f32
    %556 = vector.broadcast %cst_30 : f32 to vector<4x1x2xf32>
    %557 = arith.addf %556, %555 : vector<4x1x2xf32>
    %558 = arith.divf %556, %557 : vector<4x1x2xf32>
    %559 = arith.negf %537 : vector<4x1x2xf32>
    %560 = math.exp %559 : vector<4x1x2xf32>
    %cst_31 = arith.constant 1.000000e+00 : f32
    %561 = vector.broadcast %cst_31 : f32 to vector<4x1x2xf32>
    %562 = arith.addf %561, %560 : vector<4x1x2xf32>
    %563 = arith.divf %561, %562 : vector<4x1x2xf32>
    %564 = math.tanh %545 : vector<4x1x2xf32>
    %565 = arith.negf %553 : vector<4x1x2xf32>
    %566 = math.exp %565 : vector<4x1x2xf32>
    %cst_32 = arith.constant 1.000000e+00 : f32
    %567 = vector.broadcast %cst_32 : f32 to vector<4x1x2xf32>
    %568 = arith.addf %567, %566 : vector<4x1x2xf32>
    %569 = arith.divf %567, %568 : vector<4x1x2xf32>
    %570 = arith.mulf %563, %517 : vector<4x1x2xf32>
    %571 = arith.mulf %558, %564 : vector<4x1x2xf32>
    %572 = arith.addf %570, %571 : vector<4x1x2xf32>
    %573 = math.tanh %572 : vector<4x1x2xf32>
    %574 = arith.mulf %569, %573 : vector<4x1x2xf32>
    %575 = vector.extract_strided_slice %574 {offsets = [0, 0, 0], sizes = [4, 1, 1], strides = [1, 1, 1]} : vector<4x1x2xf32> to vector<4x1x1xf32>
    %576 = vector.extract_strided_slice %574 {offsets = [0, 0, 1], sizes = [4, 1, 1], strides = [1, 1, 1]} : vector<4x1x2xf32> to vector<4x1x1xf32>
    %577 = vector.broadcast %575 : vector<4x1x1xf32> to vector<4x1x2xf32>
    %578 = vector.broadcast %8 : vector<1x1x2xf32> to vector<4x1x2xf32>
    %579 = arith.mulf %577, %578 : vector<4x1x2xf32>
    %580 = arith.addf %172, %579 : vector<4x1x2xf32>
    %581 = vector.broadcast %576 : vector<4x1x1xf32> to vector<4x1x2xf32>
    %582 = vector.broadcast %9 : vector<1x1x2xf32> to vector<4x1x2xf32>
    %583 = arith.mulf %581, %582 : vector<4x1x2xf32>
    %584 = arith.addf %580, %583 : vector<4x1x2xf32>
    %585 = vector.broadcast %575 : vector<4x1x1xf32> to vector<4x1x2xf32>
    %586 = vector.broadcast %10 : vector<1x1x2xf32> to vector<4x1x2xf32>
    %587 = arith.mulf %585, %586 : vector<4x1x2xf32>
    %588 = arith.addf %177, %587 : vector<4x1x2xf32>
    %589 = vector.broadcast %576 : vector<4x1x1xf32> to vector<4x1x2xf32>
    %590 = vector.broadcast %11 : vector<1x1x2xf32> to vector<4x1x2xf32>
    %591 = arith.mulf %589, %590 : vector<4x1x2xf32>
    %592 = arith.addf %588, %591 : vector<4x1x2xf32>
    %593 = vector.broadcast %575 : vector<4x1x1xf32> to vector<4x1x2xf32>
    %594 = vector.broadcast %12 : vector<1x1x2xf32> to vector<4x1x2xf32>
    %595 = arith.mulf %593, %594 : vector<4x1x2xf32>
    %596 = arith.addf %182, %595 : vector<4x1x2xf32>
    %597 = vector.broadcast %576 : vector<4x1x1xf32> to vector<4x1x2xf32>
    %598 = vector.broadcast %13 : vector<1x1x2xf32> to vector<4x1x2xf32>
    %599 = arith.mulf %597, %598 : vector<4x1x2xf32>
    %600 = arith.addf %596, %599 : vector<4x1x2xf32>
    %601 = vector.broadcast %575 : vector<4x1x1xf32> to vector<4x1x2xf32>
    %602 = vector.broadcast %14 : vector<1x1x2xf32> to vector<4x1x2xf32>
    %603 = arith.mulf %601, %602 : vector<4x1x2xf32>
    %604 = arith.addf %187, %603 : vector<4x1x2xf32>
    %605 = vector.broadcast %576 : vector<4x1x1xf32> to vector<4x1x2xf32>
    %606 = vector.broadcast %15 : vector<1x1x2xf32> to vector<4x1x2xf32>
    %607 = arith.mulf %605, %606 : vector<4x1x2xf32>
    %608 = arith.addf %604, %607 : vector<4x1x2xf32>
    %609 = arith.negf %584 : vector<4x1x2xf32>
    %610 = math.exp %609 : vector<4x1x2xf32>
    %cst_33 = arith.constant 1.000000e+00 : f32
    %611 = vector.broadcast %cst_33 : f32 to vector<4x1x2xf32>
    %612 = arith.addf %611, %610 : vector<4x1x2xf32>
    %613 = arith.divf %611, %612 : vector<4x1x2xf32>
    %614 = arith.negf %592 : vector<4x1x2xf32>
    %615 = math.exp %614 : vector<4x1x2xf32>
    %cst_34 = arith.constant 1.000000e+00 : f32
    %616 = vector.broadcast %cst_34 : f32 to vector<4x1x2xf32>
    %617 = arith.addf %616, %615 : vector<4x1x2xf32>
    %618 = arith.divf %616, %617 : vector<4x1x2xf32>
    %619 = math.tanh %600 : vector<4x1x2xf32>
    %620 = arith.negf %608 : vector<4x1x2xf32>
    %621 = math.exp %620 : vector<4x1x2xf32>
    %cst_35 = arith.constant 1.000000e+00 : f32
    %622 = vector.broadcast %cst_35 : f32 to vector<4x1x2xf32>
    %623 = arith.addf %622, %621 : vector<4x1x2xf32>
    %624 = arith.divf %622, %623 : vector<4x1x2xf32>
    %625 = arith.mulf %618, %572 : vector<4x1x2xf32>
    %626 = arith.mulf %613, %619 : vector<4x1x2xf32>
    %627 = arith.addf %625, %626 : vector<4x1x2xf32>
    %628 = math.tanh %627 : vector<4x1x2xf32>
    %629 = arith.mulf %624, %628 : vector<4x1x2xf32>
    %c0_36 = arith.constant 0 : index
    %c0_37 = arith.constant 0 : index
    %c0_38 = arith.constant 0 : index
    %630 = vector.load %arg5[%c0_36, %c0_37, %c0_38] : memref<2x1x1xf32, #tpu.memory_space<vmem>>, vector<2x1x1xf32>
    %c0_39 = arith.constant 0 : index
    %c0_40 = arith.constant 0 : index
    %c0_41 = arith.constant 0 : index
    %631 = vector.load %arg6[%c0_39, %c0_40, %c0_41] : memref<1x1x1xf32, #tpu.memory_space<vmem>>, vector<1x1x1xf32>
    %632 = vector.extract_strided_slice %629 {offsets = [0, 0, 0], sizes = [4, 1, 1], strides = [1, 1, 1]} : vector<4x1x2xf32> to vector<4x1x1xf32>
    %633 = vector.extract_strided_slice %630 {offsets = [0, 0, 0], sizes = [1, 1, 1], strides = [1, 1, 1]} : vector<2x1x1xf32> to vector<1x1x1xf32>
    %634 = vector.broadcast %633 : vector<1x1x1xf32> to vector<4x1x1xf32>
    %635 = arith.mulf %632, %634 : vector<4x1x1xf32>
    %636 = vector.broadcast %631 : vector<1x1x1xf32> to vector<4x1x1xf32>
    %637 = arith.addf %636, %635 : vector<4x1x1xf32>
    %638 = vector.extract_strided_slice %629 {offsets = [0, 0, 1], sizes = [4, 1, 1], strides = [1, 1, 1]} : vector<4x1x2xf32> to vector<4x1x1xf32>
    %639 = vector.extract_strided_slice %630 {offsets = [1, 0, 0], sizes = [1, 1, 1], strides = [1, 1, 1]} : vector<2x1x1xf32> to vector<1x1x1xf32>
    %640 = vector.broadcast %639 : vector<1x1x1xf32> to vector<4x1x1xf32>
    %641 = arith.mulf %638, %640 : vector<4x1x1xf32>
    %642 = arith.addf %637, %641 : vector<4x1x1xf32>
    %c0_42 = arith.constant 0 : index
    %c0_43 = arith.constant 0 : index
    %c0_44 = arith.constant 0 : index
    %643 = vector.load %arg7[%c0_42, %c0_43, %c0_44] : memref<4x1x1xf32, #tpu.memory_space<vmem>>, vector<4x1x1xf32>
    tpu.vector_store %arg7[%c0_42, %c0_43, %c0_44], %642 {strides = array<i32>} : memref<4x1x1xf32, #tpu.memory_space<vmem>>, vector<4x1x1xf32>,
    return
  }
  func.func @transform_0(%arg0: i32) -> (i32, i32, i32) {
    %c0_i32 = arith.constant 0 : i32
    %c0_i32_0 = arith.constant 0 : i32
    %c0_i32_1 = arith.constant 0 : i32
    return %arg0, %c0_i32, %c0_i32_0 : i32, i32, i32
  }
  func.func @transform_1(%arg0: i32) -> (i32, i32, i32) {
    %c0_i32 = arith.constant 0 : i32
    %c0_i32_0 = arith.constant 0 : i32
    %c0_i32_1 = arith.constant 0 : i32
    %c0_i32_2 = arith.constant 0 : i32
    return %c0_i32, %c0_i32_0, %c0_i32_1 : i32, i32, i32
  }
  func.func @transform_2(%arg0: i32) -> (i32, i32, i32) {
    %c0_i32 = arith.constant 0 : i32
    %c0_i32_0 = arith.constant 0 : i32
    %c0_i32_1 = arith.constant 0 : i32
    %c0_i32_2 = arith.constant 0 : i32
    return %c0_i32, %c0_i32_0, %c0_i32_1 : i32, i32, i32
  }
  func.func @transform_3(%arg0: i32) -> (i32, i32, i32) {
    %c0_i32 = arith.constant 0 : i32
    %c0_i32_0 = arith.constant 0 : i32
    %c0_i32_1 = arith.constant 0 : i32
    %c0_i32_2 = arith.constant 0 : i32
    return %c0_i32, %c0_i32_0, %c0_i32_1 : i32, i32, i32
  }
  func.func @transform_4(%arg0: i32) -> (i32, i32, i32) {
    %c0_i32 = arith.constant 0 : i32
    %c0_i32_0 = arith.constant 0 : i32
    %c0_i32_1 = arith.constant 0 : i32
    %c0_i32_2 = arith.constant 0 : i32
    return %c0_i32, %c0_i32_0, %c0_i32_1 : i32, i32, i32
  }
  func.func @transform_5(%arg0: i32) -> (i32, i32, i32) {
    %c0_i32 = arith.constant 0 : i32
    %c0_i32_0 = arith.constant 0 : i32
    %c0_i32_1 = arith.constant 0 : i32
    %c0_i32_2 = arith.constant 0 : i32
    return %c0_i32, %c0_i32_0, %c0_i32_1 : i32, i32, i32
  }
  func.func @transform_6(%arg0: i32) -> (i32, i32, i32) {
    %c0_i32 = arith.constant 0 : i32
    %c0_i32_0 = arith.constant 0 : i32
    %c0_i32_1 = arith.constant 0 : i32
    return %arg0, %c0_i32, %c0_i32_0 : i32, i32, i32
  }
}

</mosaic_0001>

<bundles_post_ra>
// kernel: tpu_custom_call.1
= control target key start
LH: loop header
LB: loop body
LE: loop exit
PB: predicated region body
PF: predicated region fallthrough
CT: control target
= control target key end

     0   :  { %v7751_v0 = vmov 0   ;;  %v7749_v5 = vmov 1   ;;  %v5575_v6 = vmov 1966171168   ;;  %v94_v8 = vlaneseq  ;;  %s5576_s24 = smov 1   ;;  %s5577_s27 = smov 127   ;;  %s7742_s0 = inlined_call_operand.vmem [shape: f32[4,8,1], index: 0, kind: input, shape index: {}]   ;;  %s7743_s2 = inlined_call_operand.vmem [shape: f32[4,2,2], index: 2, kind: input, shape index: {}]   ;;  %s7744_s1 = inlined_call_operand.vmem [shape: f32[4,1,2], index: 1, kind: input, shape index: {}]   ;;  %s7745_s3 = inlined_call_operand.vmem [shape: f32[4,1,2], index: 3, kind: input, shape index: {}]   ;;  %s7746_s4 = inlined_call_operand.vmem [shape: f32[2,1,1], index: 4, kind: input, shape index: {}]   ;;  %s7747_s5 = inlined_call_operand.<no memory space> [shape: f32[1,1,1], index: 5, kind: input, shape index: {}]   ;;  %s7748_s6 = inlined_call_operand.vmem [shape: f32[4,1,1], index: 6, kind: output, shape index: {}]  }
   0x1   :  { %5007 = vset.pattern.permute.xlu1 %v7751_v0  ;;  %5006 = vset.pattern.permute.xlu0 %v7751_v0  ;;  %v27_v1 = vld [vmem:[%s7742_s0 + $0x10] sm:$0xff]  ;;  %v25_v2 = vld [vmem:[%s7742_s0] sm:$0xff]  ;;  %v28_v3 = vld [vmem:[%s7742_s0 + $0x18] sm:$0xff]  ;;  %v108_v7 = vunpack.c.l.s4 %v5575_v6  ;;  %vm4896_vm0 = vcmask 0  }
   0x2   :  { %53 = vperm.xlu1 %5007, %v27_v1   ;;  %43 = vperm.xlu0 %5006, %v25_v2   ;;  %v26_v4 = vld [vmem:[%s7742_s0 + $0x8] sm:$0xff]  ;;  %v5632_v10 = vld [vmem:[%s7743_s2] sm:$0x3]  ;;  %v5634_v11 = vshrl.u32 %v94_v8, 7  ;;  %v5645_v14 = vld [vmem:[%s7743_s2 + $0x2] sm:$0x3] }
   0x3   :  { %v109_v9 = vunpack.c.0.s8 %v108_v7  ;;  %v5640_v13 = vmul.f32 0.0, %v5632_v10  ;;  %v5652_v16 = vld [vmem:[%s7743_s2 + $0x4] sm:$0x3]  ;;  %v5655_v17 = vmul.f32 0.0, %v5645_v14  ;;  %v5660_v18 = vld [vmem:[%s7744_s1] sm:$0x1] }
   0x4   :  { %v5671_v22 = vld [vmem:[%s7745_s3] sm:$0x1]  ;;  %v5674_v24 = vmul.f32 0.0, %v5652_v16  ;;  %v5679_v25 = vld [vmem:[%s7743_s2 + $0x6] sm:$0x3] }
   0x5   :  { %v5637_v12 = vsub.s32 %v109_v9, %v5634_v11  ;;  %v5684_v26 = vld [vmem:[%s7744_s1 + $0x1] sm:$0x1]  ;;  %v5699_v32 = vmul.f32 0.0, %v5679_v25  ;;  %v5719_v44 = vld [vmem:[%s7744_s1 + $0x2] sm:$0x1] }
   0x6   :  { %58 = vperm.xlu1 %5007, %v28_v3   ;;  %48 = vperm.xlu0 %5006, %v26_v4   ;;  %v5695_v30 = vld [vmem:[%s7745_s3 + $0x1] sm:$0x1]  ;;  %v5724_v45 = vld [vmem:[%s7744_s1 + $0x3] sm:$0x1]  ;;  %v5737_v53 = vld [vmem:[%s7745_s3 + $0x2] sm:$0x1] }
   0x7   :  { %v1169_v15 = vrot.slane %v5640_v13, %v5637_v12  ;;  %v1195_v27 = vrot.slane %v5655_v17, %v5637_v12  ;;  %v1221_v34 = vrot.slane %v5674_v24, %v5637_v12  ;;  %v1247_v43 = vrot.slane %v5699_v32, %v5637_v12  ;;  %v5748_v59 = vld [vmem:[%s7745_s3 + $0x3] sm:$0x1] }
   0x9   :  { %v1170_v23 = vcombine.high %v1169_v15, %v1169_v15  ;;  %v1196_v37 = vcombine.high %v1195_v27, %v1195_v27  ;;  %v1222_v46 = vcombine.high %v1221_v34, %v1221_v34  ;;  %v1248_v62 = vcombine.high %v1247_v43, %v1247_v43 }
   0xa   :  { %5008 = vset.pattern.permute.xlu0 %v7749_v5  ;;  %5009 = vset.pattern.permute.xlu1 %v7749_v5 }
   0xb   :  { %v1177_v33 = vrot.slane %v1170_v23, %v5637_v12  ;;  %v1203_v49 = vrot.slane %v1196_v37, %v5637_v12  ;;  %v5756_v3 = vrot.slane %v1222_v46, %v5637_v12 }
  0x81   :  { %v5662_v19 = vpop.permute.xlu1 %53  ;;  %v5666_v21 = vpop.permute.xlu0 %43 }
  0x82   :  { %v63_v20 = vmul.f32 %v5662_v19, %v5660_v18  ;;  %v61_v28 = vmul.f32 %v5666_v21, %v5660_v18  ;;  %v69_v29 = vmul.f32 %v5666_v21, %v5684_v26  ;;  %v71_v40 = vmul.f32 %v5662_v19, %v5684_v26 }
  0x83   :  { %v77_v50 = vmul.f32 %v5666_v21, %v5719_v44  ;;  %v85_v51 = vmul.f32 %v5666_v21, %v5724_v45 }
  0x84   :  { %v67_v31 = vadd.f32 %v63_v20, %v5671_v22  ;;  %v65_v35 = vadd.f32 %v61_v28, %v5671_v22  ;;  %v73_v38 = vadd.f32 %v69_v29, %v5695_v30  ;;  %v75_v60 = vadd.f32 %v71_v40, %v5695_v30 }
  0x85   :  { %v5705_v36 = vpop.permute.xlu1 %58  ;;  %v5743_v58 = vpop.permute.xlu0 %48  ;;  %v81_v4 = vadd.f32 %v77_v50, %v5737_v53  ;;  %v89_v8 = vadd.f32 %v85_v51, %v5748_v59  ;;  %v5768_v29 = vrot.slane %v1248_v62, %v5637_v12  ;;  %v87_v51 = vmul.f32 %v5662_v19, %v5724_v45 }
  0x86   :  { %v1158_v39 = vadd.f32 %v5640_v13, %v65_v35  ;;  %v1160_v41 = vadd.f32 %v5640_v13, %v67_v31  ;;  %v64_v42 = vmul.f32 %v5705_v36, %v5660_v18  ;;  %v72_v48 = vmul.f32 %v5705_v36, %v5684_v26 }
  0x87   :  { %v1184_v54 = vadd.f32 %v5655_v17, %v73_v38  ;;  %v80_v57 = vmul.f32 %v5705_v36, %v5719_v44  ;;  %v88_v63 = vmul.f32 %v5705_v36, %v5724_v45  ;;  %v62_v6 = vmul.f32 %v5743_v58, %v5660_v18 }
  0x88   :  { %v1179_v47 = vadd.f32 %v1177_v33, %v1158_v39  ;;  %v68_v52 = vadd.f32 %v64_v42, %v5671_v22  ;;  %v76_v56 = vadd.f32 %v72_v48, %v5695_v30  ;;  %v1181_v61 = vadd.f32 %v1177_v33, %v1160_v41 }
  0x89   :  { %v70_v7 = vmul.f32 %v5743_v58, %v5684_v26  ;;  %v1205_v9 = vadd.f32 %v1203_v49, %v1184_v54  ;;  %v84_v15 = vadd.f32 %v80_v57, %v5737_v53  ;;  %v66_v27 = vadd.f32 %v62_v6, %v5671_v22 }
  0x8a   :  { %v4905_v55 = vmul.f32 -1.442695, %v1179_v47  ;;  %v1161_v1 = vadd.f32 %v5640_v13, %v68_v52  ;;  %v1187_v2 = vadd.f32 %v5655_v17, %v76_v56  ;;  %v1186_v31 = vadd.f32 %v5655_v17, %v75_v60 }
  0x8b   :  { %v74_v28 = vadd.f32 %v70_v7, %v5695_v30  ;;  %v4907_v34 = vmul.f32 -1.442695, %v1181_v61  ;;  %v92_v35 = vadd.f32 %v88_v63, %v5748_v59  ;;  %v1210_v38 = vadd.f32 %v5674_v24, %v81_v4 }
  0x8c   :  { %5037 = vpow2.f32 %v4905_v55  ;;  %v1182_v20 = vadd.f32 %v1177_v33, %v1161_v1  ;;  %v1208_v23 = vadd.f32 %v1203_v49, %v1187_v2  ;;  %v86_v39 = vmul.f32 %v5743_v58, %v5724_v45 }
  0x8d   :  { %v1159_v40 = vadd.f32 %v5640_v13, %v66_v27  ;;  %v1185_v41 = vadd.f32 %v5655_v17, %v74_v28  ;;  %v1213_v42 = vadd.f32 %v5674_v24, %v84_v15  ;;  %v1236_v43 = vadd.f32 %v5699_v32, %v89_v8 }
  0x8e   :  { %v4908_v37 = vmul.f32 -1.442695, %v1182_v20  ;;  %v4909_v46 = vmul.f32 -1.442695, %v1205_v9  ;;  %v4912_v50 = vmul.f32 -1.442695, %v1208_v23  ;;  %v1239_v54 = vadd.f32 %v5699_v32, %v92_v35 }
  0x8f   :  { %v1180_v47 = vadd.f32 %v1177_v33, %v1159_v40  ;;  %v1206_v48 = vadd.f32 %v1203_v49, %v1185_v41  ;;  %v1257_v52 = vadd.f32 %v5768_v29, %v1236_v43  ;;  %v1231_v13 = vadd.f32 %v5756_v3, %v1210_v38 }
  0x90   :  { %5039 = vpow2.f32 %v4908_v37  ;;  %v90_v17 = vadd.f32 %v86_v39, %v5748_v59  ;;  %v1207_v57 = vadd.f32 %v1203_v49, %v1186_v31  ;;  %v1234_v33 = vadd.f32 %v5756_v3, %v1213_v42 }
  0x91   :  { %5041 = vpow2.f32 %v4909_v46  ;;  %v4906_v55 = vmul.f32 -1.442695, %v1180_v47  ;;  %v78_v60 = vmul.f32 %v5743_v58, %v5719_v44  ;;  %v4910_v61 = vmul.f32 -1.442695, %v1206_v48 }
  0x92   :  { %5043 = vpow2.f32 %v4912_v50  ;;  %v4913_v62 = vmul.f32 -1.442695, %v1257_v52  ;;  %v1260_v63 = vadd.f32 %v5768_v29, %v1239_v54  ;;  %v79_v1 = vmul.f32 %v5662_v19, %v5719_v44 }
  0x93   :  { %5045 = vpow2.f32 %v4907_v34  ;;  %v1237_v4 = vadd.f32 %v5699_v32, %v90_v17  ;;  %v91_v49 = vadd.f32 %v87_v51, %v5748_v59  ;;  %v82_v6 = vadd.f32 %v78_v60, %v5737_v53 }
  0x94   :  { %5047 = vpow2.f32 %v4906_v55  ;;  %v4911_v7 = vmul.f32 -1.442695, %v1207_v57  ;;  %v4916_v9 = vmul.f32 -1.442695, %v1260_v63  ;;  %v83_v15 = vadd.f32 %v79_v1, %v5737_v53 }
  0x95   :  { %5049 = vtanh.f32 %v1231_v13  ;;  %v1258_v23 = vadd.f32 %v5768_v29, %v1237_v4  ;;  %v1211_v28 = vadd.f32 %v5674_v24, %v82_v6  ;;  %v1238_v31 = vadd.f32 %v5699_v32, %v91_v49 }
  0x96   :  { %v5038_v56 = vpop.eup %5037  ;;  %5051 = vtanh.f32 %v1234_v33  ;;  %v1212_v40 = vadd.f32 %v5674_v24, %v83_v15 }
  0x97   :  { %v1273_v2 = vadd.f32 1.0, %v5038_v56  ;;  %5053 = vpow2.f32 %v4910_v61  ;;  %v4914_v41 = vmul.f32 -1.442695, %v1258_v23  ;;  %v1232_v42 = vadd.f32 %v5756_v3, %v1211_v28 }
  0x98   :  { %5055 = vpow2.f32 %v4913_v62  ;;  %v1259_v46 = vadd.f32 %v5768_v29, %v1238_v31  ;;  %v1233_v51 = vadd.f32 %v5756_v3, %v1212_v40 }
  0x99   :  { %5057 = vrcp.f32 %v1273_v2 }
  0x9a   :  { %v5040_v8 = vpop.eup %5039  ;;  %5059 = vpow2.f32 %v4911_v7  ;;  %v4915_v24 = vmul.f32 -1.442695, %v1259_v46 }
  0x9b   :  { %v1276_v20 = vadd.f32 1.0, %v5040_v8  ;;  %v5042_v27 = vpop.eup %5041 }
  0x9c   :  { %v5044_v34 = vpop.eup %5043  ;;  %v1297_v35 = vadd.f32 1.0, %v5042_v27 }
  0x9d   :  { %5061 = vrcp.f32 %v1276_v20  ;;  %v5046_v37 = vpop.eup %5045  ;;  %v1300_v38 = vadd.f32 1.0, %v5044_v34 }
  0x9e   :  { %5063 = vpow2.f32 %v4916_v9  ;;  %v5048_v39 = vpop.eup %5047  ;;  %v1275_v32 = vadd.f32 1.0, %v5046_v37 }
  0x9f   :  { %5065 = vrcp.f32 %v1297_v35  ;;  %v1274_v43 = vadd.f32 1.0, %v5048_v39  ;;  %v5050_v47 = vpop.eup %5049 }
  0xa0   :  { %5067 = vrcp.f32 %v1300_v38  ;;  %v5052_v48 = vpop.eup %5051 }
  0xa1   :  { %5069 = vrcp.f32 %v1274_v43  ;;  %v5054_v50 = vpop.eup %5053 }
  0xa2   :  { %5071 = vpow2.f32 %v4914_v41  ;;  %v5056_v52 = vpop.eup %5055  ;;  %v1298_v54 = vadd.f32 1.0, %v5054_v50 }
  0xa3   :  { %5073 = vtanh.f32 %v1232_v42  ;;  %v5058_v13 = vpop.eup %5057  ;;  %v1325_v60 = vadd.f32 1.0, %v5056_v52 }
  0xa4   :  { %5075 = vrcp.f32 %v1275_v32  ;;  %v5060_v17 = vpop.eup %5059  ;;  %v1341_v57 = vmul.f32 %v5058_v13, %v5050_v47 }
  0xa5   :  { %5077 = vrcp.f32 %v1298_v54  ;;  %v1299_v56 = vadd.f32 1.0, %v5060_v17 }
  0xa6   :  { %5079 = vtanh.f32 %v1233_v51 }
  0xa7   :  { %v5062_v55 = vpop.eup %5061  ;;  %5081 = vpow2.f32 %v4915_v24  ;;  %v5819_v24 = vsub.s32 0, %v5634_v11 }
  0xa8   :  { %v5064_v29 = vpop.eup %5063  ;;  %v1344_v61 = vmul.f32 %v5062_v55, %v5052_v48  ;;  %5083 = vrcp.f32 %v1299_v56 }
  0xa9   :  { %v5066_v33 = vpop.eup %5065  ;;  %v1328_v4 = vadd.f32 1.0, %v5064_v29  ;;  %5085 = vrcp.f32 %v1325_v60  ;;  %v97_v13 = vrot.slane %v5660_v18, %v5819_v24  ;;  %v207_v17 = vrot.slane %v5684_v26, %v5819_v24 }
  0xaa   :  { %v5068_v3 = vpop.eup %5067  ;;  %v1337_v62 = vmul.f32 0.0, %v5066_v33  ;;  %v317_v55 = vrot.slane %v5719_v44, %v5819_v24  ;;  %v427_v56 = vrot.slane %v5724_v45, %v5819_v24 }
  0xab   :  { %v1340_v63 = vmul.f32 0.0, %v5068_v3  ;;  %v5070_v1 = vpop.eup %5069  ;;  %v5830_v29 = vmul.f32 %v97_v13, %v5743_v58  ;;  %v5842_v26 = vmul.f32 %v97_v13, %v5666_v21  ;;  %v5845_v44 = vmul.f32 %v207_v17, %v5666_v21 }
  0xac   :  { %v5802_v2 = vadd.f32 %v1341_v57, %v1337_v62  ;;  %v5072_v49 = vpop.eup %5071  ;;  %v5833_v57 = vmul.f32 %v207_v17, %v5743_v58  ;;  %v5836_v11 = vmul.f32 %v317_v55, %v5743_v58  ;;  %v5839_v18 = vmul.f32 %v427_v56, %v5743_v58 }
  0xad   :  { %v5804_v6 = vadd.f32 %v1344_v61, %v1340_v63  ;;  %v5074_v7 = vpop.eup %5073  ;;  %v1326_v20 = vadd.f32 1.0, %v5072_v49  ;;  %7856 = vst [vmem:[#allocation3_spill] sm:$0xff] %v5830_v29  ;;  %7860 = vst [vmem:[#allocation7_spill] sm:$0xff] %v5842_v26  ;;  %v5849_v45 = vrot.slane %v5830_v29, %v5637_v12  ;;  %v5852_v33 = vmul.f32 %v97_v13, %v5662_v19 }
  0xae   :  { %5087 = vtanh.f32 %v5802_v2  ;;  %v5076_v8 = vpop.eup %5075  ;;  %v1342_v9 = vmul.f32 %v5074_v7, %v5070_v1  ;;  %7857 = vst [vmem:[#allocation4_spill] sm:$0xff] %v5833_v57  ;;  %7858 = vst [vmem:[#allocation5_spill] sm:$0xff] %v5836_v11  ;;  %v5855_v60 = vmul.f32 %v317_v55, %v5666_v21  ;;  %v5858_v61 = vmul.f32 %v427_v56, %v5666_v21 }
  0xaf   :  { %5089 = vtanh.f32 %v5804_v6  ;;  %v5078_v15 = vpop.eup %5077  ;;  %7859 = vst [vmem:[#allocation6_spill] sm:$0xff] %v5839_v18  ;;  %7861 = vst [vmem:[#allocation8_spill] sm:$0xff] %v5845_v44  ;;  %v5862_v58 = vrot.slane %v5833_v57, %v5637_v12  ;;  %v5866_v3 = vrot.slane %v5836_v11, %v5637_v12  ;;  %v5870_v62 = vrot.slane %v5839_v18, %v5637_v12 }
  0xb0   :  { %5091 = vrcp.f32 %v1328_v4  ;;  %v5080_v23 = vpop.eup %5079  ;;  %v1338_v27 = vmul.f32 0.0, %v5078_v15  ;;  %7862 = vst [vmem:[#allocation9_spill] sm:$0xff] %v5849_v45  ;;  %7863 = vst [vmem:[#allocation10_spill] sm:$0xff] %v5852_v33  ;;  %v5873_v63 = vmul.f32 %v207_v17, %v5662_v19  ;;  %v5877_v1 = vrot.slane %v5842_v26, %v5637_v12 }
  0xb1   :  { %v5082_v28 = vpop.eup %5081  ;;  %v1343_v31 = vmul.f32 %v5080_v23, %v5076_v8  ;;  %5093 = vrcp.f32 %v1326_v20  ;;  %7864 = vst [vmem:[#allocation11_spill] sm:$0xff] %v5855_v60  ;;  %7865 = vst [vmem:[#allocation12_spill] sm:$0xff] %v5858_v61  ;;  %v5881_v21 = vrot.slane %v5845_v44, %v5637_v12  ;;  %v136_v4 = vcombine.high %v5849_v45, %v5849_v45 }
  0xb2   :  { %v5084_v34 = vpop.eup %5083  ;;  %v5808_v35 = vadd.f32 %v1342_v9, %v1338_v27  ;;  %v1327_v38 = vadd.f32 1.0, %v5082_v28  ;;  %7866 = vst [vmem:[#allocation13_spill] sm:$0xff] %v5862_v58  ;;  %7867 = vst [vmem:[#allocation14_spill] sm:$0xff] %v5866_v3  ;;  %v246_v49 = vcombine.high %v5862_v58, %v5862_v58  ;;  %v5889_v7 = vrot.slane %v5855_v60, %v5637_v12 }
  0xb3   :  { %v1339_v37 = vmul.f32 0.0, %v5084_v34  ;;  %v5086_v40 = vpop.eup %5085  ;;  %7868 = vst [vmem:[#allocation15_spill] sm:$0xff] %v5870_v62  ;;  %7869 = vst [vmem:[#allocation16_spill] sm:$0xff] %v5873_v63  ;;  %v5893_v8 = vrot.slane %v5858_v61, %v5637_v12  ;;  %v5897_v9 = vrot.slane %v5852_v33, %v5637_v12  ;;  %v5900_v15 = vmul.f32 %v317_v55, %v5662_v19 }
  0xb4   :  { %5095 = vtanh.f32 %v5808_v35  ;;  %v356_v20 = vcombine.high %v5866_v3, %v5866_v3  ;;  %v466_v23 = vcombine.high %v5870_v62, %v5870_v62  ;;  %v5907_v27 = vmul.f32 %v427_v56, %v5662_v19 }
  0xb5   :  { %v5811_v39 = vadd.f32 %v1343_v31, %v1339_v37  ;;  %7870 = vst [vmem:[#allocation17_spill] sm:$0xff] %v5897_v9  ;;  %7871 = vst [vmem:[#allocation18_spill] sm:$0xff] %v5900_v15  ;;  %v114_v28 = vcombine.high %v5877_v1, %v5877_v1  ;;  %v224_v31 = vcombine.high %v5881_v21, %v5881_v21 }
  0xb6   :  { %7872 = vst [vmem:[#allocation19_spill] sm:$0xff] %v5907_v27  ;;  %v5915_v34 = vrot.slane %v5873_v63, %v5637_v12  ;;  %v5918_v37 = vmul.f32 %v97_v13, %v5705_v36  ;;  %v5927_v19 = vrot.slane %v136_v4, %v5637_v12  ;;  %v5961_v13 = vrot.slane %v5907_v27, %v5637_v12 }
  0xb7   :  { %5097 = vtanh.f32 %v5811_v39 }
  0xb8   :  { %v5088_v41 = vpop.eup %5087  ;;  %5099 = vrcp.f32 %v1327_v38  ;;  %7873 = vst [vmem:[#allocation20_spill] sm:$0xff] %v5915_v34  ;;  %7874 = vst [vmem:[#allocation21_spill] sm:$0xff] %v5918_v37  ;;  %v5921_v38 = vmul.f32 %v207_v17, %v5705_v36 }
  0xb9   :  { %v5090_v42 = vpop.eup %5089  ;;  %v1353_v43 = vmul.f32 %v5088_v41, %v5086_v40  ;;  %v5924_v40 = vmul.f32 %v317_v55, %v5705_v36  ;;  %7877 = vst [vmem:[#allocation24_spill] sm:$0xff] %v5927_v19  ;;  %v5930_v41 = vrot.slane %v246_v49, %v5637_v12  ;;  %7885 = vst [vmem:[#allocation32_spill] sm:$0xff] %v5961_v13 }
  0xba   :  { %v5092_v46 = vpop.eup %5091  ;;  %7875 = vst [vmem:[#allocation22_spill] sm:$0xff] %v5921_v38  ;;  %v5966_v55 = vadd.f32 %v5927_v19, %v5671_v22  ;;  %v5974_v4 = vrot.slane %v5921_v38, %v5637_v12  ;;  %v488_v38 = vcombine.high %v5961_v13, %v5961_v13 }
  0xbb   :  { %1402 = vperm.xlu0 %5008, %v1353_v43   ;;  %v1356_v47 = vmul.f32 %v5092_v46, %v5090_v42  ;;  %v5094_v32 = vpop.eup %5093  ;;  %7876 = vst [vmem:[#allocation23_spill] sm:$0xff] %v5924_v40  ;;  %7878 = vst [vmem:[#allocation25_spill] sm:$0xff] %v5930_v41  ;;  %v334_v42 = vcombine.high %v5889_v7, %v5889_v7  ;;  %v158_v46 = vcombine.high %v5897_v9, %v5897_v9 }
  0xbc   :  { %7887 = vst [vmem:[#allocation34_spill] sm:$0xff] %v5974_v4  ;;  %v5978_v49 = vadd.f32 %v5930_v41, %v5695_v30  ;;  %v290_v57 = vcombine.high %v5974_v4, %v5974_v4  ;;  %v6041_v60 = vrot.slane %v5924_v40, %v5637_v12 }
  0xbe   :  { %v5096_v48 = vpop.eup %5095  ;;  %7894 = vst [vmem:[#allocation41_spill] sm:$0xff] %v6041_v60  ;;  %v6060_v41 = vrot.slane %v290_v57, %v5637_v12 }
  0xbf   :  { %1426 = vperm.xlu0 %5008, %v1356_v47   ;;  %v1354_v50 = vmul.f32 %v5096_v48, %v5094_v32  ;;  %v5942_v32 = vrot.slane %v356_v20, %v5637_v12  ;;  %v5945_v48 = vrot.slane %v466_v23, %v5637_v12  ;;  %v5981_v20 = vrot.slane %v334_v42, %v5637_v12 }
  0xc0   :  { %7897 = vst [vmem:[#allocation44_spill] sm:$0xff] %v6060_v41 }
  0xc1   :  { %v5098_v51 = vpop.eup %5097  ;;  %1410 = vperm.xlu1 %5009, %v1354_v50   ;;  %7880 = vst [vmem:[#allocation27_spill] sm:$0xff] %v5942_v32  ;;  %7881 = vst [vmem:[#allocation28_spill] sm:$0xff] %v5945_v48 }
  0xc2   :  { %v5100_v52 = vpop.eup %5099  ;;  %7888 = vst [vmem:[#allocation35_spill] sm:$0xff] %v5981_v20 }
  0xc3   :  { %5011 = vset.pattern.permute.xlu0 %v7751_v0  ;;  %v1355_v54 = vmul.f32 %v5100_v52, %v5098_v51  ;;  %v5952_v52 = vrot.slane %v114_v28, %v5637_v12  ;;  %v5987_v28 = vrot.slane %v158_v46, %v5637_v12 }
  0xc4   :  { %1368 = vperm.xlu0 %5011, %v1354_v50   ;;  %v5949_v50 = vrot.slane %v5900_v15, %v5637_v12 }
  0xc5   :  { %1418 = vperm.xlu1 %5009, %v1355_v54   ;;  %7883 = vst [vmem:[#allocation30_spill] sm:$0xff] %v5952_v52  ;;  %7890 = vst [vmem:[#allocation37_spill] sm:$0xff] %v5987_v28  ;;  %v6033_v15 = vadd.f32 %v5987_v28, %v5671_v22 }
  0xc6   :  { %7882 = vst [vmem:[#allocation29_spill] sm:$0xff] %v5949_v50 }
  0xc8   :  { %5012 = vset.pattern.permute.xlu0 %v7749_v5 }
  0xc9   :  { %5010 = vset.pattern.permute.xlu1 %v7751_v0 }
  0xca   :  { %1359 = vperm.xlu1 %5010, %v1353_v43   ;;  %v444_v43 = vcombine.high %v5893_v8, %v5893_v8 }
  0xcc   :  { %v5984_v23 = vrot.slane %v444_v43, %v5637_v12  ;;  %v6005_v43 = vadd.f32 %v5952_v52, %v5671_v22 }
  0xce   :  { %1377 = vperm.xlu1 %5010, %v1355_v54   ;;  %v5955_v54 = vrot.slane %v224_v31, %v5637_v12  ;;  %7889 = vst [vmem:[#allocation36_spill] sm:$0xff] %v5984_v23  ;;  %v5991_v31 = vadd.f32 %v5942_v32, %v5737_v53  ;;  %v6029_v27 = vadd.f32 %v5984_v23, %v5748_v59 }
  0xd0   :  { %7884 = vst [vmem:[#allocation31_spill] sm:$0xff] %v5955_v54  ;;  %v6009_v46 = vadd.f32 %v5955_v54, %v5695_v30 }
  0xd2   :  { %1386 = vperm.xlu1 %5010, %v1356_v47   ;;  %v5939_v47 = vmul.f32 %v427_v56, %v5705_v36  ;;  %v268_v36 = vcombine.high %v5915_v34, %v5915_v34  ;;  %v5970_v56 = vrot.slane %v5918_v37, %v5637_v12 }
  0xd4   :  { %7879 = vst [vmem:[#allocation26_spill] sm:$0xff] %v5939_v47  ;;  %7886 = vst [vmem:[#allocation33_spill] sm:$0xff] %v5970_v56  ;;  %v6001_v42 = vrot.slane %v5939_v47, %v5637_v12  ;;  %v6012_v0 = vrot.slane %v268_v36, %v5637_v12  ;;  %v180_v11 = vcombine.high %v5970_v56, %v5970_v56 }
  0xd5   :  { %v6025_v36 = vadd.f32 %v5981_v20, %v5737_v53 }
  0xd6   :  { %5013 = vset.pattern.permute.xlu1 %v7749_v5  ;;  %v378_v5 = vcombine.high %v5949_v50, %v5949_v50  ;;  %7891 = vst [vmem:[#allocation38_spill] sm:$0xff] %v6001_v42  ;;  %7892 = vst [vmem:[#allocation39_spill] sm:$0xff] %v6012_v0  ;;  %v510_v44 = vcombine.high %v6001_v42, %v6001_v42  ;;  %v6049_v28 = vadd.f32 %v6012_v0, %v5695_v30 }
  0xd7   :  { %v6057_v40 = vrot.slane %v180_v11, %v5637_v12  ;;  %v400_v11 = vcombine.high %v6041_v60, %v6041_v60 }
  0xd8   :  { %v6037_v61 = vrot.slane %v378_v5, %v5637_v12  ;;  %v6074_v57 = vrot.slane %v510_v44, %v5637_v12 }
  0xd9   :  { %7896 = vst [vmem:[#allocation43_spill] sm:$0xff] %v6057_v40  ;;  %v6088_v44 = vadd.f32 %v6057_v40, %v5671_v22  ;;  %v6095_v62 = vrot.slane %v400_v11, %v5637_v12 }
  0xda   :  { %7893 = vst [vmem:[#allocation40_spill] sm:$0xff] %v6037_v61  ;;  %7898 = vst [vmem:[#allocation45_spill] sm:$0xff] %v6074_v57 }
  0xdb   :  { %7899 = vst [vmem:[#allocation46_spill] sm:$0xff] %v6095_v62 }
 0x13a   :  { %v1403_v51 = vpop.permute.xlu0 %1402 }
 0x13b   :  { %v1408_v17 = vrot.slane %v1403_v51, %v5819_v24  ;;  %v5995_v51 = vadd.f32 %v5945_v48, %v5748_v59 }
 0x13d   :  { %v1433_v37 = vmul.f32 %v1408_v17, %v5632_v10  ;;  %v1517_v18 = vmul.f32 %v1408_v17, %v5645_v14  ;;  %v1601_v29 = vmul.f32 %v1408_v17, %v5652_v16  ;;  %v1685_v63 = vmul.f32 %v1408_v17, %v5679_v25 }
 0x13e   :  { %v1427_v47 = vpop.permute.xlu0 %1426  ;;  %v6052_v17 = vrot.slane %v488_v38, %v5637_v12 }
 0x13f   :  { %v1432_v48 = vrot.slane %v1427_v47, %v5819_v24  ;;  %v1447_v5 = vrot.slane %v1433_v37, %v5637_v12  ;;  %v1531_v32 = vrot.slane %v1517_v18, %v5637_v12  ;;  %v1699_v38 = vrot.slane %v1685_v63, %v5637_v12 }
 0x140   :  { %v1411_v33 = vpop.permute.xlu1 %1410  ;;  %7895 = vst [vmem:[#allocation42_spill] sm:$0xff] %v6052_v17  ;;  %v6069_v18 = vadd.f32 %v6037_v61, %v5737_v53  ;;  %v6084_v61 = vadd.f32 %v6052_v17, %v5748_v59 }
 0x141   :  { %v1416_v26 = vrot.slane %v1411_v33, %v5819_v24  ;;  %v1615_v33 = vrot.slane %v1601_v29, %v5637_v12  ;;  %v1436_v54 = vmul.f32 %v1432_v48, %v5632_v10  ;;  %v1520_v52 = vmul.f32 %v1432_v48, %v5645_v14 }
 0x142   :  { %v1448_v42 = vcombine.high %v1447_v5, %v1447_v5  ;;  %v1700_v17 = vcombine.high %v1699_v38, %v1699_v38  ;;  %v6099_v22 = vmul.f32 %v1432_v48, %v5652_v16 }
 0x143   :  { %v1434_v47 = vmul.f32 %v1416_v26, %v5632_v10  ;;  %v1518_v0 = vmul.f32 %v1416_v26, %v5645_v14  ;;  %v1686_v19 = vmul.f32 %v1416_v26, %v5679_v25  ;;  %v1602_v63 = vmul.f32 %v1416_v26, %v5652_v16 }
 0x144   :  { %v1419_v23 = vpop.permute.xlu1 %1418  ;;  %v1616_v60 = vcombine.high %v1615_v33, %v1615_v33  ;;  %v1492_v3 = vrot.slane %v1436_v54, %v5637_v12  ;;  %v1576_v33 = vrot.slane %v1520_v52, %v5637_v12  ;;  %v1455_v38 = vrot.slane %v1448_v42, %v5637_v12 }
 0x145   :  { %v1462_v29 = vrot.slane %v1434_v47, %v5637_v12  ;;  %v1546_v37 = vrot.slane %v1518_v0, %v5637_v12  ;;  %v1714_v20 = vrot.slane %v1686_v19, %v5637_v12  ;;  %v1532_v47 = vcombine.high %v1531_v32, %v1531_v32  ;;  %v1369_v0 = vpop.permute.xlu0 %1368 }
 0x146   :  { %v6092_v19 = vadd.f32 %v6060_v41, %v5695_v30  ;;  %v6103_v32 = vadd.f32 %v6074_v57, %v5748_v59  ;;  %v1630_v30 = vrot.slane %v1602_v63, %v5637_v12  ;;  %v1374_v11 = vrot.slane %v1369_v0, %v5819_v24 }
 0x147   :  { %v1463_v4 = vcombine.high %v1462_v29, %v1462_v29  ;;  %v1547_v26 = vcombine.high %v1546_v37, %v1546_v37  ;;  %v1715_v56 = vcombine.high %v1714_v20, %v1714_v20  ;;  %v1424_v20 = vrot.slane %v1419_v23, %v5819_v24 }
 0x148   :  { %v1539_v54 = vrot.slane %v1532_v47, %v5637_v12  ;;  %v6112_v29 = vrot.slane %v1616_v60, %v5637_v12  ;;  %v1688_v37 = vmul.f32 %v1432_v48, %v5679_v25  ;;  %v1394_v0 = vmul.f32 %v1374_v11, %v5632_v10 }
 0x149   :  { %v1360_v5 = vpop.permute.xlu1 %1359  ;;  %v1470_v59 = vrot.slane %v1463_v4, %v5637_v12  ;;  %v1554_v57 = vrot.slane %v1547_v26, %v5637_v12  ;;  %v1722_v63 = vrot.slane %v1715_v56, %v5637_v12  ;;  %v1435_v52 = vmul.f32 %v1424_v20, %v5632_v10 }
 0x14a   :  { %v1519_v23 = vmul.f32 %v1424_v20, %v5645_v14  ;;  %v1510_v42 = vmul.f32 %v1374_v11, %v5645_v14  ;;  %v1678_v47 = vmul.f32 %v1374_v11, %v5679_v25  ;;  %v1631_v60 = vcombine.high %v1630_v30, %v1630_v30 }
 0x14b   :  { %v1493_v41 = vcombine.high %v1492_v3, %v1492_v3  ;;  %v1577_v40 = vcombine.high %v1576_v33, %v1576_v33  ;;  %v1603_v48 = vmul.f32 %v1424_v20, %v5652_v16  ;;  %v1687_v4 = vmul.f32 %v1424_v20, %v5679_v25 }
 0x14c   :  { %v1398_v26 = vadd.f32 %v1394_v0, %v5966_v55  ;;  %v1514_v56 = vadd.f32 %v1510_v42, %v5978_v49  ;;  %v1682_v58 = vadd.f32 %v1678_v47, %v5995_v51  ;;  %v1707_v13 = vrot.slane %v1700_v17, %v5637_v12 }
 0x14d   :  { %v1378_v45 = vpop.permute.xlu1 %1377  ;;  %v1477_v50 = vrot.slane %v1435_v52, %v5637_v12  ;;  %v1594_v34 = vmul.f32 %v1374_v11, %v5652_v16  ;;  %v1365_v3 = vrot.slane %v1360_v5, %v5819_v24  ;;  %v1561_v30 = vrot.slane %v1519_v23, %v5637_v12 }
 0x14e   :  { %v1506_v33 = vadd.f32 %v1470_v59, %v1398_v26  ;;  %v1590_v9 = vadd.f32 %v1554_v57, %v1514_v56  ;;  %v1758_v20 = vadd.f32 %v1722_v63, %v1682_v58  ;;  %v1638_v55 = vrot.slane %v1631_v60, %v5637_v12 }
 0x14f   :  { %v1500_v49 = vrot.slane %v1493_v41, %v5637_v12  ;;  %v1584_v51 = vrot.slane %v1577_v40, %v5637_v12  ;;  %v6137_v0 = vrot.slane %v1688_v37, %v5637_v12  ;;  %v6140_v17 = vrot.slane %v1603_v48, %v5637_v12 }
 0x150   :  { %v1729_v11 = vrot.slane %v1687_v4, %v5637_v12  ;;  %v4918_v5 = vmul.f32 -1.442695, %v1506_v33  ;;  %v4922_v52 = vmul.f32 -1.442695, %v1590_v9  ;;  %v1478_v23 = vcombine.high %v1477_v50, %v1477_v50 }
 0x151   :  { %v1598_v57 = vadd.f32 %v1594_v34, %v5991_v31  ;;  %v1393_v58 = vmul.f32 %v1365_v3, %v5632_v10  ;;  %v1509_v59 = vmul.f32 %v1365_v3, %v5645_v14  ;;  %v1562_v41 = vcombine.high %v1561_v30, %v1561_v30  ;;  %v1387_v63 = vpop.permute.xlu1 %1386 }
 0x152   :  { %5101 = vpow2.f32 %v4918_v5  ;;  %v4926_v40 = vmul.f32 -1.442695, %v1758_v20  ;;  %v1383_v37 = vrot.slane %v1378_v45, %v5819_v24  ;;  %v1593_v9 = vmul.f32 %v1365_v3, %v5652_v16 }
 0x153   :  { %5103 = vpow2.f32 %v4922_v52  ;;  %v1397_v42 = vadd.f32 %v1393_v58, %v6005_v43  ;;  %v1513_v47 = vadd.f32 %v1509_v59, %v6009_v46  ;;  %v1730_v50 = vcombine.high %v1729_v11, %v1729_v11 }
 0x154   :  { %v1677_v34 = vmul.f32 %v1365_v3, %v5679_v25  ;;  %v1395_v31 = vmul.f32 %v1383_v37, %v5632_v10  ;;  %v1511_v60 = vmul.f32 %v1383_v37, %v5645_v14  ;;  %v1485_v48 = vrot.slane %v1478_v23, %v5637_v12 }
 0x155   :  { %v1505_v4 = vadd.f32 %v1455_v38, %v1397_v42  ;;  %v1589_v26 = vadd.f32 %v1539_v54, %v1513_v47  ;;  %v1392_v45 = vrot.slane %v1387_v63, %v5819_v24  ;;  %v1569_v56 = vrot.slane %v1562_v41, %v5637_v12 }
 0x156   :  { %v1399_v43 = vadd.f32 %v1395_v31, %v6033_v15  ;;  %v1515_v46 = vadd.f32 %v1511_v60, %v6049_v28  ;;  %v1679_v30 = vmul.f32 %v1383_v37, %v5679_v25  ;;  %5105 = vpow2.f32 %v4926_v40 }
 0x157   :  { %v1597_v3 = vadd.f32 %v1593_v9, %v6025_v36  ;;  %v4917_v33 = vmul.f32 -1.442695, %v1505_v4  ;;  %v4921_v20 = vmul.f32 -1.442695, %v1589_v26  ;;  %v1681_v11 = vadd.f32 %v1677_v34, %v6029_v27 }
 0x158   :  { %v1507_v5 = vadd.f32 %v1485_v48, %v1399_v43  ;;  %v1591_v38 = vadd.f32 %v1569_v56, %v1515_v46  ;;  %v1683_v54 = vadd.f32 %v1679_v30, %v6084_v61  ;;  %v1674_v52 = vadd.f32 %v1638_v55, %v1598_v57 }
 0x159   :  { %5107 = vpow2.f32 %v4917_v33  ;;  %v1396_v23 = vmul.f32 %v1392_v45, %v5632_v10  ;;  %v1512_v15 = vmul.f32 %v1392_v45, %v5645_v14  ;;  %v1737_v28 = vrot.slane %v1730_v50, %v5637_v12 }
 0x15a   :  { %5109 = vpow2.f32 %v4921_v20  ;;  %v4919_v58 = vmul.f32 -1.442695, %v1507_v5  ;;  %v4923_v59 = vmul.f32 -1.442695, %v1591_v38  ;;  %v1673_v36 = vadd.f32 %v6112_v29, %v1597_v3 }
 0x15b   :  { %v1595_v41 = vmul.f32 %v1383_v37, %v5652_v16  ;;  %v1400_v27 = vadd.f32 %v1396_v23, %v6088_v44  ;;  %v1516_v40 = vadd.f32 %v1512_v15, %v6092_v19  ;;  %v1757_v55 = vadd.f32 %v1707_v13, %v1681_v11 }
 0x15c   :  { %v5102_v61 = vpop.eup %5101  ;;  %v1759_v57 = vadd.f32 %v1737_v28, %v1683_v54  ;;  %5111 = vpow2.f32 %v4919_v58  ;;  %v1680_v10 = vmul.f32 %v1392_v45, %v5679_v25  ;;  %v1660_v29 = vrot.slane %v6099_v22, %v5637_v12 }
 0x15d   :  { %v5104_v14 = vpop.eup %5103  ;;  %v1774_v63 = vadd.f32 1.0, %v5102_v61  ;;  %5113 = vpow2.f32 %v4923_v59  ;;  %v1508_v42 = vadd.f32 %v1500_v49, %v1400_v27  ;;  %v1592_v47 = vadd.f32 %v1584_v51, %v1516_v40 }
 0x15e   :  { %v1646_v37 = vcombine.high %v6140_v17, %v6140_v17  ;;  %v1798_v44 = vadd.f32 1.0, %v5104_v14  ;;  %5115 = vtanh.f32 %v1674_v52  ;;  %v1745_v13 = vcombine.high %v6137_v0, %v6137_v0 }
 0x15f   :  { %5117 = vrcp.f32 %v1774_v63  ;;  %v4920_v19 = vmul.f32 -1.442695, %v1508_v42  ;;  %v4924_v9 = vmul.f32 -1.442695, %v1592_v47  ;;  %v4925_v25 = vmul.f32 -1.442695, %v1757_v55 }
 0x160   :  { %5119 = vrcp.f32 %v1798_v44  ;;  %v1599_v50 = vadd.f32 %v1595_v41, %v6069_v18  ;;  %v1596_v49 = vmul.f32 %v1392_v45, %v5652_v16  ;;  %v5106_v51 = vpop.eup %5105  ;;  %v4927_v22 = vmul.f32 -1.442695, %v1759_v57 }
 0x161   :  { %5121 = vtanh.f32 %v1673_v36  ;;  %v1684_v34 = vadd.f32 %v1680_v10, %v6103_v32  ;;  %v1661_v17 = vcombine.high %v1660_v29, %v1660_v29  ;;  %v1653_v31 = vrot.slane %v1646_v37, %v5637_v12 }
 0x162   :  { %v422_v0 = vadd.f32 %v6095_v62, %v5737_v53  ;;  %5123 = vpow2.f32 %v4920_v19  ;;  %v1752_v48 = vrot.slane %v1745_v13, %v5637_v12  ;;  %v1826_v38 = vadd.f32 1.0, %v5106_v51 }
 0x163   :  { %v5108_v60 = vpop.eup %5107  ;;  %5125 = vpow2.f32 %v4924_v9  ;;  %v1675_v16 = vadd.f32 %v1653_v31, %v1599_v50  ;;  %v1668_v43 = vrot.slane %v1661_v17, %v5637_v12 }
 0x164   :  { %v5110_v4 = vpop.eup %5109  ;;  %v1773_v18 = vadd.f32 1.0, %v5108_v60  ;;  %5127 = vpow2.f32 %v4925_v25  ;;  %v1600_v26 = vadd.f32 %v1596_v49, %v422_v0  ;;  %v1760_v56 = vadd.f32 %v1752_v48, %v1684_v34 }
 0x165   :  { %v1797_v45 = vadd.f32 1.0, %v5110_v4  ;;  %5129 = vpow2.f32 %v4927_v22 }
 0x166   :  { %v5112_v32 = vpop.eup %5111  ;;  %5131 = vrcp.f32 %v1773_v18  ;;  %v1676_v33 = vadd.f32 %v1668_v43, %v1600_v26  ;;  %v4928_v11 = vmul.f32 -1.442695, %v1760_v56  ;;  %v121_v56 = vrot.slane %v5877_v1, %v5637_v12  ;;  %v7905_v1 = vld [vmem:[#allocation32_spill] sm:$0xff] }
 0x167   :  { %v5114_v46 = vpop.eup %5113  ;;  %5133 = vrcp.f32 %v1797_v45  ;;  %v1775_v53 = vadd.f32 1.0, %v5112_v32  ;;  %v7900_v45 = vmov 0   ;;  %v231_v32 = vrot.slane %v5881_v21, %v5637_v12  ;;  %v7906_v21 = vld [vmem:[#allocation9_spill] sm:$0xff] }
 0x168   :  { %v5116_v30 = vpop.eup %5115  ;;  %v1799_v3 = vadd.f32 1.0, %v5114_v46  ;;  %5135 = vtanh.f32 %v1675_v16  ;;  %v341_v43 = vrot.slane %v5889_v7, %v5637_v12  ;;  %v451_v46 = vrot.slane %v5893_v8, %v5637_v12 }
 0x169   :  { %v5118_v20 = vpop.eup %5117  ;;  %5137 = vrcp.f32 %v1775_v53  ;;  %v7902_v53 = vld [vmem:[#allocation17_spill] sm:$0xff]  ;;  %v533_v7 = vcombine.high %v121_v56, %v121_v56  ;;  %v6294_v56 = vld [vmem:[%s7743_s2 + $0x6] sm:$0x3] }
 0x16a   :  { %v5120_v5 = vpop.eup %5119  ;;  %5139 = vrcp.f32 %v1799_v3  ;;  %v1842_v54 = vmul.f32 %v5118_v20, %v5116_v30  ;;  %v165_v30 = vrot.slane %v7902_v53, %v5637_v12  ;;  %v7903_v3 = vld [vmem:[#allocation20_spill] sm:$0xff]  ;;  %v7904_v20 = vld [vmem:[#allocation29_spill] sm:$0xff]  ;;  %v569_v8 = vcombine.high %v451_v46, %v451_v46  ;;  %v7912_v46 = vld [vmem:[#allocation34_spill] sm:$0xff] }
 0x16b   :  { %v5122_v52 = vpop.eup %5121  ;;  %v1838_v23 = vmul.f32 %v5120_v5, %v5808_v35  ;;  %5141 = vtanh.f32 %v1676_v33  ;;  %v275_v33 = vrot.slane %v7903_v3, %v5637_v12  ;;  %v495_v5 = vrot.slane %v7905_v1, %v5637_v12 }
 0x16c   :  { %v5124_v15 = vpop.eup %5123  ;;  %5143 = vpow2.f32 %v4928_v11  ;;  %v385_v11 = vrot.slane %v7904_v20, %v5637_v12  ;;  %v297_v53 = vrot.slane %v7912_v46, %v5637_v12 }
 0x16d   :  { %v5126_v28 = vpop.eup %5125  ;;  %v1776_v58 = vadd.f32 1.0, %v5124_v15  ;;  %v6185_v59 = vadd.f32 %v1842_v54, %v1838_v23  ;;  %5145 = vrcp.f32 %v1826_v38  ;;  %v143_v54 = vrot.slane %v7906_v21, %v5637_v12 }
 0x16e   :  { %v5128_v36 = vpop.eup %5127  ;;  %v1800_v41 = vadd.f32 1.0, %v5126_v28  ;;  %v557_v23 = vcombine.high %v341_v43, %v341_v43  ;;  %v535_v15 = vcombine.high %v165_v30, %v165_v30  ;;  %v547_v28 = vcombine.high %v275_v33, %v275_v33  ;;  %v7913_v30 = vld [vmem:[#allocation41_spill] sm:$0xff] }
 0x16f   :  { %v5130_v27 = vpop.eup %5129  ;;  %5147 = vrcp.f32 %v1776_v58  ;;  %v1825_v55 = vadd.f32 1.0, %v5128_v36  ;;  %v559_v36 = vcombine.high %v385_v11, %v385_v11  ;;  %v6301_v3 = vrot.slane %v7913_v30, %v5637_v12  ;;  %v6308_v11 = vld [vmem:[%s7743_s2 + $0x4] sm:$0x3] }
 0x170   :  { %v5132_v40 = vpop.eup %5131  ;;  %5149 = vrcp.f32 %v1800_v41  ;;  %v1827_v47 = vadd.f32 1.0, %v5130_v27  ;;  %v571_v41 = vcombine.high %v495_v5, %v495_v5  ;;  %v7907_v27 = vld [vmem:[#allocation13_spill] sm:$0xff]  ;;  %v7914_v5 = vld [vmem:[#allocation38_spill] sm:$0xff] }
 0x171   :  { %v5134_v61 = vpop.eup %5133  ;;  %5151 = vtanh.f32 %v6185_v59  ;;  %v1841_v57 = vmul.f32 %v5132_v40, %v5122_v52  ;;  %v545_v52 = vcombine.high %v231_v32, %v231_v32  ;;  %v253_v40 = vrot.slane %v7907_v27, %v5637_v12 }
 0x172   :  { %v5136_v35 = vpop.eup %5135  ;;  %v1837_v10 = vmul.f32 %v5134_v61, %v5802_v2  ;;  %5153 = vrcp.f32 %v1825_v55  ;;  %v7908_v61 = vld [vmem:[#allocation14_spill] sm:$0xff]  ;;  %v548_v27 = vcombine.high %v297_v53, %v297_v53 }
 0x173   :  { %v5138_v14 = vpop.eup %5137  ;;  %v363_v55 = vrot.slane %v7908_v61, %v5637_v12 }
 0x174   :  { %v5140_v63 = vpop.eup %5139  ;;  %v6189_v42 = vadd.f32 %v1841_v57, %v1837_v10  ;;  %v1843_v29 = vmul.f32 %v5138_v14, %v5136_v35  ;;  %v534_v57 = vcombine.high %v143_v54, %v143_v54  ;;  %v6230_v10 = vld [vmem:[%s7745_s3] sm:$0x1] }
 0x175   :  { %v1839_v37 = vmul.f32 %v5140_v63, %v5811_v39  ;;  %v5142_v44 = vpop.eup %5141  ;;  %v6233_v14 = vadd.f32 %v6230_v10, %v533_v7  ;;  %v6238_v63 = vld [vmem:[%s7745_s3 + $0x1] sm:$0x1] }
 0x176   :  { %5155 = vtanh.f32 %v6189_v42  ;;  %v5144_v13 = vpop.eup %5143  ;;  %v6346_v46 = vadd.f32 %v6238_v63, %v548_v27 }
 0x177   :  { %v6193_v19 = vadd.f32 %v1843_v29, %v1839_v37  ;;  %v5146_v9 = vpop.eup %5145  ;;  %5157 = vrcp.f32 %v1827_v47  ;;  %v1828_v50 = vadd.f32 1.0, %v5144_v13  ;;  %v6241_v47 = vadd.f32 %v6238_v63, %v545_v52  ;;  %v6246_v29 = vld [vmem:[%s7745_s3 + $0x2] sm:$0x1] }
 0x178   :  { %v6249_v37 = vadd.f32 %v6246_v29, %v557_v23 }
 0x179   :  { %v5148_v25 = vpop.eup %5147  ;;  %5159 = vtanh.f32 %v6193_v19 }
 0x17a   :  { %v5150_v2 = vpop.eup %5149  ;;  %v1844_v49 = vmul.f32 %v5148_v25, %v5142_v44  ;;  %5161 = vrcp.f32 %v1828_v50  ;;  %v7909_v44 = vld [vmem:[#allocation15_spill] sm:$0xff]  ;;  %v6263_v50 = vadd.f32 %v6230_v10, %v535_v15 }
 0x17b   :  { %v5152_v51 = vpop.eup %5151  ;;  %v1840_v22 = vmul.f32 %v5150_v2, %v5804_v6  ;;  %v7901_v6 = vmov 1   ;;  %v473_v13 = vrot.slane %v7909_v44, %v5637_v12  ;;  %v6257_v25 = vld [vmem:[%s7745_s3 + $0x3] sm:$0x1] }
 0x17c   :  { %v1854_v34 = vmul.f32 %v5152_v51, %v5146_v9  ;;  %v5154_v39 = vpop.eup %5153  ;;  %7910 = vst [vmem:[#allocation17_spill] sm:$0xff] %v6257_v25  ;;  %v6260_v2 = vadd.f32 %v6257_v25, %v569_v8  ;;  %v6271_v51 = vld [vmem:[%s7743_s2] sm:$0x3] }
 0x17d   :  { %v6197_v17 = vadd.f32 %v1844_v49, %v1840_v22  ;;  %v6266_v49 = vadd.f32 %v6238_v63, %v547_v28  ;;  %v570_v43 = vcombine.high %v473_v13, %v473_v13 }
 0x17e   :  { %1910 = vperm.xlu1 %5013, %v1854_v34  }
 0x17f   :  { %5163 = vtanh.f32 %v6197_v17 }
 0x180   :  { %v5156_v31 = vpop.eup %5155 }
 0x181   :  { %v1853_v0 = vmul.f32 %v5156_v31, %v5154_v39  ;;  %v5158_v60 = vpop.eup %5157  ;;  %v6278_v39 = vadd.f32 %v6257_v25, %v571_v41  ;;  %v7911_v31 = vld [vmem:[#allocation33_spill] sm:$0xff]  ;;  %v6326_v41 = vadd.f32 %v6257_v25, %v570_v43 }
 0x183   :  { %v5160_v48 = vpop.eup %5159  ;;  %1902 = vperm.xlu0 %5012, %v1853_v0  }
 0x184   :  { %v1855_v4 = vmul.f32 %v5160_v48, %v5158_v60  ;;  %v5162_v18 = vpop.eup %5161  ;;  %v6285_v60 = vld [vmem:[%s7743_s2 + $0x2] sm:$0x3] }
 0x186   :  { %1918 = vperm.xlu1 %5013, %v1855_v4  }
 0x189   :  { %v5164_v16 = vpop.eup %5163 }
 0x18a   :  { %v1856_v26 = vmul.f32 %v5164_v16, %v5162_v18  ;;  %5014 = vset.pattern.permute.xlu1 %v7900_v45  ;;  %v6289_v18 = vadd.f32 %v6230_v10, %v534_v57  ;;  %v546_v16 = vcombine.high %v253_v40, %v253_v40 }
 0x18b   :  { %1859 = vperm.xlu1 %5014, %v1853_v0   ;;  %v187_v0 = vrot.slane %v7911_v31, %v5637_v12 }
 0x18c   :  { %1926 = vperm.xlu0 %5012, %v1856_v26   ;;  %v6319_v15 = vadd.f32 %v6238_v63, %v546_v16 }
 0x18d   :  { %v536_v52 = vcombine.high %v187_v0, %v187_v0 }
 0x18f   :  { %1877 = vperm.xlu1 %5014, %v1855_v4  }
 0x190   :  { %5015 = vset.pattern.permute.xlu0 %v7900_v45 }
 0x191   :  { %1868 = vperm.xlu0 %5015, %v1854_v34   ;;  %v6275_v34 = vadd.f32 %v6246_v29, %v559_v36 }
 0x193   :  { %1886 = vperm.xlu1 %5014, %v1856_v26   ;;  %v558_v26 = vcombine.high %v363_v55, %v363_v55 }
 0x195   :  { %5016 = vset.pattern.permute.xlu0 %v7901_v6  ;;  %v6322_v28 = vadd.f32 %v6246_v29, %v558_v26 }
 0x197   :  { %5017 = vset.pattern.permute.xlu1 %v7901_v6 }
 0x1fd   :  { %v1911_v38 = vpop.permute.xlu1 %1910 }
 0x1fe   :  { %v1916_v58 = vrot.slane %v1911_v38, %v5819_v24  ;;  %v517_v38 = vrot.slane %v7914_v5, %v5637_v12 }
 0x200   :  { %v1934_v22 = vmul.f32 %v6271_v51, %v1916_v58  ;;  %v2018_v48 = vmul.f32 %v6285_v60, %v1916_v58  ;;  %v2186_v32 = vmul.f32 %v6294_v56, %v1916_v58  ;;  %v2102_v54 = vmul.f32 %v6308_v11, %v1916_v58 }
 0x202   :  { %v1903_v35 = vpop.permute.xlu0 %1902  ;;  %v1962_v21 = vrot.slane %v1934_v22, %v5637_v12  ;;  %v2046_v23 = vrot.slane %v2018_v48, %v5637_v12  ;;  %v2214_v36 = vrot.slane %v2186_v32, %v5637_v12  ;;  %v6334_v13 = vrot.slane %v2102_v54, %v5637_v12 }
 0x203   :  { %v1908_v9 = vrot.slane %v1903_v35, %v5819_v24  ;;  %v572_v35 = vcombine.high %v517_v38, %v517_v38  ;;  %v6338_v22 = vadd.f32 %v6230_v10, %v536_v52 }
 0x204   :  { %v1963_v44 = vcombine.high %v1962_v21, %v1962_v21  ;;  %v2047_v31 = vcombine.high %v2046_v23, %v2046_v23  ;;  %v2215_v26 = vcombine.high %v2214_v36, %v2214_v36 }
 0x205   :  { %v1919_v4 = vpop.permute.xlu1 %1918  ;;  %v1933_v33 = vmul.f32 %v6271_v51, %v1908_v9  ;;  %v2017_v20 = vmul.f32 %v6285_v60, %v1908_v9  ;;  %v2101_v1 = vmul.f32 %v6308_v11, %v1908_v9  ;;  %v2185_v8 = vmul.f32 %v6294_v56, %v1908_v9 }
 0x206   :  { %v1924_v7 = vrot.slane %v1919_v4, %v5819_v24  ;;  %v2054_v54 = vrot.slane %v2047_v31, %v5637_v12 }
 0x207   :  { %v1947_v40 = vrot.slane %v1933_v33, %v5637_v12  ;;  %v2031_v61 = vrot.slane %v2017_v20, %v5637_v12  ;;  %v2115_v55 = vrot.slane %v2101_v1, %v5637_v12  ;;  %v2199_v0 = vrot.slane %v2185_v8, %v5637_v12 }
 0x208   :  { %v1935_v9 = vmul.f32 %v6271_v51, %v1924_v7  ;;  %v2019_v48 = vmul.f32 %v6285_v60, %v1924_v7  ;;  %v2103_v4 = vmul.f32 %v6308_v11, %v1924_v7  ;;  %v2187_v32 = vmul.f32 %v6294_v56, %v1924_v7 }
 0x209   :  { %v1948_v53 = vcombine.high %v1947_v40, %v1947_v40  ;;  %v2032_v30 = vcombine.high %v2031_v61, %v2031_v61  ;;  %v2116_v33 = vcombine.high %v2115_v55, %v2115_v55  ;;  %v6349_v20 = vadd.f32 %v6257_v25, %v572_v35 }
 0x20a   :  { %v1860_v57 = vpop.permute.xlu1 %1859  ;;  %v1970_v1 = vrot.slane %v1963_v44, %v5637_v12  ;;  %v1977_v38 = vrot.slane %v1935_v9, %v5637_v12  ;;  %v2200_v7 = vcombine.high %v2199_v0, %v2199_v0  ;;  %v2061_v52 = vrot.slane %v2019_v48, %v5637_v12 }
 0x20b   :  { %v1927_v16 = vpop.permute.xlu0 %1926  ;;  %v1865_v43 = vrot.slane %v1860_v57, %v5819_v24  ;;  %v2145_v23 = vrot.slane %v2103_v4, %v5637_v12  ;;  %v6360_v8 = vrot.slane %v2215_v26, %v5637_v12  ;;  %v6363_v36 = vrot.slane %v2187_v32, %v5637_v12 }
 0x20c   :  { %v1932_v21 = vrot.slane %v1927_v16, %v5819_v24  ;;  %v1955_v61 = vrot.slane %v1948_v53, %v5637_v12  ;;  %v2039_v55 = vrot.slane %v2032_v30, %v5637_v12  ;;  %v2123_v57 = vrot.slane %v2116_v33, %v5637_v12 }
 0x20d   :  { %v1893_v27 = vmul.f32 %v6271_v51, %v1865_v43  ;;  %v2009_v40 = vmul.f32 %v6285_v60, %v1865_v43  ;;  %v2177_v35 = vmul.f32 %v6294_v56, %v1865_v43  ;;  %v1978_v44 = vcombine.high %v1977_v38, %v1977_v38 }
 0x20e   :  { %v1936_v9 = vmul.f32 %v6271_v51, %v1932_v21  ;;  %v1878_v48 = vpop.permute.xlu1 %1877  ;;  %v2207_v16 = vrot.slane %v2200_v7, %v5637_v12  ;;  %v2062_v26 = vcombine.high %v2061_v52, %v2061_v52  ;;  %v2146_v32 = vcombine.high %v2145_v23, %v2145_v23 }
 0x20f   :  { %v1897_v31 = vadd.f32 %v1893_v27, %v6233_v14  ;;  %v2013_v0 = vadd.f32 %v2009_v40, %v6241_v47  ;;  %v2020_v53 = vmul.f32 %v6285_v60, %v1932_v21  ;;  %v6379_v33 = vmul.f32 %v6308_v11, %v1932_v21 }
 0x210   :  { %v1869_v4 = vpop.permute.xlu0 %1868  ;;  %v2188_v14 = vmul.f32 %v6294_v56, %v1932_v21  ;;  %v2181_v47 = vadd.f32 %v2177_v35, %v6260_v2  ;;  %v1883_v27 = vrot.slane %v1878_v48, %v5819_v24  ;;  %v1985_v52 = vrot.slane %v1978_v44, %v5637_v12 }
 0x211   :  { %v2005_v38 = vadd.f32 %v1955_v61, %v1897_v31  ;;  %v2089_v58 = vadd.f32 %v2039_v55, %v2013_v0  ;;  %v1874_v7 = vrot.slane %v1869_v4, %v5819_v24  ;;  %v1992_v23 = vrot.slane %v1936_v9, %v5637_v12 }
 0x212   :  { %v2069_v30 = vrot.slane %v2062_v26, %v5637_v12  ;;  %v2076_v62 = vrot.slane %v2020_v53, %v5637_v12  ;;  %v1895_v61 = vmul.f32 %v6271_v51, %v1883_v27  ;;  %v2011_v21 = vmul.f32 %v6285_v60, %v1883_v27  ;;  %v1887_v44 = vpop.permute.xlu1 %1886 }
 0x213   :  { %v4929_v40 = vmul.f32 -1.442695, %v2005_v38  ;;  %v4933_v5 = vmul.f32 -1.442695, %v2089_v58  ;;  %v2093_v2 = vmul.f32 %v6308_v11, %v1865_v43  ;;  %v1894_v55 = vmul.f32 %v6271_v51, %v1874_v7 }
 0x214   :  { %v2010_v35 = vmul.f32 %v6285_v60, %v1874_v7  ;;  %v2257_v31 = vadd.f32 %v2207_v16, %v2181_v47  ;;  %v1899_v58 = vadd.f32 %v1895_v61, %v6263_v50  ;;  %v2015_v9 = vadd.f32 %v2011_v21, %v6266_v49 }
 0x215   :  { %5165 = vpow2.f32 %v4929_v40  ;;  %v2153_v0 = vrot.slane %v2146_v32, %v5637_v12  ;;  %v1993_v48 = vcombine.high %v1992_v23, %v1992_v23  ;;  %v1898_v4 = vadd.f32 %v1894_v55, %v6289_v18 }
 0x216   :  { %5167 = vpow2.f32 %v4933_v5  ;;  %v2014_v26 = vadd.f32 %v2010_v35, %v6319_v15  ;;  %v2077_v43 = vcombine.high %v2076_v62, %v2076_v62  ;;  %v2007_v53 = vadd.f32 %v1985_v52, %v1899_v58 }
 0x217   :  { %v2091_v38 = vadd.f32 %v2069_v30, %v2015_v9  ;;  %v1892_v40 = vrot.slane %v1887_v44, %v5819_v24  ;;  %v2097_v25 = vadd.f32 %v2093_v2, %v6249_v37  ;;  %v2006_v16 = vadd.f32 %v1970_v1, %v1898_v4 }
 0x218   :  { %v2090_v5 = vadd.f32 %v2054_v54, %v2014_v26  ;;  %v2178_v50 = vmul.f32 %v6294_v56, %v1874_v7  ;;  %v2244_v49 = vrot.slane %v2188_v14, %v5637_v12  ;;  %v4937_v47 = vmul.f32 -1.442695, %v2257_v31 }
 0x219   :  { %v4931_v32 = vmul.f32 -1.442695, %v2007_v53  ;;  %v4935_v23 = vmul.f32 -1.442695, %v2091_v38  ;;  %v2000_v18 = vrot.slane %v1993_v48, %v5637_v12  ;;  %v2095_v15 = vmul.f32 %v6308_v11, %v1883_v27 }
 0x21a   :  { %v2182_v62 = vadd.f32 %v2178_v50, %v6326_v41  ;;  %v4930_v30 = vmul.f32 -1.442695, %v2006_v16  ;;  %v4934_v52 = vmul.f32 -1.442695, %v2090_v5  ;;  %v1896_v37 = vmul.f32 %v6271_v51, %v1892_v40 }
 0x21b   :  { %5169 = vpow2.f32 %v4931_v32  ;;  %v2012_v1 = vmul.f32 %v6285_v60, %v1892_v40  ;;  %v2084_v54 = vrot.slane %v2077_v43, %v5637_v12  ;;  %v2173_v61 = vadd.f32 %v2123_v57, %v2097_v25 }
 0x21c   :  { %v2179_v14 = vmul.f32 %v6294_v56, %v1883_v27  ;;  %5171 = vpow2.f32 %v4935_v23  ;;  %v2094_v21 = vmul.f32 %v6308_v11, %v1874_v7  ;;  %v1900_v2 = vadd.f32 %v1896_v37, %v6338_v22 }
 0x21d   :  { %5173 = vpow2.f32 %v4937_v47  ;;  %v2016_v41 = vadd.f32 %v2012_v1, %v6346_v46  ;;  %v2099_v35 = vadd.f32 %v2095_v15, %v6275_v34  ;;  %v2258_v44 = vadd.f32 %v6360_v8, %v2182_v62 }
 0x21e   :  { %5175 = vpow2.f32 %v4930_v30  ;;  %v2180_v31 = vmul.f32 %v6294_v56, %v1892_v40  ;;  %v2008_v57 = vadd.f32 %v2000_v18, %v1900_v2  ;;  %v2160_v7 = vrot.slane %v6379_v33, %v5637_v12 }
 0x21f   :  { %v5166_v55 = vpop.eup %5165  ;;  %5177 = vpow2.f32 %v4934_v52  ;;  %v2092_v27 = vadd.f32 %v2084_v54, %v2016_v41  ;;  %v2245_v9 = vcombine.high %v2244_v49, %v2244_v49  ;;  %v2183_v46 = vadd.f32 %v2179_v14, %v6278_v39 }
 0x220   :  { %v5168_v58 = vpop.eup %5167  ;;  %v2273_v25 = vadd.f32 1.0, %v5166_v55  ;;  %5179 = vtanh.f32 %v2173_v61  ;;  %v4932_v34 = vmul.f32 -1.442695, %v2008_v57  ;;  %v2175_v8 = vadd.f32 %v2153_v0, %v2099_v35 }
 0x221   :  { %v2297_v22 = vadd.f32 1.0, %v5168_v58  ;;  %v4936_v48 = vmul.f32 -1.442695, %v2092_v27  ;;  %v2098_v4 = vadd.f32 %v2094_v21, %v6322_v28  ;;  %v2096_v26 = vmul.f32 %v6308_v11, %v1892_v40 }
 0x222   :  { %5181 = vrcp.f32 %v2273_v25  ;;  %v7915_v43 = vcombine.high %v6363_v36, %v6363_v36  ;;  %v4938_v33 = vmul.f32 -1.442695, %v2258_v44  ;;  %v2184_v38 = vadd.f32 %v2180_v31, %v6349_v20 }
 0x223   :  { %5183 = vrcp.f32 %v2297_v22  ;;  %v7916_v39 = vcombine.high %v6334_v13, %v6334_v13  ;;  %v2161_v5 = vcombine.high %v2160_v7, %v2160_v7  ;;  %v7917_v0 = vcombine.high %v6301_v3, %v6301_v3 }
 0x224   :  { %v2237_v53 = vrot.slane %v7915_v43, %v5637_v12  ;;  %5185 = vpow2.f32 %v4932_v34  ;;  %v2252_v50 = vrot.slane %v2245_v9, %v5637_v12 }
 0x225   :  { %v2138_v16 = vrot.slane %v7916_v39, %v5637_v12  ;;  %v568_v28 = vadd.f32 %v6246_v29, %v7917_v0  ;;  %v5170_v40 = vpop.eup %5169  ;;  %5187 = vpow2.f32 %v4936_v48  ;;  %v2168_v3 = vrot.slane %v2161_v5, %v5637_v12 }
 0x226   :  { %v2259_v36 = vadd.f32 %v2237_v53, %v2183_v46  ;;  %v5172_v49 = vpop.eup %5171  ;;  %v2275_v47 = vadd.f32 1.0, %v5170_v40  ;;  %5189 = vtanh.f32 %v2175_v8  ;;  %v2260_v18 = vadd.f32 %v2252_v50, %v2184_v38 }
 0x227   :  { %v2174_v20 = vadd.f32 %v2138_v16, %v2098_v4  ;;  %v2100_v32 = vadd.f32 %v2096_v26, %v568_v28  ;;  %v5174_v23 = vpop.eup %5173  ;;  %v2299_v13 = vadd.f32 1.0, %v5172_v49  ;;  %5191 = vpow2.f32 %v4938_v33 }
 0x228   :  { %v5176_v15 = vpop.eup %5175  ;;  %5193 = vrcp.f32 %v2275_v47  ;;  %v4939_v30 = vmul.f32 -1.442695, %v2259_v36  ;;  %v4940_v14 = vmul.f32 -1.442695, %v2260_v18  ;;  %v2325_v2 = vadd.f32 1.0, %v5174_v23 }
 0x229   :  { %v5178_v62 = vpop.eup %5177  ;;  %5195 = vrcp.f32 %v2299_v13  ;;  %v2274_v52 = vadd.f32 1.0, %v5176_v15  ;;  %v2176_v54 = vadd.f32 %v2168_v3, %v2100_v32 }
 0x22a   :  { %v5180_v37 = vpop.eup %5179  ;;  %v2298_v1 = vadd.f32 1.0, %v5178_v62  ;;  %5197 = vtanh.f32 %v2174_v20 }
 0x22b   :  { %5199 = vrcp.f32 %v2274_v52 }
 0x22c   :  { %v5182_v61 = vpop.eup %5181  ;;  %5201 = vrcp.f32 %v2298_v1 }
 0x22d   :  { %v5184_v21 = vpop.eup %5183  ;;  %v2341_v41 = vmul.f32 %v5182_v61, %v5180_v37  ;;  %5203 = vpow2.f32 %v4939_v30  ;;  %v7918_v30 = vld [vmem:[#allocation30_spill] sm:$0xff]  ;;  %v7919_v37 = vld [vmem:[#allocation31_spill] sm:$0xff] }
 0x22e   :  { %v2337_v55 = vmul.f32 %v5184_v21, %v6189_v42  ;;  %v5186_v35 = vpop.eup %5185  ;;  %5205 = vtanh.f32 %v2176_v54  ;;  %v581_v52 = vcombine.high %v7918_v30, %v7918_v30  ;;  %v593_v1 = vcombine.high %v7919_v37, %v7919_v37  ;;  %v7920_v54 = vld [vmem:[#allocation35_spill] sm:$0xff] }
 0x22f   :  { %v5188_v44 = vpop.eup %5187  ;;  %v2276_v31 = vadd.f32 1.0, %v5186_v35  ;;  %5207 = vpow2.f32 %v4940_v14  ;;  %v605_v61 = vcombine.high %v7920_v54, %v7920_v54  ;;  %v7921_v14 = vld [vmem:[#allocation36_spill] sm:$0xff] }
 0x230   :  { %v6437_v58 = vadd.f32 %v2341_v41, %v2337_v55  ;;  %v5190_v25 = vpop.eup %5189  ;;  %v2300_v57 = vadd.f32 1.0, %v5188_v44  ;;  %5209 = vrcp.f32 %v2325_v2  ;;  %v617_v21 = vcombine.high %v7921_v14, %v7921_v14  ;;  %v7922_v41 = vld [vmem:[#allocation24_spill] sm:$0xff]  ;;  %v7923_v44 = vld [vmem:[#allocation25_spill] sm:$0xff] }
 0x231   :  { %v5192_v27 = vpop.eup %5191  ;;  %5211 = vrcp.f32 %v2276_v31  ;;  %v582_v55 = vcombine.high %v7922_v41, %v7922_v41  ;;  %v6468_v35 = vadd.f32 %v6230_v10, %v581_v52  ;;  %v594_v31 = vcombine.high %v7923_v44, %v7923_v44  ;;  %v7932_v41 = vld [vmem:[#allocation44_spill] sm:$0xff]  ;;  %v7933_v44 = vld [vmem:[#allocation45_spill] sm:$0xff] }
 0x232   :  { %v5194_v7 = vpop.eup %5193  ;;  %5213 = vrcp.f32 %v2300_v57  ;;  %v2326_v8 = vadd.f32 1.0, %v5192_v27  ;;  %v7925_v27 = vld [vmem:[#allocation28_spill] sm:$0xff] }
 0x233   :  { %v5196_v9 = vpop.eup %5195  ;;  %5215 = vtanh.f32 %v6437_v58  ;;  %v2343_v22 = vmul.f32 %v5194_v7, %v5190_v25  ;;  %v7924_v25 = vld [vmem:[#allocation27_spill] sm:$0xff]  ;;  %v618_v7 = vcombine.high %v7925_v27, %v7925_v27 }
 0x234   :  { %v5198_v46 = vpop.eup %5197  ;;  %v2339_v42 = vmul.f32 %v5196_v9, %v6193_v19  ;;  %5217 = vrcp.f32 %v2326_v8  ;;  %v606_v57 = vcombine.high %v7924_v25, %v7924_v25  ;;  %v7926_v9 = vld [vmem:[#allocation37_spill] sm:$0xff]  ;;  %v6484_v8 = vadd.f32 %v6246_v29, %v605_v61 }
 0x235   :  { %v5200_v34 = vpop.eup %5199 }
 0x236   :  { %v5202_v48 = vpop.eup %5201  ;;  %v2342_v4 = vmul.f32 %v5200_v34, %v5198_v46  ;;  %v6441_v26 = vadd.f32 %v2343_v22, %v2339_v42  ;;  %v583_v22 = vcombine.high %v7926_v9, %v7926_v9  ;;  %v7927_v46 = vld [vmem:[#allocation39_spill] sm:$0xff] }
 0x237   :  { %v5204_v43 = vpop.eup %5203  ;;  %v2338_v53 = vmul.f32 %v5202_v48, %v6185_v59  ;;  %v595_v42 = vcombine.high %v7927_v46, %v7927_v46  ;;  %v6481_v48 = vadd.f32 %v6238_v63, %v593_v1 }
 0x238   :  { %v5206_v33 = vpop.eup %5205  ;;  %v2327_v0 = vadd.f32 1.0, %v5204_v43 }
 0x239   :  { %v5208_v38 = vpop.eup %5207  ;;  %v6444_v39 = vadd.f32 %v2342_v4, %v2338_v53  ;;  %v7928_v4 = vld [vmem:[#allocation17_spill] sm:$0xff]  ;;  %v7929_v53 = vld [vmem:[#allocation40_spill] sm:$0xff] }
 0x23a   :  { %v5210_v16 = vpop.eup %5209  ;;  %v2328_v28 = vadd.f32 1.0, %v5208_v38  ;;  %v6487_v43 = vadd.f32 %v7928_v4, %v617_v21 }
 0x23b   :  { %v5212_v5 = vpop.eup %5211  ;;  %5219 = vtanh.f32 %v6444_v39 }
 0x23c   :  { %v5214_v19 = vpop.eup %5213  ;;  %v2344_v40 = vmul.f32 %v5212_v5, %v5206_v33  ;;  %5221 = vtanh.f32 %v6441_v26  ;;  %v607_v33 = vcombine.high %v7929_v53, %v7929_v53 }
 0x23d   :  { %v5216_v50 = vpop.eup %5215  ;;  %v2340_v36 = vmul.f32 %v5214_v19, %v6197_v17  ;;  %5223 = vrcp.f32 %v2327_v0  ;;  %v6495_v0 = vadd.f32 %v6230_v10, %v582_v55  ;;  %v596_v55 = vcombine.high %v7932_v41, %v7932_v41 }
 0x23e   :  { %v2353_v49 = vmul.f32 %v5216_v50, %v5210_v16  ;;  %5225 = vrcp.f32 %v2328_v28  ;;  %v5218_v47 = vpop.eup %5217  ;;  %v7930_v50 = vld [vmem:[#allocation42_spill] sm:$0xff] }
 0x23f   :  { %v6449_v59 = vadd.f32 %v2344_v40, %v2340_v36  ;;  %v6500_v40 = vadd.f32 %v6238_v63, %v594_v31  ;;  %v619_v36 = vcombine.high %v7930_v50, %v7930_v50  ;;  %v620_v31 = vcombine.high %v7933_v44, %v7933_v44 }
 0x240   :  { %2402 = vperm.xlu0 %5016, %v2353_v49  }
 0x241   :  { %5227 = vtanh.f32 %v6449_v59  ;;  %v6531_v14 = vadd.f32 %v7928_v4, %v619_v36  ;;  %v6551_v36 = vadd.f32 %v6238_v63, %v596_v55 }
 0x245   :  { %v5220_v20 = vpop.eup %5219 }
 0x246   :  { %v2354_v32 = vmul.f32 %v5220_v20, %v5218_v47  ;;  %v5222_v23 = vpop.eup %5221  ;;  %v6508_v47 = vadd.f32 %v7928_v4, %v618_v7  ;;  %v6511_v20 = vadd.f32 %v6230_v10, %v583_v22  ;;  %v7934_v7 = vld [vmem:[#allocation46_spill] sm:$0xff] }
 0x247   :  { %v5224_v13 = vpop.eup %5223  ;;  %v608_v9 = vcombine.high %v7934_v7, %v7934_v7 }
 0x248   :  { %2410 = vperm.xlu1 %5017, %v2354_v32   ;;  %v5226_v18 = vpop.eup %5225  ;;  %v2355_v15 = vmul.f32 %v5224_v13, %v5222_v23 }
 0x24b   :  { %v5228_v3 = vpop.eup %5227 }
 0x24c   :  { %v2356_v17 = vmul.f32 %v5228_v3, %v5226_v18  ;;  %2418 = vperm.xlu1 %5017, %v2355_v15   ;;  %v7931_v3 = vld [vmem:[#allocation43_spill] sm:$0xff] }
 0x24e   :  { %2426 = vperm.xlu0 %5016, %v2356_v17  }
 0x250   :  { %5018 = vset.pattern.permute.xlu1 %v7900_v45 }
 0x251   :  { %2359 = vperm.xlu1 %5018, %v2353_v49   ;;  %v6505_v49 = vadd.f32 %v6246_v29, %v606_v57 }
 0x252   :  { %5019 = vset.pattern.permute.xlu0 %v7900_v45 }
 0x253   :  { %2368 = vperm.xlu0 %5019, %v2354_v32   ;;  %v6514_v32 = vadd.f32 %v6238_v63, %v595_v42 }
 0x255   :  { %2377 = vperm.xlu1 %5018, %v2355_v15   ;;  %v6519_v15 = vadd.f32 %v6246_v29, %v607_v33 }
 0x257   :  { %5020 = vset.pattern.permute.xlu0 %v7901_v6 }
 0x259   :  { %2386 = vperm.xlu1 %5018, %v2356_v17   ;;  %v584_v17 = vcombine.high %v7931_v3, %v7931_v3 }
 0x25b   :  { %v6545_v33 = vadd.f32 %v6230_v10, %v584_v17 }
 0x25d   :  { %5021 = vset.pattern.permute.xlu1 %v7901_v6 }
 0x2bf   :  { %v2403_v62 = vpop.permute.xlu0 %2402 }
 0x2c0   :  { %v2408_v2 = vrot.slane %v2403_v62, %v5819_v24 }
 0x2c2   :  { %v2433_v38 = vmul.f32 %v6271_v51, %v2408_v2  ;;  %v2517_v16 = vmul.f32 %v6285_v60, %v2408_v2  ;;  %v2601_v5 = vmul.f32 %v6308_v11, %v2408_v2  ;;  %v2685_v19 = vmul.f32 %v6294_v56, %v2408_v2 }
 0x2c4   :  { %v2447_v62 = vrot.slane %v2433_v38, %v5637_v12  ;;  %v2531_v30 = vrot.slane %v2517_v16, %v5637_v12  ;;  %v2615_v52 = vrot.slane %v2601_v5, %v5637_v12  ;;  %v2699_v1 = vrot.slane %v2685_v19, %v5637_v12 }
 0x2c6   :  { %v2448_v22 = vcombine.high %v2447_v62, %v2447_v62  ;;  %v2532_v46 = vcombine.high %v2531_v30, %v2531_v30  ;;  %v2616_v42 = vcombine.high %v2615_v52, %v2615_v52  ;;  %v2700_v38 = vcombine.high %v2699_v1, %v2699_v1 }
 0x2c7   :  { %v2411_v34 = vpop.permute.xlu1 %2410 }
 0x2c8   :  { %v2416_v28 = vrot.slane %v2411_v34, %v5819_v24  ;;  %v2455_v17 = vrot.slane %v2448_v22, %v5637_v12  ;;  %v2539_v62 = vrot.slane %v2532_v46, %v5637_v12  ;;  %v2623_v30 = vrot.slane %v2616_v42, %v5637_v12 }
 0x2c9   :  { %v2707_v52 = vrot.slane %v2700_v38, %v5637_v12 }
 0x2ca   :  { %v2434_v23 = vmul.f32 %v6271_v51, %v2416_v28  ;;  %v2518_v13 = vmul.f32 %v6285_v60, %v2416_v28  ;;  %v2602_v54 = vmul.f32 %v6308_v11, %v2416_v28  ;;  %v2686_v61 = vmul.f32 %v6294_v56, %v2416_v28 }
 0x2cb   :  { %v2419_v18 = vpop.permute.xlu1 %2418 }
 0x2cc   :  { %v2424_v37 = vrot.slane %v2419_v18, %v5819_v24  ;;  %v2462_v21 = vrot.slane %v2434_v23, %v5637_v12  ;;  %v2546_v2 = vrot.slane %v2518_v13, %v5637_v12  ;;  %v2630_v16 = vrot.slane %v2602_v54, %v5637_v12 }
 0x2cd   :  { %v2427_v34 = vpop.permute.xlu0 %2426  ;;  %v2714_v5 = vrot.slane %v2686_v61, %v5637_v12  ;;  %v6554_v23 = vadd.f32 %v7928_v4, %v620_v31 }
 0x2ce   :  { %v2435_v25 = vmul.f32 %v6271_v51, %v2424_v37  ;;  %v2519_v57 = vmul.f32 %v6285_v60, %v2424_v37  ;;  %v2687_v27 = vmul.f32 %v6294_v56, %v2424_v37  ;;  %v2603_v19 = vmul.f32 %v6308_v11, %v2424_v37 }
 0x2cf   :  { %v2463_v28 = vcombine.high %v2462_v21, %v2462_v21  ;;  %v2547_v50 = vcombine.high %v2546_v2, %v2546_v2  ;;  %v2432_v63 = vrot.slane %v2427_v34, %v5819_v24  ;;  %v2631_v4 = vcombine.high %v2630_v16, %v2630_v16 }
 0x2d0   :  { %v2360_v53 = vpop.permute.xlu1 %2359  ;;  %v2477_v13 = vrot.slane %v2435_v25, %v5637_v12  ;;  %v2561_v10 = vrot.slane %v2519_v57, %v5637_v12  ;;  %v2729_v18 = vrot.slane %v2687_v27, %v5637_v12  ;;  %v2715_v37 = vcombine.high %v2714_v5, %v2714_v5 }
 0x2d1   :  { %v2365_v3 = vrot.slane %v2360_v53, %v5819_v24  ;;  %v6566_v1 = vrot.slane %v2603_v19, %v5637_v12  ;;  %v2470_v54 = vrot.slane %v2463_v28, %v5637_v12  ;;  %v2554_v55 = vrot.slane %v2547_v50, %v5637_v12 }
 0x2d2   :  { %v2369_v41 = vpop.permute.xlu0 %2368  ;;  %v2478_v44 = vcombine.high %v2477_v13, %v2477_v13  ;;  %v2562_v31 = vcombine.high %v2561_v10, %v2561_v10  ;;  %v2730_v25 = vcombine.high %v2729_v18, %v2729_v18  ;;  %v2436_v57 = vmul.f32 %v6271_v51, %v2432_v63 }
 0x2d3   :  { %v2393_v61 = vmul.f32 %v6271_v51, %v2365_v3  ;;  %v2509_v21 = vmul.f32 %v6285_v60, %v2365_v3  ;;  %v2677_v2 = vmul.f32 %v6294_v56, %v2365_v3  ;;  %v2638_v34 = vrot.slane %v2631_v4, %v5637_v12 }
 0x2d4   :  { %v2378_v42 = vpop.permute.xlu1 %2377  ;;  %v2520_v53 = vmul.f32 %v6285_v60, %v2432_v63  ;;  %v2688_v38 = vmul.f32 %v6294_v56, %v2432_v63  ;;  %v2374_v16 = vrot.slane %v2369_v41, %v5819_v24  ;;  %v2593_v28 = vmul.f32 %v6308_v11, %v2365_v3 }
 0x2d5   :  { %v2397_v27 = vadd.f32 %v2393_v61, %v6468_v35  ;;  %v2513_v22 = vadd.f32 %v2509_v21, %v6481_v48  ;;  %v2681_v46 = vadd.f32 %v2677_v2, %v6487_v43  ;;  %v2722_v35 = vrot.slane %v2715_v37, %v5637_v12 }
 0x2d6   :  { %v2485_v48 = vrot.slane %v2478_v44, %v5637_v12  ;;  %v2569_v43 = vrot.slane %v2562_v31, %v5637_v12  ;;  %v2737_v13 = vrot.slane %v2730_v25, %v5637_v12  ;;  %v2492_v10 = vrot.slane %v2436_v57, %v5637_v12 }
 0x2d7   :  { %v2505_v5 = vadd.f32 %v2455_v17, %v2397_v27  ;;  %v2589_v19 = vadd.f32 %v2539_v62, %v2513_v22  ;;  %v2757_v50 = vadd.f32 %v2707_v52, %v2681_v46  ;;  %v2604_v18 = vmul.f32 %v6308_v11, %v2432_v63 }
 0x2d8   :  { %v2576_v17 = vrot.slane %v2520_v53, %v5637_v12  ;;  %v6590_v62 = vrot.slane %v2688_v38, %v5637_v12  ;;  %v2394_v3 = vmul.f32 %v6271_v51, %v2374_v16  ;;  %v2510_v52 = vmul.f32 %v6285_v60, %v2374_v16  ;;  %v2387_v41 = vpop.permute.xlu1 %2386 }
 0x2d9   :  { %v4941_v4 = vmul.f32 -1.442695, %v2505_v5  ;;  %v4945_v61 = vmul.f32 -1.442695, %v2589_v19  ;;  %v2597_v37 = vadd.f32 %v2593_v28, %v6484_v8  ;;  %v4949_v21 = vmul.f32 -1.442695, %v2757_v50 }
 0x2da   :  { %v2383_v2 = vrot.slane %v2378_v42, %v5819_v24  ;;  %v2398_v63 = vadd.f32 %v2394_v3, %v6495_v0  ;;  %v2514_v44 = vadd.f32 %v2510_v52, %v6500_v40  ;;  %v2594_v31 = vmul.f32 %v6308_v11, %v2374_v16 }
 0x2db   :  { %5229 = vpow2.f32 %v4941_v4  ;;  %v2493_v25 = vcombine.high %v2492_v10, %v2492_v10  ;;  %v2678_v57 = vmul.f32 %v6294_v56, %v2374_v16  ;;  %v2577_v8 = vcombine.high %v2576_v17, %v2576_v17 }
 0x2dc   :  { %5231 = vpow2.f32 %v4945_v61  ;;  %v2395_v27 = vmul.f32 %v6271_v51, %v2383_v2  ;;  %v2511_v22 = vmul.f32 %v6285_v60, %v2383_v2  ;;  %v2506_v46 = vadd.f32 %v2470_v54, %v2398_v63 }
 0x2dd   :  { %v2590_v53 = vadd.f32 %v2554_v55, %v2514_v44  ;;  %v2392_v42 = vrot.slane %v2387_v41, %v5819_v24  ;;  %v2673_v38 = vadd.f32 %v2623_v30, %v2597_v37  ;;  %v2679_v40 = vmul.f32 %v6294_v56, %v2383_v2 }
 0x2de   :  { %v2399_v5 = vadd.f32 %v2395_v27, %v6511_v20  ;;  %v2515_v0 = vadd.f32 %v2511_v22, %v6514_v32  ;;  %5233 = vpow2.f32 %v4949_v21  ;;  %v2598_v19 = vadd.f32 %v2594_v31, %v6505_v49 }
 0x2df   :  { %v4942_v16 = vmul.f32 -1.442695, %v2506_v46  ;;  %v4946_v28 = vmul.f32 -1.442695, %v2590_v53  ;;  %v2682_v50 = vadd.f32 %v2678_v57, %v6508_v47  ;;  %v2683_v54 = vadd.f32 %v2679_v40, %v6531_v14 }
 0x2e0   :  { %v2507_v10 = vadd.f32 %v2485_v48, %v2399_v5  ;;  %v2591_v4 = vadd.f32 %v2569_v43, %v2515_v0  ;;  %v2500_v55 = vrot.slane %v2493_v25, %v5637_v12  ;;  %v2396_v20 = vmul.f32 %v6271_v51, %v2392_v42 }
 0x2e1   :  { %5235 = vpow2.f32 %v4942_v16  ;;  %v2512_v32 = vmul.f32 %v6285_v60, %v2392_v42  ;;  %v2584_v30 = vrot.slane %v2577_v8, %v5637_v12  ;;  %v2674_v17 = vadd.f32 %v2638_v34, %v2598_v19 }
 0x2e2   :  { %5237 = vpow2.f32 %v4946_v28  ;;  %v4943_v61 = vmul.f32 -1.442695, %v2507_v10  ;;  %v4947_v49 = vmul.f32 -1.442695, %v2591_v4  ;;  %v2595_v3 = vmul.f32 %v6308_v11, %v2383_v2 }
 0x2e3   :  { %v2400_v47 = vadd.f32 %v2396_v20, %v6545_v33  ;;  %v2516_v48 = vadd.f32 %v2512_v32, %v6551_v36  ;;  %v2758_v43 = vadd.f32 %v2722_v35, %v2682_v50  ;;  %v2759_v52 = vadd.f32 %v2737_v13, %v2683_v54 }
 0x2e4   :  { %5239 = vpow2.f32 %v4943_v61  ;;  %v2680_v51 = vmul.f32 %v6294_v56, %v2392_v42  ;;  %v2646_v34 = vcombine.high %v6566_v1, %v6566_v1  ;;  %v2660_v2 = vrot.slane %v2604_v18, %v5637_v12 }
 0x2e5   :  { %v5230_v14 = vpop.eup %5229  ;;  %5241 = vpow2.f32 %v4947_v49  ;;  %v2508_v21 = vadd.f32 %v2500_v55, %v2400_v47  ;;  %v2592_v41 = vadd.f32 %v2584_v30, %v2516_v48  ;;  %v2745_v33 = vcombine.high %v6590_v62, %v6590_v62 }
 0x2e6   :  { %v5232_v37 = vpop.eup %5231  ;;  %v2773_v60 = vadd.f32 1.0, %v5230_v14  ;;  %5243 = vtanh.f32 %v2673_v38  ;;  %v4950_v56 = vmul.f32 -1.442695, %v2758_v43  ;;  %v2599_v13 = vadd.f32 %v2595_v3, %v6519_v15 }
 0x2e7   :  { %v2797_v63 = vadd.f32 1.0, %v5232_v37  ;;  %v4944_v36 = vmul.f32 -1.442695, %v2508_v21  ;;  %v4948_v35 = vmul.f32 -1.442695, %v2592_v41  ;;  %v2596_v44 = vmul.f32 %v6308_v11, %v2392_v42 }
 0x2e8   :  { %5245 = vrcp.f32 %v2773_v60  ;;  %v5234_v31 = vpop.eup %5233  ;;  %v4951_v25 = vmul.f32 -1.442695, %v2759_v52  ;;  %v2684_v1 = vadd.f32 %v2680_v51, %v6554_v23  ;;  %v2653_v18 = vrot.slane %v2646_v34, %v5637_v12 }
 0x2e9   :  { %5247 = vrcp.f32 %v2797_v63  ;;  %v2661_v57 = vcombine.high %v2660_v2, %v2660_v2  ;;  %v616_v62 = vadd.f32 %v6246_v29, %v608_v9  ;;  %v2752_v22 = vrot.slane %v2745_v33, %v5637_v12 }
 0x2ea   :  { %5249 = vtanh.f32 %v2674_v17  ;;  %v2675_v8 = vadd.f32 %v2653_v18, %v2599_v13  ;;  %v2825_v28 = vadd.f32 1.0, %v5234_v31 }
 0x2eb   :  { %5251 = vpow2.f32 %v4944_v36  ;;  %v5236_v27 = vpop.eup %5235  ;;  %v2600_v46 = vadd.f32 %v2596_v44, %v616_v62  ;;  %v2760_v23 = vadd.f32 %v2752_v22, %v2684_v1  ;;  %v2668_v38 = vrot.slane %v2661_v57, %v5637_v12 }
 0x2ec   :  { %5253 = vpow2.f32 %v4948_v35  ;;  %v5238_v15 = vpop.eup %5237  ;;  %v2774_v11 = vadd.f32 1.0, %v5236_v27 }
 0x2ed   :  { %5255 = vpow2.f32 %v4950_v56  ;;  %v2798_v53 = vadd.f32 1.0, %v5238_v15  ;;  %v2676_v0 = vadd.f32 %v2668_v38, %v2600_v46  ;;  %v4952_v19 = vmul.f32 -1.442695, %v2760_v23 }
 0x2ee   :  { %5257 = vpow2.f32 %v4951_v25  ;;  %v5240_v42 = vpop.eup %5239 }
 0x2ef   :  { %5259 = vrcp.f32 %v2774_v11  ;;  %v5242_v7 = vpop.eup %5241  ;;  %v2775_v29 = vadd.f32 1.0, %v5240_v42  ;;  %v7938_v42 = vld [vmem:[#allocation12_spill] sm:$0xff] }
 0x2f0   :  { %5261 = vrcp.f32 %v2798_v53  ;;  %v5244_v9 = vpop.eup %5243  ;;  %v2799_v5 = vadd.f32 1.0, %v5242_v7  ;;  %v7937_v53 = vld [vmem:[#allocation11_spill] sm:$0xff]  ;;  %v833_v38 = vcombine.high %v7938_v42, %v7938_v42  ;;  %v7939_v7 = vld [vmem:[#allocation10_spill] sm:$0xff] }
 0x2f1   :  { %5263 = vtanh.f32 %v2675_v8  ;;  %v7936_v8 = vld [vmem:[#allocation8_spill] sm:$0xff]  ;;  %v765_v23 = vcombine.high %v7937_v53, %v7937_v53  ;;  %v7970_v53 = vld [vmem:[#allocation23_spill] sm:$0xff] }
 0x2f2   :  { %v5246_v40 = vpop.eup %5245  ;;  %5265 = vrcp.f32 %v2775_v29  ;;  %v697_v46 = vcombine.high %v7936_v8, %v7936_v8  ;;  %v659_v29 = vcombine.high %v7939_v7, %v7939_v7  ;;  %v7969_v8 = vld [vmem:[#allocation22_spill] sm:$0xff] }
 0x2f3   :  { %v5248_v16 = vpop.eup %5247  ;;  %5267 = vrcp.f32 %v2799_v5  ;;  %v2841_v50 = vmul.f32 %v5246_v40, %v5244_v9 }
 0x2f4   :  { %v5250_v10 = vpop.eup %5249  ;;  %v2837_v4 = vmul.f32 %v5248_v16, %v6437_v58  ;;  %5269 = vtanh.f32 %v2676_v0  ;;  %v6666_v5 = vrot.slane %v697_v46, %v5637_v12  ;;  %v7940_v0 = vld [vmem:[#allocation16_spill] sm:$0xff]  ;;  %v7942_v16 = vld [vmem:[#allocation18_spill] sm:$0xff]  ;;  %v742_v46 = vcombine.high %v7969_v8, %v7969_v8 }
 0x2f5   :  { %v5252_v54 = vpop.eup %5251  ;;  %5271 = vpow2.f32 %v4952_v19  ;;  %v727_v40 = vcombine.high %v7940_v0, %v7940_v0  ;;  %v6671_v19 = vrot.slane %v765_v23, %v5637_v12  ;;  %v810_v23 = vcombine.high %v7970_v53, %v7970_v53 }
 0x2f6   :  { %v5254_v55 = vpop.eup %5253  ;;  %v2776_v20 = vadd.f32 1.0, %v5252_v54  ;;  %v6633_v32 = vadd.f32 %v2841_v50, %v2837_v4  ;;  %5273 = vrcp.f32 %v2825_v28  ;;  %v795_v28 = vcombine.high %v7942_v16, %v7942_v16 }
 0x2f7   :  { %v5256_v30 = vpop.eup %5255  ;;  %v2800_v61 = vadd.f32 1.0, %v5254_v55  ;;  %7941 = vst [vmem:[#allocation20_spill] sm:$0xff] %v6671_v19  ;;  %v6676_v50 = vrot.slane %v833_v38, %v5637_v12  ;;  %v6681_v54 = vrot.slane %v659_v29, %v5637_v12  ;;  %v7972_v29 = vld [vmem:[#allocation26_spill] sm:$0xff] }
 0x2f8   :  { %v5258_v49 = vpop.eup %5257  ;;  %5275 = vrcp.f32 %v2776_v20  ;;  %v2826_v47 = vadd.f32 1.0, %v5256_v30  ;;  %v6689_v20 = vrot.slane %v6666_v5, %v5637_v12  ;;  %v6692_v30 = vrot.slane %v727_v40, %v5637_v12  ;;  %v6805_v40 = vld [vmem:[%s7743_s2] sm:$0x3] }
 0x2f9   :  { %v5260_v17 = vpop.eup %5259  ;;  %5277 = vrcp.f32 %v2800_v61  ;;  %v2827_v37 = vadd.f32 1.0, %v5258_v49  ;;  %7943 = vst [vmem:[#allocation29_spill] sm:$0xff] %v6676_v50  ;;  %7945 = vst [vmem:[#allocation32_spill] sm:$0xff] %v6681_v54  ;;  %v7949_v61 = vld [vmem:[#allocation3_spill] sm:$0xff]  ;;  %v878_v0 = vcombine.high %v7972_v29, %v7972_v29 }
 0x2fa   :  { %v5262_v3 = vpop.eup %5261  ;;  %5279 = vtanh.f32 %v6633_v32  ;;  %v2842_v48 = vmul.f32 %v5260_v17, %v5250_v10  ;;  %v7944_v10 = vld [vmem:[#allocation19_spill] sm:$0xff]  ;;  %7947 = vst [vmem:[#allocation13_spill] sm:$0xff] %v6689_v20  ;;  %7948 = vst [vmem:[#allocation14_spill] sm:$0xff] %v6692_v30  ;;  %v644_v49 = vcombine.high %v7949_v61, %v7949_v61  ;;  %v6698_v17 = vrot.slane %v6671_v19, %v5637_v12 }
 0x2fb   :  { %v5264_v58 = vpop.eup %5263  ;;  %v2838_v14 = vmul.f32 %v5262_v3, %v6444_v39  ;;  %5281 = vrcp.f32 %v2826_v47  ;;  %v863_v4 = vcombine.high %v7944_v10, %v7944_v10  ;;  %v6701_v3 = vrot.slane %v795_v28, %v5637_v12  ;;  %v6811_v28 = vld [vmem:[%s7743_s2 + $0x2] sm:$0x3] }
 0x2fc   :  { %v5266_v43 = vpop.eup %5265  ;;  %7950 = vst [vmem:[#allocation15_spill] sm:$0xff] %v6698_v17 }
 0x2fd   :  { %v5268_v52 = vpop.eup %5267  ;;  %v6637_v51 = vadd.f32 %v2842_v48, %v2838_v14  ;;  %v2843_v60 = vmul.f32 %v5266_v43, %v5264_v58  ;;  %7951 = vst [vmem:[#allocation33_spill] sm:$0xff] %v6701_v3  ;;  %v6705_v48 = vrot.slane %v6676_v50, %v5637_v12  ;;  %v6708_v58 = vrot.slane %v863_v4, %v5637_v12  ;;  %v7954_v14 = vld [vmem:[#allocation4_spill] sm:$0xff] }
 0x2fe   :  { %v2839_v21 = vmul.f32 %v5268_v52, %v6441_v26  ;;  %v5270_v41 = vpop.eup %5269  ;;  %v712_v43 = vcombine.high %v7954_v14, %v7954_v14  ;;  %v7955_v52 = vld [vmem:[#allocation5_spill] sm:$0xff] }
 0x2ff   :  { %5283 = vtanh.f32 %v6637_v51  ;;  %v5272_v34 = vpop.eup %5271  ;;  %7952 = vst [vmem:[#allocation34_spill] sm:$0xff] %v6705_v48  ;;  %7953 = vst [vmem:[#allocation41_spill] sm:$0xff] %v6708_v58 }
 0x300   :  { %v6641_v2 = vadd.f32 %v2843_v60, %v2839_v21  ;;  %v5274_v63 = vpop.eup %5273  ;;  %5285 = vrcp.f32 %v2827_v37  ;;  %v2828_v36 = vadd.f32 1.0, %v5272_v34  ;;  %v780_v37 = vcombine.high %v7955_v52, %v7955_v52  ;;  %v7957_v21 = vld [vmem:[#allocation6_spill] sm:$0xff] }
 0x301   :  { %v6716_v60 = vrot.slane %v6681_v54, %v5637_v12  ;;  %v6723_v34 = vld [vmem:[%s7745_s3] sm:$0x1] }
 0x302   :  { %v5276_v33 = vpop.eup %5275  ;;  %5287 = vtanh.f32 %v6641_v2  ;;  %7958 = vst [vmem:[#allocation30_spill] sm:$0xff] %v6723_v34 }
 0x303   :  { %v5278_v39 = vpop.eup %5277  ;;  %v2844_v35 = vmul.f32 %v5276_v33, %v5270_v41  ;;  %5289 = vrcp.f32 %v2828_v36  ;;  %7956 = vst [vmem:[#allocation38_spill] sm:$0xff] %v6716_v60  ;;  %v848_v41 = vcombine.high %v7957_v21, %v7957_v21  ;;  %v6732_v33 = vld [vmem:[%s7745_s3 + $0x1] sm:$0x1]  ;;  %v6740_v36 = vrot.slane %v6692_v30, %v5637_v12 }
 0x304   :  { %v5280_v56 = vpop.eup %5279  ;;  %v2840_v13 = vmul.f32 %v5278_v39, %v6449_v59  ;;  %v7935_v59 = vld [vmem:[#allocation7_spill] sm:$0xff]  ;;  %7959 = vst [vmem:[#allocation31_spill] sm:$0xff] %v6732_v33  ;;  %v6736_v39 = vadd.f32 %v6732_v33, %v6689_v20 }
 0x305   :  { %v2853_v44 = vmul.f32 %v5280_v56, %v5274_v63  ;;  %v5282_v26 = vpop.eup %5281  ;;  %v629_v11 = vcombine.high %v7935_v59, %v7935_v59  ;;  %7960 = vst [vmem:[#allocation35_spill] sm:$0xff] %v6740_v36  ;;  %v6782_v59 = vadd.f32 %v6723_v34, %v6716_v60  ;;  %v6794_v38 = vadd.f32 %v6732_v33, %v6740_v36 }
 0x306   :  { %v6645_v31 = vadd.f32 %v2844_v35, %v2840_v13  ;;  %v6743_v35 = vrot.slane %v644_v49, %v5637_v12  ;;  %v6749_v13 = vld [vmem:[%s7745_s3 + $0x2] sm:$0x1]  ;;  %v6824_v49 = vld [vmem:[%s7743_s2 + $0x4] sm:$0x3] }
 0x307   :  { %2902 = vperm.xlu0 %5020, %v2853_v44   ;;  %v6663_v9 = vrot.slane %v629_v11, %v5637_v12  ;;  %v6785_v11 = vrot.slane %v848_v41, %v5637_v12 }
 0x308   :  { %5291 = vtanh.f32 %v6645_v31  ;;  %7961 = vst [vmem:[#allocation36_spill] sm:$0xff] %v6743_v35  ;;  %v6798_v7 = vrot.slane %v6743_v35, %v5637_v12 }
 0x309   :  { %v5284_v25 = vpop.eup %5283  ;;  %v6685_v55 = vrot.slane %v6663_v9, %v5637_v12  ;;  %7968 = vst [vmem:[#allocation39_spill] sm:$0xff] %v6785_v11 }
 0x30a   :  { %v2854_v1 = vmul.f32 %v5284_v25, %v5282_v26  ;;  %v5286_v18 = vpop.eup %5285  ;;  %v6757_v26 = vrot.slane %v6701_v3, %v5637_v12  ;;  %v7963_v25 = vld [vmem:[#allocation21_spill] sm:$0xff]  ;;  %7971 = vst [vmem:[#allocation17_spill] sm:$0xff] %v6798_v7  ;;  %v6859_v29 = vadd.f32 %v6723_v34, %v6798_v7 }
 0x30b   :  { %7946 = vst [vmem:[#allocation9_spill] sm:$0xff] %v6685_v55  ;;  %v6727_v63 = vadd.f32 %v6723_v34, %v6685_v55 }
 0x30c   :  { %v5288_v57 = vpop.eup %5287  ;;  %2910 = vperm.xlu1 %5021, %v2854_v1   ;;  %7962 = vst [vmem:[#allocation24_spill] sm:$0xff] %v6757_v26  ;;  %v6816_v4 = vadd.f32 %v6749_v13, %v6757_v26 }
 0x30d   :  { %v2855_v62 = vmul.f32 %v5288_v57, %v5286_v18  ;;  %v5290_v27 = vpop.eup %5289  ;;  %v6764_v18 = vld [vmem:[%s7745_s3 + $0x3] sm:$0x1] }
 0x30e   :  { %7964 = vst [vmem:[#allocation25_spill] sm:$0xff] %v6764_v18  ;;  %v6768_v57 = vadd.f32 %v6764_v18, %v6705_v48 }
 0x310   :  { %2918 = vperm.xlu1 %5021, %v2855_v62  }
 0x312   :  { %v5292_v22 = vpop.eup %5291 }
 0x313   :  { %v2856_v15 = vmul.f32 %v5292_v22, %v5290_v27  ;;  %v6775_v27 = vrot.slane %v712_v43, %v5637_v12  ;;  %v6778_v22 = vrot.slane %v780_v37, %v5637_v12  ;;  %v6842_v37 = vld [vmem:[%s7743_s2 + $0x6] sm:$0x3] }
 0x314   :  { %5022 = vset.pattern.permute.xlu1 %v7900_v45 }
 0x315   :  { %2926 = vperm.xlu0 %5020, %v2856_v15   ;;  %2859 = vperm.xlu1 %5022, %v2853_v44   ;;  %v6753_v44 = vadd.f32 %v6749_v13, %v6698_v17  ;;  %7966 = vst [vmem:[#allocation28_spill] sm:$0xff] %v6775_v27  ;;  %7967 = vst [vmem:[#allocation37_spill] sm:$0xff] %v6778_v22  ;;  %v6833_v43 = vrot.slane %v6775_v27, %v5637_v12 }
 0x316   :  { %v6837_v52 = vrot.slane %v6778_v22, %v5637_v12 }
 0x317   :  { %7974 = vst [vmem:[#allocation42_spill] sm:$0xff] %v6833_v43  ;;  %v6875_v7 = vadd.f32 %v6732_v33, %v6833_v43 }
 0x318   :  { %7975 = vst [vmem:[#allocation43_spill] sm:$0xff] %v6837_v52 }
 0x319   :  { %5023 = vset.pattern.permute.xlu0 %v7900_v45  ;;  %2877 = vperm.xlu1 %5022, %v2855_v62   ;;  %v6772_v62 = vrot.slane %v6708_v58, %v5637_v12 }
 0x31a   :  { %2868 = vperm.xlu0 %5023, %v2854_v1   ;;  %v674_v1 = vcombine.high %v7963_v25, %v7963_v25  ;;  %v6847_v25 = vrot.slane %v6785_v11, %v5637_v12 }
 0x31b   :  { %7965 = vst [vmem:[#allocation27_spill] sm:$0xff] %v6772_v62  ;;  %v6829_v14 = vadd.f32 %v6764_v18, %v6772_v62 }
 0x31c   :  { %v6819_v61 = vrot.slane %v674_v1, %v5637_v12  ;;  %7976 = vst [vmem:[#allocation44_spill] sm:$0xff] %v6847_v25  ;;  %v6850_v1 = vrot.slane %v742_v46, %v5637_v12 }
 0x31d   :  { %2886 = vperm.xlu1 %5022, %v2856_v15  }
 0x31e   :  { %5024 = vset.pattern.permute.xlu0 %v7901_v6  ;;  %7973 = vst [vmem:[#allocation40_spill] sm:$0xff] %v6819_v61  ;;  %7977 = vst [vmem:[#allocation45_spill] sm:$0xff] %v6850_v1 }
 0x321   :  { %5025 = vset.pattern.permute.xlu1 %v7901_v6 }
 0x386   :  { %v2903_v47 = vpop.permute.xlu0 %2902 }
 0x387   :  { %v2908_v56 = vrot.slane %v2903_v47, %v5819_v24 }
 0x389   :  { %v2933_v16 = vmul.f32 %v6805_v40, %v2908_v56  ;;  %v3017_v10 = vmul.f32 %v6811_v28, %v2908_v56  ;;  %v3101_v47 = vmul.f32 %v6824_v49, %v2908_v56  ;;  %v3185_v21 = vmul.f32 %v6842_v37, %v2908_v56 }
 0x38a   :  { %v6862_v56 = vrot.slane %v878_v0, %v5637_v12  ;;  %v6879_v0 = vadd.f32 %v6749_v13, %v6837_v52 }
 0x38b   :  { %v2911_v15 = vpop.permute.xlu1 %2910  ;;  %v2947_v62 = vrot.slane %v2933_v16, %v5637_v12  ;;  %v3031_v26 = vrot.slane %v3017_v10, %v5637_v12  ;;  %v3115_v60 = vrot.slane %v3101_v47, %v5637_v12  ;;  %v3199_v16 = vrot.slane %v3185_v21, %v5637_v12 }
 0x38c   :  { %v2916_v42 = vrot.slane %v2911_v15, %v5819_v24  ;;  %v6853_v15 = vrot.slane %v810_v23, %v5637_v12  ;;  %7979 = vst [vmem:[#allocation7_spill] sm:$0xff] %v6862_v56  ;;  %v6869_v23 = vrot.slane %v6819_v61, %v5637_v12  ;;  %v6884_v10 = vadd.f32 %v6764_v18, %v6847_v25 }
 0x38d   :  { %v6899_v21 = vrot.slane %v6862_v56, %v5637_v12  ;;  %v2948_v25 = vcombine.high %v2947_v62, %v2947_v62  ;;  %v3032_v20 = vcombine.high %v3031_v26, %v3031_v26  ;;  %v3200_v58 = vcombine.high %v3199_v16, %v3199_v16 }
 0x38e   :  { %7978 = vst [vmem:[#allocation46_spill] sm:$0xff] %v6853_v15  ;;  %v2934_v8 = vmul.f32 %v6805_v40, %v2916_v42  ;;  %v3018_v53 = vmul.f32 %v6811_v28, %v2916_v42  ;;  %7980 = vst [vmem:[#allocation8_spill] sm:$0xff] %v6869_v23  ;;  %v3186_v36 = vmul.f32 %v6842_v37, %v2916_v42 }
 0x38f   :  { %v2919_v41 = vpop.permute.xlu1 %2918  ;;  %v6892_v47 = vrot.slane %v6853_v15, %v5637_v12  ;;  %v3102_v52 = vmul.f32 %v6824_v49, %v2916_v42  ;;  %7982 = vst [vmem:[#allocation12_spill] sm:$0xff] %v6899_v21  ;;  %v3039_v16 = vrot.slane %v3032_v20, %v5637_v12 }
 0x390   :  { %v2924_v46 = vrot.slane %v2919_v41, %v5819_v24  ;;  %v6888_v41 = vrot.slane %v6850_v1, %v5637_v12  ;;  %v2962_v43 = vrot.slane %v2934_v8, %v5637_v12  ;;  %v3046_v48 = vrot.slane %v3018_v53, %v5637_v12 }
 0x391   :  { %v6904_v1 = vadd.f32 %v6723_v34, %v6869_v23  ;;  %v3214_v15 = vrot.slane %v3186_v36, %v5637_v12  ;;  %v3116_v8 = vcombine.high %v3115_v60, %v3115_v60  ;;  %v6916_v34 = vrot.slane %v3102_v52, %v5637_v12 }
 0x392   :  { %7981 = vst [vmem:[#allocation11_spill] sm:$0xff] %v6888_v41  ;;  %v2935_v55 = vmul.f32 %v6805_v40, %v2924_v46  ;;  %v3019_v53 = vmul.f32 %v6811_v28, %v2924_v46  ;;  %v3103_v42 = vmul.f32 %v6824_v49, %v2924_v46  ;;  %v3187_v56 = vmul.f32 %v6842_v37, %v2924_v46 }
 0x393   :  { %v6913_v26 = vadd.f32 %v6732_v33, %v6888_v41  ;;  %v2963_v3 = vcombine.high %v2962_v43, %v2962_v43  ;;  %v3047_v23 = vcombine.high %v3046_v48, %v3046_v48  ;;  %v6920_v60 = vadd.f32 %v6764_v18, %v6899_v21 }
 0x394   :  { %v2860_v17 = vpop.permute.xlu1 %2859  ;;  %v2927_v61 = vpop.permute.xlu0 %2926  ;;  %v2955_v36 = vrot.slane %v2948_v25, %v5637_v12  ;;  %v2977_v46 = vrot.slane %v2935_v55, %v5637_v12  ;;  %v3215_v30 = vcombine.high %v3214_v15, %v3214_v15  ;;  %v6927_v41 = vrot.slane %v3116_v8, %v5637_v12 }
 0x395   :  { %v2865_v62 = vrot.slane %v2860_v17, %v5819_v24  ;;  %v2932_v17 = vrot.slane %v2927_v61, %v5819_v24  ;;  %v3061_v48 = vrot.slane %v3019_v53, %v5637_v12  ;;  %v3145_v43 = vrot.slane %v3103_v42, %v5637_v12 }
 0x396   :  { %v3207_v52 = vrot.slane %v3200_v58, %v5637_v12  ;;  %v6933_v21 = vrot.slane %v3187_v56, %v5637_v12  ;;  %v2970_v55 = vrot.slane %v2963_v3, %v5637_v12  ;;  %v3054_v61 = vrot.slane %v3047_v23, %v5637_v12 }
 0x397   :  { %v2893_v25 = vmul.f32 %v6805_v40, %v2865_v62  ;;  %v3009_v20 = vmul.f32 %v6811_v28, %v2865_v62  ;;  %v3177_v8 = vmul.f32 %v6842_v37, %v2865_v62  ;;  %v2978_v53 = vcombine.high %v2977_v46, %v2977_v46 }
 0x398   :  { %v2936_v42 = vmul.f32 %v6805_v40, %v2932_v17  ;;  %v2878_v18 = vpop.permute.xlu1 %2877  ;;  %v6946_v54 = vrot.slane %v3215_v30, %v5637_v12  ;;  %v3062_v3 = vcombine.high %v3061_v48, %v3061_v48  ;;  %v3146_v11 = vcombine.high %v3145_v43, %v3145_v43 }
 0x399   :  { %v2897_v58 = vadd.f32 %v2893_v25, %v6727_v63  ;;  %v3013_v56 = vadd.f32 %v3009_v20, %v6736_v39  ;;  %v2869_v33 = vpop.permute.xlu0 %2868  ;;  %v3020_v23 = vmul.f32 %v6811_v28, %v2932_v17  ;;  %v6952_v46 = vmul.f32 %v6824_v49, %v2932_v17 }
 0x39a   :  { %v3188_v63 = vmul.f32 %v6842_v37, %v2932_v17  ;;  %v3181_v39 = vadd.f32 %v3177_v8, %v6768_v57  ;;  %v2883_v25 = vrot.slane %v2878_v18, %v5819_v24  ;;  %v2874_v30 = vrot.slane %v2869_v33, %v5819_v24 }
 0x39b   :  { %v3005_v22 = vadd.f32 %v2955_v36, %v2897_v58  ;;  %v3089_v27 = vadd.f32 %v3039_v16, %v3013_v56  ;;  %v2985_v48 = vrot.slane %v2978_v53, %v5637_v12  ;;  %v2992_v43 = vrot.slane %v2936_v42, %v5637_v12 }
 0x39c   :  { %v3069_v15 = vrot.slane %v3062_v3, %v5637_v12  ;;  %v3076_v50 = vrot.slane %v3020_v23, %v5637_v12  ;;  %v2895_v36 = vmul.f32 %v6805_v40, %v2883_v25  ;;  %v3011_v16 = vmul.f32 %v6811_v28, %v2883_v25  ;;  %v2887_v17 = vpop.permute.xlu1 %2886 }
 0x39d   :  { %v4953_v20 = vmul.f32 -1.442695, %v3005_v22  ;;  %v4957_v35 = vmul.f32 -1.442695, %v3089_v27  ;;  %v3093_v57 = vmul.f32 %v6824_v49, %v2865_v62  ;;  %v2894_v18 = vmul.f32 %v6805_v40, %v2874_v30 }
 0x39e   :  { %v3010_v33 = vmul.f32 %v6811_v28, %v2874_v30  ;;  %v3257_v8 = vadd.f32 %v3207_v52, %v3181_v39  ;;  %v2899_v27 = vadd.f32 %v2895_v36, %v6782_v59  ;;  %v3015_v22 = vadd.f32 %v3011_v16, %v6794_v38 }
 0x39f   :  { %5293 = vpow2.f32 %v4953_v20  ;;  %v3153_v53 = vrot.slane %v3146_v11, %v5637_v12  ;;  %v2993_v42 = vcombine.high %v2992_v43, %v2992_v43  ;;  %v2898_v58 = vadd.f32 %v2894_v18, %v6859_v29 }
 0x3a0   :  { %5295 = vpow2.f32 %v4957_v35  ;;  %v3014_v56 = vadd.f32 %v3010_v33, %v6875_v7  ;;  %v3077_v62 = vcombine.high %v3076_v50, %v3076_v50  ;;  %v3007_v3 = vadd.f32 %v2985_v48, %v2899_v27 }
 0x3a1   :  { %v3091_v23 = vadd.f32 %v3069_v15, %v3015_v22  ;;  %v2892_v20 = vrot.slane %v2887_v17, %v5819_v24  ;;  %v3097_v19 = vadd.f32 %v3093_v57, %v6753_v44  ;;  %v3006_v52 = vadd.f32 %v2970_v55, %v2898_v58 }
 0x3a2   :  { %v3090_v35 = vadd.f32 %v3054_v61, %v3014_v56  ;;  %v3178_v59 = vmul.f32 %v6842_v37, %v2874_v30  ;;  %v3244_v38 = vrot.slane %v3188_v63, %v5637_v12  ;;  %v4961_v39 = vmul.f32 -1.442695, %v3257_v8 }
 0x3a3   :  { %v4955_v11 = vmul.f32 -1.442695, %v3007_v3  ;;  %v4959_v43 = vmul.f32 -1.442695, %v3091_v23  ;;  %v3000_v29 = vrot.slane %v2993_v42, %v5637_v12  ;;  %v3095_v7 = vmul.f32 %v6824_v49, %v2883_v25 }
 0x3a4   :  { %v3182_v50 = vadd.f32 %v3178_v59, %v6884_v10  ;;  %v4954_v15 = vmul.f32 -1.442695, %v3006_v52  ;;  %v4958_v48 = vmul.f32 -1.442695, %v3090_v35  ;;  %v2896_v44 = vmul.f32 %v6805_v40, %v2892_v20 }
 0x3a5   :  { %5297 = vpow2.f32 %v4955_v11  ;;  %v3012_v55 = vmul.f32 %v6811_v28, %v2892_v20  ;;  %v3084_v61 = vrot.slane %v3077_v62, %v5637_v12  ;;  %v3173_v63 = vadd.f32 %v6927_v41, %v3097_v19 }
 0x3a6   :  { %v3179_v36 = vmul.f32 %v6842_v37, %v2883_v25  ;;  %5299 = vpow2.f32 %v4959_v43  ;;  %v3094_v16 = vmul.f32 %v6824_v49, %v2874_v30  ;;  %v2900_v57 = vadd.f32 %v2896_v44, %v6904_v1 }
 0x3a7   :  { %5301 = vpow2.f32 %v4961_v39  ;;  %v3016_v10 = vadd.f32 %v3012_v55, %v6913_v26  ;;  %v3099_v33 = vadd.f32 %v3095_v7, %v6816_v4  ;;  %v3258_v17 = vadd.f32 %v6946_v54, %v3182_v50 }
 0x3a8   :  { %5303 = vpow2.f32 %v4954_v15  ;;  %v3180_v8 = vmul.f32 %v6842_v37, %v2892_v20  ;;  %v3008_v41 = vadd.f32 %v3000_v29, %v2900_v57  ;;  %v3160_v30 = vrot.slane %v6952_v46, %v5637_v12 }
 0x3a9   :  { %v5294_v18 = vpop.eup %5293  ;;  %5305 = vpow2.f32 %v4958_v48  ;;  %v3092_v25 = vadd.f32 %v3084_v61, %v3016_v10  ;;  %v3245_v22 = vcombine.high %v3244_v38, %v3244_v38  ;;  %v3183_v26 = vadd.f32 %v3179_v36, %v6829_v14 }
 0x3aa   :  { %v5296_v27 = vpop.eup %5295  ;;  %v3273_v19 = vadd.f32 1.0, %v5294_v18  ;;  %5307 = vtanh.f32 %v3173_v63  ;;  %v4956_v4 = vmul.f32 -1.442695, %v3008_v41  ;;  %v3175_v54 = vadd.f32 %v3153_v53, %v3099_v33 }
 0x3ab   :  { %v3297_v1 = vadd.f32 1.0, %v5296_v27  ;;  %v4960_v42 = vmul.f32 -1.442695, %v3092_v25  ;;  %v3098_v58 = vadd.f32 %v3094_v16, %v6879_v0  ;;  %v3096_v56 = vmul.f32 %v6824_v49, %v2892_v20 }
 0x3ac   :  { %5309 = vrcp.f32 %v3273_v19  ;;  %v7983_v62 = vcombine.high %v6933_v21, %v6933_v21  ;;  %v4962_v46 = vmul.f32 -1.442695, %v3258_v17  ;;  %v3184_v23 = vadd.f32 %v3180_v8, %v6920_v60 }
 0x3ad   :  { %5311 = vrcp.f32 %v3297_v1  ;;  %v7984_v14 = vcombine.high %v6916_v34, %v6916_v34  ;;  %v3161_v35 = vcombine.high %v3160_v30, %v3160_v30  ;;  %v832_v53 = vadd.f32 %v6749_v13, %v6892_v47 }
 0x3ae   :  { %v3237_v3 = vrot.slane %v7983_v62, %v5637_v12  ;;  %5313 = vpow2.f32 %v4956_v4  ;;  %v3252_v20 = vrot.slane %v3245_v22, %v5637_v12 }
 0x3af   :  { %v3138_v52 = vrot.slane %v7984_v14, %v5637_v12  ;;  %v5298_v0 = vpop.eup %5297  ;;  %5315 = vpow2.f32 %v4960_v42  ;;  %v3100_v60 = vadd.f32 %v3096_v56, %v832_v53  ;;  %v3168_v7 = vrot.slane %v3161_v35, %v5637_v12 }
 0x3b0   :  { %v3259_v59 = vadd.f32 %v3237_v3, %v3183_v26  ;;  %v5300_v21 = vpop.eup %5299  ;;  %v3275_v38 = vadd.f32 1.0, %v5298_v0  ;;  %5317 = vtanh.f32 %v3175_v54  ;;  %v3260_v34 = vadd.f32 %v3252_v20, %v3184_v23 }
 0x3b1   :  { %v3174_v39 = vadd.f32 %v3138_v52, %v3098_v58  ;;  %v5302_v11 = vpop.eup %5301  ;;  %v3299_v43 = vadd.f32 1.0, %v5300_v21  ;;  %5319 = vpow2.f32 %v4962_v46  ;;  %v3176_v61 = vadd.f32 %v3168_v7, %v3100_v60 }
 0x3b2   :  { %v5304_v29 = vpop.eup %5303  ;;  %5321 = vrcp.f32 %v3275_v38  ;;  %v4963_v15 = vmul.f32 -1.442695, %v3259_v59  ;;  %v4964_v36 = vmul.f32 -1.442695, %v3260_v34  ;;  %v3325_v57 = vadd.f32 1.0, %v5302_v11 }
 0x3b3   :  { %v5306_v50 = vpop.eup %5305  ;;  %5323 = vrcp.f32 %v3299_v43  ;;  %v3274_v48 = vadd.f32 1.0, %v5304_v29 }
 0x3b4   :  { %v5308_v44 = vpop.eup %5307  ;;  %v3298_v55 = vadd.f32 1.0, %v5306_v50  ;;  %5325 = vtanh.f32 %v3174_v39 }
 0x3b5   :  { %5327 = vrcp.f32 %v3274_v48  ;;  %v941_v48 = vcombine.high %v6666_v5, %v6666_v5 }
 0x3b6   :  { %v5310_v63 = vpop.eup %5309  ;;  %5329 = vrcp.f32 %v3298_v55 }
 0x3b7   :  { %v5312_v16 = vpop.eup %5311  ;;  %v3341_v10 = vmul.f32 %v5310_v63, %v5308_v44  ;;  %5331 = vpow2.f32 %v4963_v15  ;;  %v901_v15 = vcombine.high %v6663_v9, %v6663_v9  ;;  %v7985_v44 = vld [vmem:[#allocation20_spill] sm:$0xff] }
 0x3b8   :  { %v3337_v18 = vmul.f32 %v5312_v16, %v6633_v32  ;;  %v5314_v33 = vpop.eup %5313  ;;  %5333 = vtanh.f32 %v3176_v61  ;;  %v981_v55 = vcombine.high %v7985_v44, %v7985_v44  ;;  %v7986_v61 = vld [vmem:[#allocation29_spill] sm:$0xff] }
 0x3b9   :  { %v5316_v17 = vpop.eup %5315  ;;  %v3276_v8 = vadd.f32 1.0, %v5314_v33  ;;  %5335 = vpow2.f32 %v4964_v36  ;;  %v1021_v63 = vcombine.high %v7986_v61, %v7986_v61  ;;  %v7987_v36 = vld [vmem:[#allocation36_spill] sm:$0xff]  ;;  %v7045_v5 = vrot.slane %v901_v15, %v5637_v12 }
 0x3ba   :  { %v7009_v27 = vadd.f32 %v3341_v10, %v3337_v18  ;;  %v5318_v19 = vpop.eup %5317  ;;  %v3300_v41 = vadd.f32 1.0, %v5316_v17  ;;  %5337 = vrcp.f32 %v3325_v57  ;;  %v909_v16 = vcombine.high %v7987_v36, %v7987_v36  ;;  %v7988_v57 = vld [vmem:[#allocation28_spill] sm:$0xff]  ;;  %v7989_v18 = vld [vmem:[#allocation37_spill] sm:$0xff]  ;;  %v7990_v17 = vld [vmem:[#allocation39_spill] sm:$0xff] }
 0x3bb   :  { %v5320_v25 = vpop.eup %5319  ;;  %5339 = vrcp.f32 %v3276_v8  ;;  %v949_v10 = vcombine.high %v7988_v57, %v7988_v57  ;;  %v989_v33 = vcombine.high %v7989_v18, %v7989_v18  ;;  %v1029_v9 = vcombine.high %v7990_v17, %v7990_v17 }
 0x3bc   :  { %v5322_v30 = vpop.eup %5321  ;;  %5341 = vrcp.f32 %v3300_v41  ;;  %v3326_v54 = vadd.f32 1.0, %v5320_v25  ;;  %v7051_v41 = vrot.slane %v981_v55, %v5637_v12  ;;  %v7054_v25 = vrot.slane %v1021_v63, %v5637_v12  ;;  %v8009_v63 = vld [vmem:[#allocation45_spill] sm:$0xff] }
 0x3bd   :  { %v5324_v22 = vpop.eup %5323  ;;  %5343 = vtanh.f32 %v7009_v27  ;;  %v3343_v1 = vmul.f32 %v5322_v30, %v5318_v19  ;;  %v7048_v19 = vrot.slane %v941_v48, %v5637_v12  ;;  %v7057_v30 = vrot.slane %v909_v16, %v5637_v12 }
 0x3be   :  { %v5326_v26 = vpop.eup %5325  ;;  %v3339_v32 = vmul.f32 %v5324_v22, %v6641_v2  ;;  %5345 = vrcp.f32 %v3326_v54  ;;  %7991 = vst [vmem:[#allocation10_spill] sm:$0xff] %v7051_v41  ;;  %7992 = vst [vmem:[#allocation16_spill] sm:$0xff] %v7054_v25  ;;  %v7994_v22 = vld [vmem:[#allocation32_spill] sm:$0xff]  ;;  %v7998_v54 = vld [vmem:[#allocation33_spill] sm:$0xff]  ;;  %v965_v36 = vcombine.high %v8009_v63, %v8009_v63 }
 0x3bf   :  { %v5328_v4 = vpop.eup %5327  ;;  %7993 = vst [vmem:[#allocation18_spill] sm:$0xff] %v7057_v30 }
 0x3c0   :  { %v5330_v42 = vpop.eup %5329  ;;  %v3342_v58 = vmul.f32 %v5328_v4, %v5326_v26  ;;  %v7013_v56 = vadd.f32 %v3343_v1, %v3339_v32  ;;  %v917_v1 = vcombine.high %v7994_v22, %v7994_v22  ;;  %v7995_v26 = vld [vmem:[#allocation14_spill] sm:$0xff]  ;;  %v7064_v4 = vrot.slane %v949_v10, %v5637_v12 }
 0x3c1   :  { %v5332_v62 = vpop.eup %5331  ;;  %v3338_v3 = vmul.f32 %v5330_v42, %v6637_v51  ;;  %v957_v32 = vcombine.high %v7995_v26, %v7995_v26  ;;  %v7067_v42 = vrot.slane %v989_v33, %v5637_v12  ;;  %v8010_v10 = vld [vmem:[#allocation46_spill] sm:$0xff]  ;;  %v8011_v33 = vld [vmem:[#allocation7_spill] sm:$0xff] }
 0x3c2   :  { %v5334_v46 = vpop.eup %5333  ;;  %v3327_v53 = vadd.f32 1.0, %v5332_v62  ;;  %7996 = vst [vmem:[#allocation19_spill] sm:$0xff] %v7064_v4  ;;  %v1005_v18 = vcombine.high %v8010_v10, %v8010_v10  ;;  %v1045_v17 = vcombine.high %v8011_v33, %v8011_v33 }
 0x3c3   :  { %v5336_v23 = vpop.eup %5335  ;;  %v7016_v14 = vadd.f32 %v3342_v58, %v3338_v3  ;;  %7997 = vst [vmem:[#allocation3_spill] sm:$0xff] %v7067_v42  ;;  %v997_v58 = vcombine.high %v7998_v54, %v7998_v54  ;;  %v7073_v3 = vrot.slane %v1029_v9, %v5637_v12 }
 0x3c4   :  { %v5338_v52 = vpop.eup %5337  ;;  %v3328_v0 = vadd.f32 1.0, %v5336_v23  ;;  %v7174_v10 = vrot.slane %v1005_v18, %v5637_v12 }
 0x3c5   :  { %v5340_v35 = vpop.eup %5339  ;;  %5347 = vtanh.f32 %v7016_v14  ;;  %7999 = vst [vmem:[#allocation4_spill] sm:$0xff] %v7073_v3 }
 0x3c6   :  { %v5342_v2 = vpop.eup %5341  ;;  %v3344_v20 = vmul.f32 %v5340_v35, %v5334_v46  ;;  %5349 = vtanh.f32 %v7013_v56  ;;  %v8000_v46 = vld [vmem:[#allocation30_spill] sm:$0xff]  ;;  %8015 = vst [vmem:[#allocation29_spill] sm:$0xff] %v7174_v10 }
 0x3c7   :  { %v5344_v59 = vpop.eup %5343  ;;  %v3340_v21 = vmul.f32 %v5342_v2, %v6645_v31  ;;  %5351 = vrcp.f32 %v3327_v53  ;;  %v7077_v23 = vadd.f32 %v8000_v46, %v7045_v5  ;;  %v7085_v53 = vadd.f32 %v6749_v13, %v7051_v41  ;;  %v8002_v2 = vld [vmem:[#allocation41_spill] sm:$0xff] }
 0x3c8   :  { %v3353_v38 = vmul.f32 %v5344_v59, %v5338_v52  ;;  %5353 = vrcp.f32 %v3328_v0  ;;  %v5346_v39 = vpop.eup %5345  ;;  %v8001_v52 = vld [vmem:[#allocation31_spill] sm:$0xff]  ;;  %v1037_v0 = vcombine.high %v8002_v2, %v8002_v2 }
 0x3c9   :  { %v7021_v51 = vadd.f32 %v3344_v20, %v3340_v21  ;;  %v7081_v35 = vadd.f32 %v8001_v52, %v7048_v19  ;;  %v8003_v20 = vld [vmem:[#allocation25_spill] sm:$0xff]  ;;  %v7095_v21 = vadd.f32 %v8000_v46, %v7057_v30 }
 0x3ca   :  { %3402 = vperm.xlu0 %5024, %v3353_v38   ;;  %v7091_v59 = vadd.f32 %v8003_v20, %v7054_v25  ;;  %v7121_v48 = vadd.f32 %v8003_v20, %v7073_v3  ;;  %v7126_v61 = vrot.slane %v1037_v0, %v5637_v12 }
 0x3cb   :  { %5355 = vtanh.f32 %v7021_v51 }
 0x3cc   :  { %8008 = vst [vmem:[#allocation22_spill] sm:$0xff] %v7126_v61 }
 0x3cf   :  { %v5348_v60 = vpop.eup %5347 }
 0x3d0   :  { %v3354_v11 = vmul.f32 %v5348_v60, %v5346_v39  ;;  %v5350_v43 = vpop.eup %5349  ;;  %v7101_v39 = vrot.slane %v957_v32, %v5637_v12 }
 0x3d1   :  { %v5352_v34 = vpop.eup %5351 }
 0x3d2   :  { %3410 = vperm.xlu1 %5025, %v3354_v11   ;;  %v5354_v29 = vpop.eup %5353  ;;  %v3355_v7 = vmul.f32 %v5352_v34, %v5350_v43  ;;  %8005 = vst [vmem:[#allocation6_spill] sm:$0xff] %v7101_v39  ;;  %v7109_v43 = vadd.f32 %v6749_v13, %v7067_v42  ;;  %v7112_v34 = vrot.slane %v997_v58, %v5637_v12 }
 0x3d3   :  { %v7136_v57 = vadd.f32 %v8001_v52, %v7101_v39 }
 0x3d4   :  { %8006 = vst [vmem:[#allocation21_spill] sm:$0xff] %v7112_v34 }
 0x3d5   :  { %v5356_v50 = vpop.eup %5355 }
 0x3d6   :  { %v3356_v31 = vmul.f32 %v5356_v50, %v5354_v29  ;;  %3418 = vperm.xlu1 %5025, %v3355_v7   ;;  %v8007_v29 = vld [vmem:[#allocation40_spill] sm:$0xff] }
 0x3d8   :  { %3426 = vperm.xlu0 %5024, %v3356_v31  }
 0x3da   :  { %5026 = vset.pattern.permute.xlu1 %v7900_v45 }
 0x3db   :  { %3359 = vperm.xlu1 %5026, %v3353_v38   ;;  %v7098_v38 = vrot.slane %v917_v1, %v5637_v12  ;;  %v7146_v1 = vadd.f32 %v6749_v13, %v7112_v34 }
 0x3dc   :  { %5027 = vset.pattern.permute.xlu0 %v7900_v45 }
 0x3dd   :  { %3368 = vperm.xlu0 %5027, %v3354_v11   ;;  %8004 = vst [vmem:[#allocation5_spill] sm:$0xff] %v7098_v38  ;;  %v7105_v11 = vadd.f32 %v8001_v52, %v7064_v4  ;;  %v7132_v16 = vadd.f32 %v8000_v46, %v7098_v38 }
 0x3df   :  { %3377 = vperm.xlu1 %5026, %v3355_v7   ;;  %v925_v7 = vcombine.high %v8007_v29, %v8007_v29  ;;  %v7160_v29 = vadd.f32 %v8003_v20, %v7126_v61 }
 0x3e1   :  { %5028 = vset.pattern.permute.xlu0 %v7901_v6  ;;  %v7149_v26 = vrot.slane %v925_v7, %v5637_v12 }
 0x3e3   :  { %3386 = vperm.xlu1 %5026, %v3356_v31   ;;  %8012 = vst [vmem:[#allocation23_spill] sm:$0xff] %v7149_v26 }
 0x3e7   :  { %5029 = vset.pattern.permute.xlu1 %v7901_v6 }
 0x449   :  { %v3403_v8 = vpop.permute.xlu0 %3402 }
 0x44a   :  { %v3408_v62 = vrot.slane %v3403_v8, %v5819_v24 }
 0x44c   :  { %v3433_v50 = vmul.f32 %v6805_v40, %v3408_v62  ;;  %v3517_v31 = vmul.f32 %v6811_v28, %v3408_v62  ;;  %v3601_v15 = vmul.f32 %v6824_v49, %v3408_v62  ;;  %v3685_v44 = vmul.f32 %v6842_v37, %v3408_v62 }
 0x44e   :  { %v3447_v32 = vrot.slane %v3433_v50, %v5637_v12  ;;  %v3531_v54 = vrot.slane %v3517_v31, %v5637_v12  ;;  %v3615_v58 = vrot.slane %v3601_v15, %v5637_v12  ;;  %v3699_v2 = vrot.slane %v3685_v44, %v5637_v12 }
 0x44f   :  { %v7165_v31 = vrot.slane %v965_v36, %v5637_v12  ;;  %v7168_v15 = vrot.slane %v1045_v17, %v5637_v12  ;;  %v7178_v36 = vadd.f32 %v8000_v46, %v7149_v26 }
 0x450   :  { %v3448_v33 = vcombine.high %v3447_v32, %v3447_v32  ;;  %v3700_v17 = vcombine.high %v3699_v2, %v3699_v2 }
 0x451   :  { %v3411_v60 = vpop.permute.xlu1 %3410  ;;  %8013 = vst [vmem:[#allocation26_spill] sm:$0xff] %v7165_v31  ;;  %8014 = vst [vmem:[#allocation20_spill] sm:$0xff] %v7168_v15  ;;  %v7185_v18 = vadd.f32 %v8001_v52, %v7165_v31  ;;  %v7189_v32 = vadd.f32 %v8003_v20, %v7168_v15 }
 0x452   :  { %v3416_v55 = vrot.slane %v3411_v60, %v5819_v24 }
 0x454   :  { %v3434_v9 = vmul.f32 %v6805_v40, %v3416_v55  ;;  %v3518_v8 = vmul.f32 %v6811_v28, %v3416_v55  ;;  %v3602_v0 = vmul.f32 %v6824_v49, %v3416_v55  ;;  %v3686_v60 = vmul.f32 %v6842_v37, %v3416_v55 }
 0x455   :  { %v3419_v22 = vpop.permute.xlu1 %3418 }
 0x456   :  { %v3424_v62 = vrot.slane %v3419_v22, %v5819_v24  ;;  %v3462_v7 = vrot.slane %v3434_v9, %v5637_v12  ;;  %v3546_v50 = vrot.slane %v3518_v8, %v5637_v12  ;;  %v3532_v22 = vcombine.high %v3531_v54, %v3531_v54 }
 0x457   :  { %v3616_v9 = vcombine.high %v3615_v58, %v3615_v58  ;;  %v3427_v61 = vpop.permute.xlu0 %3426  ;;  %v3630_v34 = vrot.slane %v3602_v0, %v5637_v12  ;;  %v3714_v39 = vrot.slane %v3686_v60, %v5637_v12 }
 0x458   :  { %v3435_v44 = vmul.f32 %v6805_v40, %v3424_v62  ;;  %v3519_v63 = vmul.f32 %v6811_v28, %v3424_v62  ;;  %v3687_v55 = vmul.f32 %v6842_v37, %v3424_v62  ;;  %v3603_v38 = vmul.f32 %v6824_v49, %v3424_v62 }
 0x459   :  { %v3463_v3 = vcombine.high %v3462_v7, %v3462_v7  ;;  %v3547_v42 = vcombine.high %v3546_v50, %v3546_v50  ;;  %v3455_v62 = vrot.slane %v3448_v33, %v5637_v12  ;;  %v3539_v0 = vrot.slane %v3532_v22, %v5637_v12 }
 0x45a   :  { %v3360_v8 = vpop.permute.xlu1 %3359  ;;  %v3477_v46 = vrot.slane %v3435_v44, %v5637_v12  ;;  %v3561_v54 = vrot.slane %v3519_v63, %v5637_v12  ;;  %v3729_v58 = vrot.slane %v3687_v55, %v5637_v12  ;;  %v3623_v60 = vrot.slane %v3616_v9, %v5637_v12 }
 0x45b   :  { %v3365_v2 = vrot.slane %v3360_v8, %v5819_v24  ;;  %v3432_v52 = vrot.slane %v3427_v61, %v5819_v24  ;;  %v3707_v7 = vrot.slane %v3700_v17, %v5637_v12  ;;  %v3631_v20 = vcombine.high %v3630_v34, %v3630_v34 }
 0x45c   :  { %v3715_v50 = vcombine.high %v3714_v39, %v3714_v39  ;;  %v7201_v44 = vrot.slane %v3603_v38, %v5637_v12  ;;  %v3470_v63 = vrot.slane %v3463_v3, %v5637_v12  ;;  %v3369_v22 = vpop.permute.xlu0 %3368  ;;  %v3554_v9 = vrot.slane %v3547_v42, %v5637_v12 }
 0x45d   :  { %v3393_v55 = vmul.f32 %v6805_v40, %v3365_v2  ;;  %v3509_v8 = vmul.f32 %v6811_v28, %v3365_v2  ;;  %v3677_v33 = vmul.f32 %v6842_v37, %v3365_v2  ;;  %v3478_v15 = vcombine.high %v3477_v46, %v3477_v46 }
 0x45e   :  { %v3562_v61 = vcombine.high %v3561_v54, %v3561_v54  ;;  %v3730_v31 = vcombine.high %v3729_v58, %v3729_v58  ;;  %v3436_v34 = vmul.f32 %v6805_v40, %v3432_v52  ;;  %v3378_v17 = vpop.permute.xlu1 %3377  ;;  %v3638_v26 = vrot.slane %v3631_v20, %v5637_v12 }
 0x45f   :  { %v3397_v39 = vadd.f32 %v3393_v55, %v7077_v23  ;;  %v3513_v38 = vadd.f32 %v3509_v8, %v7081_v35  ;;  %v3681_v3 = vadd.f32 %v3677_v33, %v7091_v59  ;;  %v3520_v4 = vmul.f32 %v6811_v28, %v3432_v52 }
 0x460   :  { %v3688_v30 = vmul.f32 %v6842_v37, %v3432_v52  ;;  %v3374_v42 = vrot.slane %v3369_v22, %v5819_v24  ;;  %v3593_v58 = vmul.f32 %v6824_v49, %v3365_v2  ;;  %v3722_v23 = vrot.slane %v3715_v50, %v5637_v12 }
 0x461   :  { %v3505_v46 = vadd.f32 %v3455_v62, %v3397_v39  ;;  %v3589_v54 = vadd.f32 %v3539_v0, %v3513_v38  ;;  %v3757_v25 = vadd.f32 %v3707_v7, %v3681_v3  ;;  %v3485_v35 = vrot.slane %v3478_v15, %v5637_v12 }
 0x462   :  { %v3569_v59 = vrot.slane %v3562_v61, %v5637_v12  ;;  %v3737_v55 = vrot.slane %v3730_v31, %v5637_v12  ;;  %v3492_v20 = vrot.slane %v3436_v34, %v5637_v12  ;;  %v3604_v8 = vmul.f32 %v6824_v49, %v3432_v52  ;;  %v3387_v22 = vpop.permute.xlu1 %3386 }
 0x463   :  { %v4965_v33 = vmul.f32 -1.442695, %v3505_v46  ;;  %v4969_v41 = vmul.f32 -1.442695, %v3589_v54  ;;  %v3576_v62 = vrot.slane %v3520_v4, %v5637_v12  ;;  %v7225_v0 = vrot.slane %v3688_v30, %v5637_v12 }
 0x464   :  { %v3394_v2 = vmul.f32 %v6805_v40, %v3374_v42  ;;  %v3510_v7 = vmul.f32 %v6811_v28, %v3374_v42  ;;  %v3597_v15 = vadd.f32 %v3593_v58, %v7085_v53  ;;  %v4973_v50 = vmul.f32 -1.442695, %v3757_v25 }
 0x465   :  { %5357 = vpow2.f32 %v4965_v33  ;;  %v3383_v31 = vrot.slane %v3378_v17, %v5819_v24  ;;  %v3594_v4 = vmul.f32 %v6824_v49, %v3374_v42  ;;  %v3493_v30 = vcombine.high %v3492_v20, %v3492_v20 }
 0x466   :  { %5359 = vpow2.f32 %v4969_v41  ;;  %v3398_v52 = vadd.f32 %v3394_v2, %v7095_v21  ;;  %v3514_v61 = vadd.f32 %v3510_v7, %v7105_v11  ;;  %v3678_v34 = vmul.f32 %v6842_v37, %v3374_v42 }
 0x467   :  { %v3395_v39 = vmul.f32 %v6805_v40, %v3383_v31  ;;  %v3511_v38 = vmul.f32 %v6811_v28, %v3383_v31  ;;  %v3577_v53 = vcombine.high %v3576_v62, %v3576_v62  ;;  %v3392_v17 = vrot.slane %v3387_v22, %v5819_v24 }
 0x468   :  { %v3506_v3 = vadd.f32 %v3470_v63, %v3398_v52  ;;  %v3590_v25 = vadd.f32 %v3554_v9, %v3514_v61  ;;  %v3673_v46 = vadd.f32 %v3623_v60, %v3597_v15  ;;  %v3679_v11 = vmul.f32 %v6842_v37, %v3383_v31 }
 0x469   :  { %v3399_v41 = vadd.f32 %v3395_v39, %v7132_v16  ;;  %v3515_v21 = vadd.f32 %v3511_v38, %v7136_v57  ;;  %5361 = vpow2.f32 %v4973_v50  ;;  %v3598_v54 = vadd.f32 %v3594_v4, %v7109_v43 }
 0x46a   :  { %v4966_v42 = vmul.f32 -1.442695, %v3506_v3  ;;  %v4970_v58 = vmul.f32 -1.442695, %v3590_v25  ;;  %v3682_v20 = vadd.f32 %v3678_v34, %v7121_v48  ;;  %v3683_v63 = vadd.f32 %v3679_v11, %v7160_v29 }
 0x46b   :  { %v3507_v33 = vadd.f32 %v3485_v35, %v3399_v41  ;;  %v3591_v62 = vadd.f32 %v3569_v59, %v3515_v21  ;;  %v3500_v9 = vrot.slane %v3493_v30, %v5637_v12  ;;  %v3396_v16 = vmul.f32 %v6805_v40, %v3392_v17 }
 0x46c   :  { %5363 = vpow2.f32 %v4966_v42  ;;  %v3512_v57 = vmul.f32 %v6811_v28, %v3392_v17  ;;  %v3584_v60 = vrot.slane %v3577_v53, %v5637_v12  ;;  %v3674_v7 = vadd.f32 %v3638_v26, %v3598_v54 }
 0x46d   :  { %5365 = vpow2.f32 %v4970_v58  ;;  %v4967_v2 = vmul.f32 -1.442695, %v3507_v33  ;;  %v4971_v43 = vmul.f32 -1.442695, %v3591_v62  ;;  %v3595_v15 = vmul.f32 %v6824_v49, %v3383_v31 }
 0x46e   :  { %v3400_v48 = vadd.f32 %v3396_v16, %v7178_v36  ;;  %v3516_v35 = vadd.f32 %v3512_v57, %v7185_v18  ;;  %v3758_v59 = vadd.f32 %v3722_v23, %v3682_v20  ;;  %v3759_v50 = vadd.f32 %v3737_v55, %v3683_v63 }
 0x46f   :  { %v5358_v29 = vpop.eup %5357  ;;  %5367 = vpow2.f32 %v4967_v2  ;;  %v3680_v40 = vmul.f32 %v6842_v37, %v3392_v17  ;;  %v3646_v26 = vcombine.high %v7201_v44, %v7201_v44  ;;  %v3660_v31 = vrot.slane %v3604_v8, %v5637_v12 }
 0x470   :  { %v5360_v22 = vpop.eup %5359  ;;  %v3773_v28 = vadd.f32 1.0, %v5358_v29  ;;  %5369 = vpow2.f32 %v4971_v43  ;;  %v3508_v52 = vadd.f32 %v3500_v9, %v3400_v48  ;;  %v3592_v61 = vadd.f32 %v3584_v60, %v3516_v35 }
 0x471   :  { %v3797_v4 = vadd.f32 1.0, %v5360_v22  ;;  %5371 = vtanh.f32 %v3673_v46  ;;  %v3745_v36 = vcombine.high %v7225_v0, %v7225_v0  ;;  %v4974_v37 = vmul.f32 -1.442695, %v3758_v59 }
 0x472   :  { %5373 = vrcp.f32 %v3773_v28  ;;  %v4968_v18 = vmul.f32 -1.442695, %v3508_v52  ;;  %v4972_v23 = vmul.f32 -1.442695, %v3592_v61  ;;  %v3599_v55 = vadd.f32 %v3595_v15, %v7146_v1 }
 0x473   :  { %5375 = vrcp.f32 %v3797_v4  ;;  %v3596_v30 = vmul.f32 %v6824_v49, %v3392_v17  ;;  %v5362_v34 = vpop.eup %5361  ;;  %v4975_v39 = vmul.f32 -1.442695, %v3759_v50  ;;  %v3684_v44 = vadd.f32 %v3680_v40, %v7189_v32 }
 0x474   :  { %5377 = vtanh.f32 %v3674_v7  ;;  %v3653_v8 = vrot.slane %v3646_v26, %v5637_v12  ;;  %v3661_v38 = vcombine.high %v3660_v31, %v3660_v31  ;;  %v1020_v0 = vadd.f32 %v6749_v13, %v7174_v10 }
 0x475   :  { %5379 = vpow2.f32 %v4968_v18  ;;  %v3752_v3 = vrot.slane %v3745_v36, %v5637_v12  ;;  %v3825_v63 = vadd.f32 1.0, %v5362_v34 }
 0x476   :  { %v5364_v53 = vpop.eup %5363  ;;  %5381 = vpow2.f32 %v4972_v23  ;;  %v3675_v49 = vadd.f32 %v3653_v8, %v3599_v55  ;;  %v3600_v17 = vadd.f32 %v3596_v30, %v1020_v0  ;;  %v3668_v21 = vrot.slane %v3661_v38, %v5637_v12 }
 0x477   :  { %v5366_v25 = vpop.eup %5365  ;;  %v3774_v1 = vadd.f32 1.0, %v5364_v53  ;;  %5383 = vpow2.f32 %v4974_v37  ;;  %v3760_v41 = vadd.f32 %v3752_v3, %v3684_v44 }
 0x478   :  { %v3798_v46 = vadd.f32 1.0, %v5366_v25  ;;  %5385 = vpow2.f32 %v4975_v39  ;;  %v3676_v58 = vadd.f32 %v3668_v21, %v3600_v17  ;;  %v8017_v21 = vld [vmem:[#allocation13_spill] sm:$0xff] }
 0x479   :  { %v5368_v32 = vpop.eup %5367  ;;  %5387 = vrcp.f32 %v3774_v1  ;;  %v4976_v33 = vmul.f32 -1.442695, %v3760_v41  ;;  %v8016_v41 = vld [vmem:[#allocation9_spill] sm:$0xff] }
 0x47a   :  { %v5370_v11 = vpop.eup %5369  ;;  %5389 = vrcp.f32 %v3798_v46  ;;  %v3775_v13 = vadd.f32 1.0, %v5368_v32  ;;  %v1061_v32 = vcombine.high %v8016_v41, %v8016_v41 }
 0x47b   :  { %v5372_v54 = vpop.eup %5371  ;;  %v3799_v42 = vadd.f32 1.0, %v5370_v11  ;;  %5391 = vtanh.f32 %v3675_v49  ;;  %v1073_v11 = vcombine.high %v8017_v21, %v8017_v21  ;;  %v8031_v21 = vld [vmem:[#allocation8_spill] sm:$0xff] }
 0x47c   :  { %v5374_v20 = vpop.eup %5373  ;;  %5393 = vrcp.f32 %v3775_v13 }
 0x47d   :  { %v5376_v62 = vpop.eup %5375  ;;  %5395 = vrcp.f32 %v3799_v42  ;;  %v3841_v9 = vmul.f32 %v5374_v20, %v5372_v54  ;;  %v8018_v54 = vld [vmem:[#allocation15_spill] sm:$0xff] }
 0x47e   :  { %v5378_v16 = vpop.eup %5377  ;;  %v3837_v57 = vmul.f32 %v5376_v62, %v7009_v27  ;;  %5397 = vtanh.f32 %v3676_v58  ;;  %v1085_v42 = vcombine.high %v8018_v54, %v8018_v54  ;;  %v8019_v58 = vld [vmem:[#allocation34_spill] sm:$0xff] }
 0x47f   :  { %v5380_v60 = vpop.eup %5379  ;;  %5399 = vpow2.f32 %v4976_v33  ;;  %v1097_v20 = vcombine.high %v8019_v58, %v8019_v58  ;;  %v7297_v62 = vld [vmem:[%s7745_s3] sm:$0x1] }
 0x480   :  { %v5382_v2 = vpop.eup %5381  ;;  %v3776_v43 = vadd.f32 1.0, %v5380_v60  ;;  %v7266_v7 = vadd.f32 %v3841_v9, %v3837_v57  ;;  %5401 = vrcp.f32 %v3825_v63  ;;  %8020 = vst [vmem:[#allocation36_spill] sm:$0xff] %v7297_v62  ;;  %v7300_v63 = vadd.f32 %v7297_v62, %v1061_v32  ;;  %v8021_v9 = vld [vmem:[#allocation38_spill] sm:$0xff]  ;;  %v8022_v57 = vld [vmem:[#allocation35_spill] sm:$0xff] }
 0x481   :  { %v5384_v15 = vpop.eup %5383  ;;  %v3800_v48 = vadd.f32 1.0, %v5382_v2  ;;  %v1075_v60 = vcombine.high %v8022_v57, %v8022_v57  ;;  %v8023_v2 = vld [vmem:[#allocation24_spill] sm:$0xff] }
 0x482   :  { %v5386_v35 = vpop.eup %5385  ;;  %5403 = vrcp.f32 %v3776_v43  ;;  %v3826_v50 = vadd.f32 1.0, %v5384_v15  ;;  %v1087_v43 = vcombine.high %v8023_v2, %v8023_v2 }
 0x483   :  { %v5388_v29 = vpop.eup %5387  ;;  %5405 = vrcp.f32 %v3800_v48  ;;  %v3827_v26 = vadd.f32 1.0, %v5386_v35  ;;  %v7312_v48 = vld [vmem:[%s7745_s3 + $0x1] sm:$0x1] }
 0x484   :  { %v5390_v59 = vpop.eup %5389  ;;  %5407 = vtanh.f32 %v7266_v7  ;;  %v3842_v40 = vmul.f32 %v5388_v29, %v5378_v16  ;;  %v1063_v16 = vcombine.high %v8021_v9, %v8021_v9  ;;  %8024 = vst [vmem:[#allocation28_spill] sm:$0xff] %v7312_v48  ;;  %v7315_v35 = vadd.f32 %v7312_v48, %v1073_v11  ;;  %v8025_v29 = vld [vmem:[#allocation27_spill] sm:$0xff] }
 0x485   :  { %v5392_v27 = vpop.eup %5391  ;;  %v3838_v22 = vmul.f32 %v5390_v59, %v7016_v14  ;;  %5409 = vrcp.f32 %v3826_v50  ;;  %v1099_v59 = vcombine.high %v8025_v29, %v8025_v29  ;;  %v8026_v50 = vld [vmem:[#allocation17_spill] sm:$0xff]  ;;  %v1064_v11 = vcombine.high %v8031_v21, %v8031_v21  ;;  %v8032_v9 = vld [vmem:[#allocation11_spill] sm:$0xff] }
 0x486   :  { %v5394_v28 = vpop.eup %5393 }
 0x487   :  { %v5396_v52 = vpop.eup %5395  ;;  %v7270_v61 = vadd.f32 %v3842_v40, %v3838_v22  ;;  %v3843_v31 = vmul.f32 %v5394_v28, %v5392_v27  ;;  %v1062_v40 = vcombine.high %v8026_v50, %v8026_v50  ;;  %v7324_v27 = vld [vmem:[%s7743_s2] sm:$0x3]  ;;  %v7330_v28 = vld [vmem:[%s7743_s2 + $0x2] sm:$0x3] }
 0x488   :  { %v3839_v4 = vmul.f32 %v5396_v52, %v7013_v56  ;;  %v5398_v36 = vpop.eup %5397 }
 0x489   :  { %5411 = vtanh.f32 %v7270_v61  ;;  %v5400_v18 = vpop.eup %5399 }
 0x48a   :  { %v7274_v23 = vadd.f32 %v3843_v31, %v3839_v4  ;;  %v5402_v37 = vpop.eup %5401  ;;  %5413 = vrcp.f32 %v3827_v26  ;;  %v3828_v30 = vadd.f32 1.0, %v5400_v18  ;;  %v7336_v26 = vld [vmem:[%s7745_s3 + $0x2] sm:$0x1]  ;;  %v7344_v4 = vld [vmem:[%s7745_s3 + $0x3] sm:$0x1] }
 0x48b   :  { %v7339_v31 = vadd.f32 %v7336_v26, %v1085_v42  ;;  %8027 = vst [vmem:[#allocation37_spill] sm:$0xff] %v7344_v4  ;;  %v7352_v18 = vld [vmem:[%s7743_s2 + $0x4] sm:$0x3] }
 0x48c   :  { %v5404_v55 = vpop.eup %5403  ;;  %5415 = vtanh.f32 %v7274_v23 }
 0x48d   :  { %v5406_v14 = vpop.eup %5405  ;;  %v3844_v34 = vmul.f32 %v5404_v55, %v5398_v36  ;;  %5417 = vrcp.f32 %v3828_v30  ;;  %v7347_v36 = vadd.f32 %v7344_v4, %v1097_v20  ;;  %v8028_v55 = vld [vmem:[#allocation42_spill] sm:$0xff]  ;;  %v8029_v30 = vld [vmem:[#allocation43_spill] sm:$0xff] }
 0x48e   :  { %v5408_v39 = vpop.eup %5407  ;;  %v3840_v44 = vmul.f32 %v5406_v14, %v7021_v51  ;;  %v1074_v14 = vcombine.high %v8028_v55, %v8028_v55 }
 0x48f   :  { %v3853_v8 = vmul.f32 %v5408_v39, %v5402_v37  ;;  %v5410_v56 = vpop.eup %5409  ;;  %v8030_v39 = vld [vmem:[#allocation44_spill] sm:$0xff] }
 0x490   :  { %v7278_v38 = vadd.f32 %v3844_v34, %v3840_v44  ;;  %v1086_v34 = vcombine.high %v8029_v30, %v8029_v30  ;;  %v1098_v44 = vcombine.high %v8030_v39, %v8030_v39  ;;  %v7392_v42 = vadd.f32 %v7312_v48, %v1074_v14 }
 0x491   :  { %3902 = vperm.xlu0 %5028, %v3853_v8  }
 0x492   :  { %5419 = vtanh.f32 %v7278_v38  ;;  %v7395_v58 = vadd.f32 %v7336_v26, %v1086_v34 }
 0x493   :  { %v5412_v0 = vpop.eup %5411 }
 0x494   :  { %v3854_v53 = vmul.f32 %v5412_v0, %v5410_v56  ;;  %v5414_v3 = vpop.eup %5413 }
 0x496   :  { %v5416_v25 = vpop.eup %5415  ;;  %3910 = vperm.xlu1 %5029, %v3854_v53  }
 0x497   :  { %v3855_v1 = vmul.f32 %v5416_v25, %v5414_v3  ;;  %v5418_v49 = vpop.eup %5417  ;;  %v7371_v3 = vadd.f32 %v7312_v48, %v1075_v60  ;;  %v7374_v25 = vadd.f32 %v7336_v26, %v1087_v43 }
 0x49a   :  { %3918 = vperm.xlu1 %5029, %v3855_v1  }
 0x49c   :  { %v5420_v17 = vpop.eup %5419 }
 0x49d   :  { %v3856_v46 = vmul.f32 %v5420_v17, %v5418_v49  ;;  %v7379_v17 = vadd.f32 %v7344_v4, %v1099_v59  ;;  %v8033_v59 = vld [vmem:[#allocation12_spill] sm:$0xff] }
 0x49e   :  { %5030 = vset.pattern.permute.xlu1 %v7900_v45  ;;  %v1100_v50 = vcombine.high %v8033_v59, %v8033_v59 }
 0x49f   :  { %3926 = vperm.xlu0 %5028, %v3856_v46   ;;  %3859 = vperm.xlu1 %5030, %v3853_v8   ;;  %v7364_v8 = vld [vmem:[%s7743_s2 + $0x6] sm:$0x3] }
 0x4a3   :  { %5031 = vset.pattern.permute.xlu0 %v7900_v45  ;;  %3877 = vperm.xlu1 %5030, %v3855_v1  }
 0x4a4   :  { %3868 = vperm.xlu0 %5031, %v3854_v53   ;;  %v7368_v53 = vadd.f32 %v7297_v62, %v1063_v16  ;;  %v1076_v16 = vcombine.high %v8032_v9, %v8032_v9 }
 0x4a7   :  { %3886 = vperm.xlu1 %5030, %v3856_v46   ;;  %v7382_v46 = vadd.f32 %v7297_v62, %v1062_v40 }
 0x4a8   :  { %5032 = vset.pattern.permute.xlu0 %v7901_v6 }
 0x4ab   :  { %5033 = vset.pattern.permute.xlu1 %v7901_v6 }
 0x510   :  { %v3903_v51 = vpop.permute.xlu0 %3902 }
 0x511   :  { %v3908_v13 = vrot.slane %v3903_v51, %v5819_v24 }
 0x513   :  { %v3933_v22 = vmul.f32 %v7324_v27, %v3908_v13  ;;  %v4017_v52 = vmul.f32 %v7330_v28, %v3908_v13  ;;  %v4101_v37 = vmul.f32 %v7352_v18, %v3908_v13  ;;  %v4185_v56 = vmul.f32 %v7364_v8, %v3908_v13 }
 0x515   :  { %v3911_v33 = vpop.permute.xlu1 %3910  ;;  %v3947_v51 = vrot.slane %v3933_v22, %v5637_v12  ;;  %v4031_v41 = vrot.slane %v4017_v52, %v5637_v12  ;;  %v4115_v54 = vrot.slane %v4101_v37, %v5637_v12  ;;  %v4199_v20 = vrot.slane %v4185_v56, %v5637_v12 }
 0x516   :  { %v3916_v15 = vrot.slane %v3911_v33, %v5819_v24  ;;  %v7399_v33 = vadd.f32 %v7344_v4, %v1098_v44  ;;  %v7412_v37 = vadd.f32 %v7297_v62, %v1064_v11 }
 0x517   :  { %v3948_v40 = vcombine.high %v3947_v51, %v3947_v51  ;;  %v4032_v22 = vcombine.high %v4031_v41, %v4031_v41  ;;  %v4116_v14 = vcombine.high %v4115_v54, %v4115_v54  ;;  %v7426_v41 = vadd.f32 %v7344_v4, %v1100_v50 }
 0x518   :  { %v3934_v1 = vmul.f32 %v7324_v27, %v3916_v15  ;;  %v4018_v49 = vmul.f32 %v7330_v28, %v3916_v15  ;;  %v4186_v13 = vmul.f32 %v7364_v8, %v3916_v15  ;;  %v4102_v43 = vmul.f32 %v7352_v18, %v3916_v15 }
 0x519   :  { %v3919_v0 = vpop.permute.xlu1 %3918  ;;  %v4200_v15 = vcombine.high %v4199_v20, %v4199_v20  ;;  %v3955_v21 = vrot.slane %v3948_v40, %v5637_v12  ;;  %v4039_v11 = vrot.slane %v4032_v22, %v5637_v12  ;;  %v7433_v20 = vrot.slane %v4116_v14, %v5637_v12 }
 0x51a   :  { %v3924_v32 = vrot.slane %v3919_v0, %v5819_v24  ;;  %v3962_v60 = vrot.slane %v3934_v1, %v5637_v12  ;;  %v4046_v2 = vrot.slane %v4018_v49, %v5637_v12  ;;  %v4214_v55 = vrot.slane %v4186_v13, %v5637_v12 }
 0x51b   :  { %v7420_v0 = vadd.f32 %v7312_v48, %v1076_v16  ;;  %v7423_v51 = vrot.slane %v4102_v43, %v5637_v12 }
 0x51c   :  { %v3935_v52 = vmul.f32 %v7324_v27, %v3924_v32  ;;  %v4019_v30 = vmul.f32 %v7330_v28, %v3924_v32  ;;  %v4103_v34 = vmul.f32 %v7352_v18, %v3924_v32  ;;  %v4187_v44 = vmul.f32 %v7364_v8, %v3924_v32 }
 0x51d   :  { %v3963_v1 = vcombine.high %v3962_v60, %v3962_v60  ;;  %v4047_v49 = vcombine.high %v4046_v2, %v4046_v2  ;;  %v4215_v54 = vcombine.high %v4214_v55, %v4214_v55  ;;  %v4207_v60 = vrot.slane %v4200_v15, %v5637_v12 }
 0x51e   :  { %v3860_v29 = vpop.permute.xlu1 %3859  ;;  %v3927_v39 = vpop.permute.xlu0 %3926  ;;  %v3977_v13 = vrot.slane %v3935_v52, %v5637_v12  ;;  %v4061_v9 = vrot.slane %v4019_v30, %v5637_v12  ;;  %v4145_v16 = vrot.slane %v4103_v34, %v5637_v12  ;;  %v7439_v2 = vrot.slane %v4187_v44, %v5637_v12 }
 0x51f   :  { %v3865_v56 = vrot.slane %v3860_v29, %v5819_v24  ;;  %v3932_v32 = vrot.slane %v3927_v39, %v5819_v24  ;;  %v3970_v59 = vrot.slane %v3963_v1, %v5637_v12  ;;  %v4054_v50 = vrot.slane %v4047_v49, %v5637_v12 }
 0x520   :  { %v3978_v52 = vcombine.high %v3977_v13, %v3977_v13  ;;  %v7452_v15 = vrot.slane %v4215_v54, %v5637_v12  ;;  %v4062_v44 = vcombine.high %v4061_v9, %v4061_v9  ;;  %v4146_v1 = vcombine.high %v4145_v16, %v4145_v16 }
 0x521   :  { %v3893_v43 = vmul.f32 %v7324_v27, %v3865_v56  ;;  %v4009_v29 = vmul.f32 %v7330_v28, %v3865_v56  ;;  %v4177_v22 = vmul.f32 %v7364_v8, %v3865_v56  ;;  %v3936_v55 = vmul.f32 %v7324_v27, %v3932_v32 }
 0x522   :  { %v3878_v34 = vpop.permute.xlu1 %3877  ;;  %v4020_v49 = vmul.f32 %v7330_v28, %v3932_v32  ;;  %v7458_v13 = vmul.f32 %v7352_v18, %v3932_v32  ;;  %v3985_v9 = vrot.slane %v3978_v52, %v5637_v12  ;;  %v4069_v57 = vrot.slane %v4062_v44, %v5637_v12 }
 0x523   :  { %v3897_v14 = vadd.f32 %v3893_v43, %v7300_v63  ;;  %v4013_v30 = vadd.f32 %v4009_v29, %v7315_v35  ;;  %v3869_v39 = vpop.permute.xlu0 %3868  ;;  %v4188_v63 = vmul.f32 %v7364_v8, %v3932_v32  ;;  %v4181_v35 = vadd.f32 %v4177_v22, %v7347_v36 }
 0x524   :  { %v3883_v43 = vrot.slane %v3878_v34, %v5819_v24  ;;  %v3874_v54 = vrot.slane %v3869_v39, %v5819_v24  ;;  %v3992_v16 = vrot.slane %v3936_v55, %v5637_v12  ;;  %v4076_v48 = vrot.slane %v4020_v49, %v5637_v12 }
 0x525   :  { %v4005_v40 = vadd.f32 %v3955_v21, %v3897_v14  ;;  %v4089_v10 = vadd.f32 %v4039_v11, %v4013_v30  ;;  %v4093_v36 = vmul.f32 %v7352_v18, %v3865_v56  ;;  %v4257_v14 = vadd.f32 %v4207_v60, %v4181_v35 }
 0x526   :  { %v3895_v21 = vmul.f32 %v7324_v27, %v3883_v43  ;;  %v4011_v11 = vmul.f32 %v7330_v28, %v3883_v43  ;;  %v3894_v32 = vmul.f32 %v7324_v27, %v3874_v54  ;;  %v4010_v22 = vmul.f32 %v7330_v28, %v3874_v54  ;;  %v3887_v52 = vpop.permute.xlu1 %3886 }
 0x527   :  { %v4977_v29 = vmul.f32 -1.442695, %v4005_v40  ;;  %v4981_v4 = vmul.f32 -1.442695, %v4089_v10  ;;  %v4153_v55 = vrot.slane %v4146_v1, %v5637_v12  ;;  %v3993_v30 = vcombine.high %v3992_v16, %v3992_v16 }
 0x528   :  { %v3899_v10 = vadd.f32 %v3895_v21, %v7368_v53  ;;  %v4015_v40 = vadd.f32 %v4011_v11, %v7371_v3  ;;  %v3898_v34 = vadd.f32 %v3894_v32, %v7382_v46  ;;  %v4014_v39 = vadd.f32 %v4010_v22, %v7392_v42 }
 0x529   :  { %5421 = vpow2.f32 %v4977_v29  ;;  %v4077_v56 = vcombine.high %v4076_v48, %v4076_v48  ;;  %v3892_v29 = vrot.slane %v3887_v52, %v5819_v24  ;;  %v4097_v62 = vadd.f32 %v4093_v36, %v7339_v31 }
 0x52a   :  { %5423 = vpow2.f32 %v4981_v4  ;;  %v4007_v44 = vadd.f32 %v3985_v9, %v3899_v10  ;;  %v4091_v49 = vadd.f32 %v4069_v57, %v4015_v40  ;;  %v4006_v60 = vadd.f32 %v3970_v59, %v3898_v34 }
 0x52b   :  { %v4090_v4 = vadd.f32 %v4054_v50, %v4014_v39  ;;  %v4178_v53 = vmul.f32 %v7364_v8, %v3874_v54  ;;  %v4244_v3 = vrot.slane %v4188_v63, %v5637_v12  ;;  %v4985_v35 = vmul.f32 -1.442695, %v4257_v14 }
 0x52c   :  { %v4979_v1 = vmul.f32 -1.442695, %v4007_v44  ;;  %v4983_v16 = vmul.f32 -1.442695, %v4091_v49  ;;  %v4000_v46 = vrot.slane %v3993_v30, %v5637_v12  ;;  %v4095_v42 = vmul.f32 %v7352_v18, %v3883_v43 }
 0x52d   :  { %v4182_v48 = vadd.f32 %v4178_v53, %v7399_v33  ;;  %v4978_v57 = vmul.f32 -1.442695, %v4006_v60  ;;  %v4982_v9 = vmul.f32 -1.442695, %v4090_v4  ;;  %v3896_v31 = vmul.f32 %v7324_v27, %v3892_v29 }
 0x52e   :  { %5425 = vpow2.f32 %v4979_v1  ;;  %v4012_v59 = vmul.f32 %v7330_v28, %v3892_v29  ;;  %v4084_v50 = vrot.slane %v4077_v56, %v5637_v12  ;;  %v4173_v63 = vadd.f32 %v7433_v20, %v4097_v62 }
 0x52f   :  { %v4179_v21 = vmul.f32 %v7364_v8, %v3883_v43  ;;  %5427 = vpow2.f32 %v4983_v16  ;;  %v4094_v11 = vmul.f32 %v7352_v18, %v3874_v54  ;;  %v3900_v36 = vadd.f32 %v3896_v31, %v7412_v37 }
 0x530   :  { %5429 = vpow2.f32 %v4985_v35  ;;  %v4016_v33 = vadd.f32 %v4012_v59, %v7420_v0  ;;  %v4099_v22 = vadd.f32 %v4095_v42, %v7374_v25  ;;  %v4258_v52 = vadd.f32 %v7452_v15, %v4182_v48 }
 0x531   :  { %5431 = vpow2.f32 %v4978_v57  ;;  %v4180_v14 = vmul.f32 %v7364_v8, %v3892_v29  ;;  %v4008_v20 = vadd.f32 %v4000_v46, %v3900_v36  ;;  %v4160_v54 = vrot.slane %v7458_v13, %v5637_v12 }
 0x532   :  { %5433 = vpow2.f32 %v4982_v9  ;;  %v4092_v43 = vadd.f32 %v4084_v50, %v4016_v33  ;;  %v4245_v40 = vcombine.high %v4244_v3, %v4244_v3  ;;  %v4183_v0 = vadd.f32 %v4179_v21, %v7379_v17 }
 0x533   :  { %v5422_v32 = vpop.eup %5421  ;;  %5435 = vtanh.f32 %v4173_v63  ;;  %v4980_v25 = vmul.f32 -1.442695, %v4008_v20  ;;  %v4175_v15 = vadd.f32 %v4153_v55, %v4099_v22  ;;  %v4098_v34 = vadd.f32 %v4094_v11, %v7395_v58 }
 0x534   :  { %v5424_v10 = vpop.eup %5423  ;;  %v4273_v62 = vadd.f32 1.0, %v5422_v32  ;;  %v4984_v30 = vmul.f32 -1.442695, %v4092_v43  ;;  %v4096_v39 = vmul.f32 %v7352_v18, %v3892_v29  ;;  %v8034_v56 = vcombine.high %v7439_v2, %v7439_v2 }
 0x535   :  { %v4297_v37 = vadd.f32 1.0, %v5424_v10  ;;  %v4986_v13 = vmul.f32 -1.442695, %v4258_v52  ;;  %v4184_v49 = vadd.f32 %v4180_v14, %v7426_v41  ;;  %v8035_v17 = vcombine.high %v7423_v51, %v7423_v51 }
 0x536   :  { %5437 = vrcp.f32 %v4273_v62  ;;  %v4237_v44 = vrot.slane %v8034_v56, %v5637_v12  ;;  %v4161_v4 = vcombine.high %v4160_v54, %v4160_v54  ;;  %v8036_v55 = vcombine.high %v6892_v47, %v6892_v47 }
 0x537   :  { %5439 = vrcp.f32 %v4297_v37  ;;  %v4138_v60 = vrot.slane %v8035_v17, %v5637_v12  ;;  %v4252_v53 = vrot.slane %v4245_v40, %v5637_v12 }
 0x538   :  { %v1096_v58 = vadd.f32 %v7336_v26, %v8036_v55  ;;  %5441 = vpow2.f32 %v4980_v25  ;;  %v5426_v29 = vpop.eup %5425  ;;  %v4259_v2 = vadd.f32 %v4237_v44, %v4183_v0  ;;  %v4168_v47 = vrot.slane %v4161_v4, %v5637_v12 }
 0x539   :  { %5443 = vpow2.f32 %v4984_v30  ;;  %v5428_v3 = vpop.eup %5427  ;;  %v4275_v35 = vadd.f32 1.0, %v5426_v29  ;;  %v4174_v41 = vadd.f32 %v4138_v60, %v4098_v34  ;;  %v4260_v46 = vadd.f32 %v4252_v53, %v4184_v49 }
 0x53a   :  { %5445 = vtanh.f32 %v4175_v15  ;;  %v4100_v1 = vadd.f32 %v4096_v39, %v1096_v58  ;;  %v5430_v16 = vpop.eup %5429  ;;  %v4299_v51 = vadd.f32 1.0, %v5428_v3  ;;  %v4987_v57 = vmul.f32 -1.442695, %v4259_v2 }
 0x53b   :  { %5447 = vpow2.f32 %v4986_v13  ;;  %v5432_v42 = vpop.eup %5431  ;;  %v4988_v21 = vmul.f32 -1.442695, %v4260_v46  ;;  %v4325_v36 = vadd.f32 1.0, %v5430_v16 }
 0x53c   :  { %5449 = vrcp.f32 %v4275_v35  ;;  %v5434_v48 = vpop.eup %5433  ;;  %v4274_v9 = vadd.f32 1.0, %v5432_v42  ;;  %v4176_v50 = vadd.f32 %v4168_v47, %v4100_v1 }
 0x53d   :  { %5451 = vrcp.f32 %v4299_v51  ;;  %v5436_v31 = vpop.eup %5435  ;;  %v4298_v59 = vadd.f32 1.0, %v5434_v48  ;;  %v4858_v48 = vld [vmem:[%s7746_s4 + $0x1] sm:$0x1] }
 0x53e   :  { %5453 = vtanh.f32 %v4174_v41 }
 0x53f   :  { %5455 = vrcp.f32 %v4274_v9 }
 0x540   :  { %v5438_v63 = vpop.eup %5437  ;;  %5457 = vrcp.f32 %v4298_v59  ;;  %v8037_v59 = vld [vmem:[#allocation10_spill] sm:$0xff] }
 0x541   :  { %v5440_v11 = vpop.eup %5439  ;;  %v4341_v33 = vmul.f32 %v5438_v63, %v5436_v31  ;;  %5459 = vpow2.f32 %v4987_v57  ;;  %v11_v57 = vstv %s7747_s5  ;;  %v1121_v31 = vcombine.high %v7048_v19, %v7048_v19 }
 0x542   :  { %v4337_v32 = vmul.f32 %v5440_v11, %v7266_v7  ;;  %v5442_v22 = vpop.eup %5441  ;;  %5461 = vtanh.f32 %v4176_v50  ;;  %12 = vst [vmem:[#allocation2] sm:$0x1] %v11_v57  ;;  %v1133_v50 = vcombine.high %v8037_v59, %v8037_v59  ;;  %v8039_v11 = vld [vmem:[#allocation36_spill] sm:$0xff]  ;;  %v8050_v59 = vld [vmem:[#allocation23_spill] sm:$0xff] }
 0x543   :  { %v5444_v52 = vpop.eup %5443  ;;  %v4276_v14 = vadd.f32 1.0, %v5442_v22  ;;  %5463 = vpow2.f32 %v4988_v21  ;;  %v8038_v21 = vld [vmem:[#allocation16_spill] sm:$0xff]  ;;  %v8041_v22 = vld [vmem:[#allocation19_spill] sm:$0xff] }
 0x544   :  { %v7517_v10 = vadd.f32 %v4341_v33, %v4337_v32  ;;  %v5446_v62 = vpop.eup %5445  ;;  %v4300_v20 = vadd.f32 1.0, %v5444_v52  ;;  %5465 = vrcp.f32 %v4325_v36  ;;  %v8040_v33 = vld [vmem:[#allocation18_spill] sm:$0xff]  ;;  %v8042_v52 = vld [vmem:[#allocation3_spill] sm:$0xff] }
 0x545   :  { %v5448_v43 = vpop.eup %5447  ;;  %5467 = vrcp.f32 %v4276_v14  ;;  %v1110_v32 = vcombine.high %v8040_v33, %v8040_v33  ;;  %v1134_v19 = vcombine.high %v8042_v52, %v8042_v52  ;;  %v8043_v14 = vld [vmem:[#allocation4_spill] sm:$0xff] }
 0x546   :  { %v5450_v54 = vpop.eup %5449  ;;  %5469 = vrcp.f32 %v4300_v20  ;;  %v4326_v15 = vadd.f32 1.0, %v5448_v43  ;;  %v8044_v43 = vld [vmem:[#allocation28_spill] sm:$0xff] }
 0x547   :  { %v5452_v40 = vpop.eup %5451  ;;  %5471 = vtanh.f32 %v7517_v10  ;;  %v4343_v37 = vmul.f32 %v5450_v54, %v5446_v62  ;;  %v1146_v62 = vcombine.high %v8043_v14, %v8043_v14  ;;  %v7562_v54 = vadd.f32 %v8044_v43, %v1121_v31 }
 0x548   :  { %v5454_v0 = vpop.eup %5453  ;;  %v4339_v7 = vmul.f32 %v5452_v40, %v7274_v23  ;;  %5473 = vrcp.f32 %v4326_v15  ;;  %v7565_v40 = vadd.f32 %v7336_v26, %v1133_v50  ;;  %v1112_v50 = vcombine.high %v8050_v59, %v8050_v59 }
 0x549   :  { %v5456_v25 = vpop.eup %5455 }
 0x54a   :  { %v5458_v30 = vpop.eup %5457  ;;  %v4342_v34 = vmul.f32 %v5456_v25, %v5454_v0  ;;  %v7521_v39 = vadd.f32 %v4343_v37, %v4339_v7  ;;  %v8045_v37 = vld [vmem:[#allocation5_spill] sm:$0xff]  ;;  %v8046_v7 = vld [vmem:[#allocation6_spill] sm:$0xff] }
 0x54b   :  { %v5460_v56 = vpop.eup %5459  ;;  %v4338_v44 = vmul.f32 %v5458_v30, %v7270_v61  ;;  %v1111_v0 = vcombine.high %v8045_v37, %v8045_v37  ;;  %v1123_v25 = vcombine.high %v8046_v7, %v8046_v7 }
 0x54c   :  { %v5462_v13 = vpop.eup %5461  ;;  %v4327_v55 = vadd.f32 1.0, %v5460_v56 }
 0x54d   :  { %v5464_v49 = vpop.eup %5463  ;;  %v7524_v17 = vadd.f32 %v4342_v34, %v4338_v44  ;;  %v8047_v34 = vld [vmem:[#allocation37_spill] sm:$0xff] }
 0x54e   :  { %v5466_v60 = vpop.eup %5465  ;;  %v4328_v58 = vadd.f32 1.0, %v5464_v49  ;;  %v8048_v44 = vld [vmem:[#allocation21_spill] sm:$0xff] }
 0x54f   :  { %v5468_v4 = vpop.eup %5467  ;;  %5475 = vtanh.f32 %v7524_v17 }
 0x550   :  { %v5470_v23 = vpop.eup %5469  ;;  %v4344_v29 = vmul.f32 %v5468_v4, %v5462_v13  ;;  %5477 = vtanh.f32 %v7521_v39  ;;  %v1135_v13 = vcombine.high %v8048_v44, %v8048_v44 }
 0x551   :  { %v5472_v53 = vpop.eup %5471  ;;  %v4340_v2 = vmul.f32 %v5470_v23, %v7278_v38  ;;  %5479 = vrcp.f32 %v4327_v55  ;;  %v8049_v55 = vld [vmem:[#allocation22_spill] sm:$0xff] }
 0x552   :  { %v4353_v3 = vmul.f32 %v5472_v53, %v5466_v60  ;;  %5481 = vrcp.f32 %v4328_v58  ;;  %v5474_v35 = vpop.eup %5473  ;;  %v1147_v23 = vcombine.high %v8049_v55, %v8049_v55  ;;  %v7584_v58 = vadd.f32 %v8039_v11, %v1110_v32 }
 0x553   :  { %v7529_v61 = vadd.f32 %v4344_v29, %v4340_v2  ;;  %v7590_v53 = vadd.f32 %v7336_v26, %v1134_v19  ;;  %v7593_v2 = vadd.f32 %v8047_v34, %v1146_v62 }
 0x554   :  { %4402 = vperm.xlu0 %5032, %v4353_v3  }
 0x555   :  { %5483 = vtanh.f32 %v7529_v61 }
 0x559   :  { %v5476_v41 = vpop.eup %5475 }
 0x55a   :  { %v4354_v1 = vmul.f32 %v5476_v41, %v5474_v35  ;;  %v5478_v16 = vpop.eup %5477 }
 0x55b   :  { %v5480_v51 = vpop.eup %5479 }
 0x55c   :  { %4410 = vperm.xlu1 %5033, %v4354_v1   ;;  %v5482_v46 = vpop.eup %5481  ;;  %v4355_v42 = vmul.f32 %v5480_v51, %v5478_v16  ;;  %v7601_v16 = vadd.f32 %v8044_v43, %v1123_v25 }
 0x55f   :  { %v5484_v47 = vpop.eup %5483 }
 0x560   :  { %v4356_v38 = vmul.f32 %v5484_v47, %v5482_v46  ;;  %4418 = vperm.xlu1 %5033, %v4355_v42  }
 0x562   :  { %4426 = vperm.xlu0 %5032, %v4356_v38  }
 0x564   :  { %5034 = vset.pattern.permute.xlu1 %v7900_v45 }
 0x565   :  { %4359 = vperm.xlu1 %5034, %v4353_v3  }
 0x566   :  { %5035 = vset.pattern.permute.xlu0 %v7900_v45  ;;  %v1109_v45 = vcombine.high %v7045_v5, %v7045_v5  ;;  %v1122_v5 = vcombine.high %v8041_v22, %v8041_v22  ;;  %v7623_v22 = vadd.f32 %v8047_v34, %v1147_v23 }
 0x567   :  { %4368 = vperm.xlu0 %5035, %v4354_v1   ;;  %v7598_v1 = vadd.f32 %v8039_v11, %v1111_v0 }
 0x568   :  { %v7551_v36 = vadd.f32 %v8039_v11, %v1109_v45  ;;  %v7587_v29 = vadd.f32 %v8044_v43, %v1122_v5 }
 0x569   :  { %4377 = vperm.xlu1 %5034, %v4355_v42  }
 0x56b   :  { %4869 = vrot.lane.b32.xlu0 %v4858_v48, %s5576_s24 }
 0x56c   :  { %5036 = vset.pattern.permute.xlu0 %v7901_v6  ;;  %v1145_v6 = vcombine.high %v8038_v21, %v8038_v21 }
 0x56d   :  { %4386 = vperm.xlu1 %5034, %v4356_v38  }
 0x56e   :  { %v7574_v56 = vadd.f32 %v8047_v34, %v1145_v6 }
 0x5d3   :  { %v4403_v9 = vpop.permute.xlu0 %4402 }
 0x5d4   :  { %v4408_v63 = vrot.slane %v4403_v9, %v5819_v24  ;;  %v7611_v9 = vadd.f32 %v7336_v26, %v1135_v13  ;;  %v7631_v13 = vadd.f32 %v8039_v11, %v1112_v50 }
 0x5d6   :  { %v4433_v30 = vmul.f32 %v7324_v27, %v4408_v63  ;;  %v4517_v15 = vmul.f32 %v7330_v28, %v4408_v63  ;;  %v4601_v49 = vmul.f32 %v7352_v18, %v4408_v63  ;;  %v4685_v60 = vmul.f32 %v7364_v8, %v4408_v63  ;;  %v8051_v63 = vld [vmem:[#allocation26_spill] sm:$0xff] }
 0x5d7   :  { %v1124_v21 = vcombine.high %v8051_v63, %v8051_v63 }
 0x5d8   :  { %v4447_v51 = vrot.slane %v4433_v30, %v5637_v12  ;;  %v4531_v46 = vrot.slane %v4517_v15, %v5637_v12  ;;  %v4615_v38 = vrot.slane %v4601_v49, %v5637_v12  ;;  %v4699_v48 = vrot.slane %v4685_v60, %v5637_v12 }
 0x5d9   :  { %v7634_v49 = vadd.f32 %v8044_v43, %v1124_v21 }
 0x5da   :  { %v4448_v5 = vcombine.high %v4447_v51, %v4447_v51  ;;  %v4532_v52 = vcombine.high %v4531_v46, %v4531_v46  ;;  %v4616_v0 = vcombine.high %v4615_v38, %v4615_v38  ;;  %v4700_v7 = vcombine.high %v4699_v48, %v4699_v48 }
 0x5db   :  { %v4411_v20 = vpop.permute.xlu1 %4410 }
 0x5dc   :  { %v4416_v4 = vrot.slane %v4411_v20, %v5819_v24  ;;  %v8052_v20 = vld [vmem:[#allocation20_spill] sm:$0xff]  ;;  %v4623_v11 = vrot.slane %v4616_v0, %v5637_v12  ;;  %v4707_v43 = vrot.slane %v4700_v7, %v5637_v12 }
 0x5dd   :  { %v1148_v37 = vcombine.high %v8052_v20, %v8052_v20 }
 0x5de   :  { %v4434_v3 = vmul.f32 %v7324_v27, %v4416_v4  ;;  %v4518_v35 = vmul.f32 %v7330_v28, %v4416_v4  ;;  %v4602_v42 = vmul.f32 %v7352_v18, %v4416_v4  ;;  %v4686_v57 = vmul.f32 %v7364_v8, %v4416_v4 }
 0x5df   :  { %v4419_v41 = vpop.permute.xlu1 %4418 }
 0x5e0   :  { %v4424_v47 = vrot.slane %v4419_v41, %v5819_v24  ;;  %v4462_v45 = vrot.slane %v4434_v3, %v5637_v12  ;;  %v4546_v31 = vrot.slane %v4518_v35, %v5637_v12  ;;  %v4630_v19 = vrot.slane %v4602_v42, %v5637_v12 }
 0x5e1   :  { %v4427_v14 = vpop.permute.xlu0 %4426  ;;  %v4714_v25 = vrot.slane %v4686_v57, %v5637_v12  ;;  %v4455_v3 = vrot.slane %v4448_v5, %v5637_v12  ;;  %v4539_v35 = vrot.slane %v4532_v52, %v5637_v12 }
 0x5e2   :  { %v4435_v6 = vmul.f32 %v7324_v27, %v4424_v47  ;;  %v4519_v33 = vmul.f32 %v7330_v28, %v4424_v47  ;;  %v4687_v32 = vmul.f32 %v7364_v8, %v4424_v47  ;;  %v4603_v30 = vmul.f32 %v7352_v18, %v4424_v47 }
 0x5e3   :  { %v4463_v15 = vcombine.high %v4462_v45, %v4462_v45  ;;  %v4547_v44 = vcombine.high %v4546_v31, %v4546_v31  ;;  %v4631_v41 = vcombine.high %v4630_v19, %v4630_v19  ;;  %v4432_v51 = vrot.slane %v4427_v14, %v5819_v24 }
 0x5e4   :  { %v4360_v62 = vpop.permute.xlu1 %4359  ;;  %v4477_v60 = vrot.slane %v4435_v6, %v5637_v12  ;;  %v4561_v4 = vrot.slane %v4519_v33, %v5637_v12  ;;  %v4729_v55 = vrot.slane %v4687_v32, %v5637_v12  ;;  %v4715_v46 = vcombine.high %v4714_v25, %v4714_v25 }
 0x5e5   :  { %v4365_v23 = vrot.slane %v4360_v62, %v5819_v24  ;;  %v7646_v42 = vrot.slane %v4603_v30, %v5637_v12  ;;  %v4470_v47 = vrot.slane %v4463_v15, %v5637_v12  ;;  %v4554_v38 = vrot.slane %v4547_v44, %v5637_v12 }
 0x5e6   :  { %v4369_v45 = vpop.permute.xlu0 %4368  ;;  %v4478_v31 = vcombine.high %v4477_v60, %v4477_v60  ;;  %v4562_v59 = vcombine.high %v4561_v4, %v4561_v4  ;;  %v4730_v50 = vcombine.high %v4729_v55, %v4729_v55  ;;  %v7654_v21 = vrot.slane %v4631_v41, %v5637_v12 }
 0x5e7   :  { %v4393_v48 = vmul.f32 %v7324_v27, %v4365_v23  ;;  %v4509_v57 = vmul.f32 %v7330_v28, %v4365_v23  ;;  %v4677_v63 = vmul.f32 %v7364_v8, %v4365_v23  ;;  %v4436_v6 = vmul.f32 %v7324_v27, %v4432_v51 }
 0x5e8   :  { %v4378_v5 = vpop.permute.xlu1 %4377  ;;  %v4722_v52 = vrot.slane %v4715_v46, %v5637_v12  ;;  %v4520_v19 = vmul.f32 %v7330_v28, %v4432_v51  ;;  %v4688_v14 = vmul.f32 %v7364_v8, %v4432_v51  ;;  %v4374_v62 = vrot.slane %v4369_v45, %v5819_v24 }
 0x5e9   :  { %v4397_v33 = vadd.f32 %v4393_v48, %v7551_v36  ;;  %v4513_v32 = vadd.f32 %v4509_v57, %v7562_v54  ;;  %v4646_v0 = vcombine.high %v7646_v42, %v7646_v42  ;;  %v4593_v30 = vmul.f32 %v7352_v18, %v4365_v23 }
 0x5ea   :  { %v4485_v36 = vrot.slane %v4478_v31, %v5637_v12  ;;  %v4569_v54 = vrot.slane %v4562_v59, %v5637_v12  ;;  %v4737_v15 = vrot.slane %v4730_v50, %v5637_v12  ;;  %v4681_v44 = vadd.f32 %v4677_v63, %v7574_v56 }
 0x5eb   :  { %v4505_v7 = vadd.f32 %v4455_v3, %v4397_v33  ;;  %v4589_v25 = vadd.f32 %v4539_v35, %v4513_v32  ;;  %v4492_v60 = vrot.slane %v4436_v6, %v5637_v12  ;;  %v7672_v4 = vmul.f32 %v7352_v18, %v4432_v51 }
 0x5ec   :  { %v4576_v3 = vrot.slane %v4520_v19, %v5637_v12  ;;  %v7676_v35 = vrot.slane %v4688_v14, %v5637_v12  ;;  %v4394_v23 = vmul.f32 %v7324_v27, %v4374_v62  ;;  %v4510_v46 = vmul.f32 %v7330_v28, %v4374_v62  ;;  %v4387_v51 = vpop.permute.xlu1 %4386 }
 0x5ed   :  { %v4989_v55 = vmul.f32 -1.442695, %v4505_v7  ;;  %v4993_v41 = vmul.f32 -1.442695, %v4589_v25  ;;  %v4597_v48 = vadd.f32 %v4593_v30, %v7565_v40  ;;  %v4678_v56 = vmul.f32 %v7364_v8, %v4374_v62 }
 0x5ee   :  { %v4383_v57 = vrot.slane %v4378_v5, %v5819_v24  ;;  %v4757_v45 = vadd.f32 %v4707_v43, %v4681_v44  ;;  %v4398_v31 = vadd.f32 %v4394_v23, %v7584_v58  ;;  %v4514_v59 = vadd.f32 %v4510_v46, %v7587_v29 }
 0x5ef   :  { %5485 = vpow2.f32 %v4989_v55  ;;  %v4493_v50 = vcombine.high %v4492_v60, %v4492_v60  ;;  %v4594_v63 = vmul.f32 %v7352_v18, %v4374_v62  ;;  %v4577_v40 = vcombine.high %v4576_v3, %v4576_v3 }
 0x5f0   :  { %5487 = vpow2.f32 %v4993_v41  ;;  %v4395_v6 = vmul.f32 %v7324_v27, %v4383_v57  ;;  %v4511_v33 = vmul.f32 %v7330_v28, %v4383_v57  ;;  %v4506_v32 = vadd.f32 %v4470_v47, %v4398_v31 }
 0x5f1   :  { %v4590_v19 = vadd.f32 %v4554_v38, %v4514_v59  ;;  %v4392_v14 = vrot.slane %v4387_v51, %v5819_v24  ;;  %v4682_v5 = vadd.f32 %v4678_v56, %v7593_v2  ;;  %v4679_v29 = vmul.f32 %v7364_v8, %v4383_v57 }
 0x5f2   :  { %v4399_v43 = vadd.f32 %v4395_v6, %v7598_v1  ;;  %v4515_v58 = vadd.f32 %v4511_v33, %v7601_v16  ;;  %v4673_v7 = vadd.f32 %v4623_v11, %v4597_v48  ;;  %v4997_v25 = vmul.f32 -1.442695, %v4757_v45 }
 0x5f3   :  { %v4990_v62 = vmul.f32 -1.442695, %v4506_v32  ;;  %v4994_v30 = vmul.f32 -1.442695, %v4590_v19  ;;  %v4598_v44 = vadd.f32 %v4594_v63, %v7590_v53  ;;  %v4683_v47 = vadd.f32 %v4679_v29, %v7623_v22 }
 0x5f4   :  { %v4507_v60 = vadd.f32 %v4485_v36, %v4399_v43  ;;  %v4591_v55 = vadd.f32 %v4569_v54, %v4515_v58  ;;  %v4500_v24 = vrot.slane %v4493_v50, %v5637_v12  ;;  %v4396_v2 = vmul.f32 %v7324_v27, %v4392_v14 }
 0x5f5   :  { %5489 = vpow2.f32 %v4990_v62  ;;  %v4512_v1 = vmul.f32 %v7330_v28, %v4392_v14  ;;  %v4758_v16 = vadd.f32 %v4722_v52, %v4682_v5  ;;  %v4584_v41 = vrot.slane %v4577_v40, %v5637_v12 }
 0x5f6   :  { %5491 = vpow2.f32 %v4994_v30  ;;  %v4991_v38 = vmul.f32 -1.442695, %v4507_v60  ;;  %v4995_v11 = vmul.f32 -1.442695, %v4591_v55  ;;  %v4400_v53 = vadd.f32 %v4396_v2, %v7631_v13 }
 0x5f7   :  { %5493 = vpow2.f32 %v4997_v25  ;;  %v4516_v36 = vadd.f32 %v4512_v1, %v7634_v49  ;;  %v4674_v22 = vadd.f32 %v7654_v21, %v4598_v44  ;;  %v4595_v3 = vmul.f32 %v7352_v18, %v4383_v57 }
 0x5f8   :  { %v4759_v23 = vadd.f32 %v4737_v15, %v4683_v47  ;;  %5495 = vpow2.f32 %v4991_v38  ;;  %v4508_v52 = vadd.f32 %v4500_v24, %v4400_v53  ;;  %v4998_v56 = vmul.f32 -1.442695, %v4758_v16 }
 0x5f9   :  { %v5486_v54 = vpop.eup %5485  ;;  %5497 = vpow2.f32 %v4995_v11  ;;  %v4592_v46 = vadd.f32 %v4584_v41, %v4516_v36  ;;  %v4680_v51 = vmul.f32 %v7364_v8, %v4392_v14  ;;  %v1156_v13 = vadd.f32 %v8047_v34, %v1148_v37  ;;  %v8053_v8 = vld [vmem:[#allocation29_spill] sm:$0xff] }
 0x5fa   :  { %v5488_v27 = vpop.eup %5487  ;;  %v4773_v28 = vadd.f32 1.0, %v5486_v54  ;;  %5499 = vtanh.f32 %v4673_v7  ;;  %v4992_v49 = vmul.f32 -1.442695, %v4508_v52  ;;  %v4745_v21 = vcombine.high %v7676_v35, %v7676_v35 }
 0x5fb   :  { %v4797_v48 = vadd.f32 1.0, %v5488_v27  ;;  %v4599_v15 = vadd.f32 %v4595_v3, %v7611_v9  ;;  %v4996_v57 = vmul.f32 -1.442695, %v4592_v46  ;;  %v4660_v45 = vrot.slane %v7672_v4, %v5637_v12 }
 0x5fc   :  { %5501 = vrcp.f32 %v4773_v28  ;;  %v4999_v31 = vmul.f32 -1.442695, %v4759_v23  ;;  %v1136_v59 = vcombine.high %v8053_v8, %v8053_v8  ;;  %v4653_v34 = vrot.slane %v4646_v0, %v5637_v12 }
 0x5fd   :  { %5503 = vrcp.f32 %v4797_v48  ;;  %v4684_v20 = vadd.f32 %v4680_v51, %v1156_v13  ;;  %v4596_v35 = vmul.f32 %v7352_v18, %v4392_v14  ;;  %v4752_v50 = vrot.slane %v4745_v21, %v5637_v12 }
 0x5fe   :  { %5505 = vtanh.f32 %v4674_v22  ;;  %v4675_v63 = vadd.f32 %v4653_v34, %v4599_v15  ;;  %v4661_v33 = vcombine.high %v4660_v45, %v4660_v45  ;;  %v1144_v32 = vadd.f32 %v7336_v26, %v1136_v59  ;;  %v4857_v15 = vld [vmem:[%s7746_s4] sm:$0x1] }
 0x5ff   :  { %5507 = vpow2.f32 %v4998_v56  ;;  %v5490_v37 = vpop.eup %5489  ;;  %v4760_v0 = vadd.f32 %v4752_v50, %v4684_v20 }
 0x600   :  { %5509 = vpow2.f32 %v4992_v49  ;;  %v5492_v9 = vpop.eup %5491  ;;  %v4774_v4 = vadd.f32 1.0, %v5490_v37  ;;  %v4600_v18 = vadd.f32 %v4596_v35, %v1144_v32  ;;  %v4668_v29 = vrot.slane %v4661_v33, %v5637_v12 }
 0x601   :  { %5511 = vpow2.f32 %v4996_v57  ;;  %v5494_v6 = vpop.eup %5493  ;;  %v4798_v40 = vadd.f32 1.0, %v5492_v9  ;;  %v5000_v62 = vmul.f32 -1.442695, %v4760_v0  ;;  %v4870_v57 = vpop.permute.xlu0 %4869 }
 0x602   :  { %5513 = vpow2.f32 %v4999_v31  ;;  %v5496_v42 = vpop.eup %5495  ;;  %v4825_v7 = vadd.f32 1.0, %v5494_v6  ;;  %v4676_v44 = vadd.f32 %v4668_v29, %v4600_v18 }
 0x603   :  { %5515 = vrcp.f32 %v4774_v4  ;;  %v5498_v19 = vpop.eup %5497  ;;  %v4775_v5 = vadd.f32 1.0, %v5496_v42 }
 0x604   :  { %5517 = vrcp.f32 %v4798_v40  ;;  %v5500_v14 = vpop.eup %5499  ;;  %v4799_v43 = vadd.f32 1.0, %v5498_v19  ;;  %v4859_v19 = vld [vmem:[#allocation2] sm:$0x1] }
 0x605   :  { %5519 = vtanh.f32 %v4675_v63 }
 0x606   :  { %v5502_v58 = vpop.eup %5501  ;;  %5521 = vrcp.f32 %v4775_v5 }
 0x607   :  { %v5504_v25 = vpop.eup %5503  ;;  %5523 = vrcp.f32 %v4799_v43  ;;  %v4841_v30 = vmul.f32 %v5502_v58, %v5500_v14 }
 0x608   :  { %v5506_v26 = vpop.eup %5505  ;;  %v4837_v60 = vmul.f32 %v5504_v25, %v7517_v10  ;;  %5525 = vrcp.f32 %v4825_v7 }
 0x609   :  { %v5508_v55 = vpop.eup %5507  ;;  %5527 = vpow2.f32 %v5000_v62 }
 0x60a   :  { %v5510_v47 = vpop.eup %5509  ;;  %v4845_v24 = vadd.f32 %v4841_v30, %v4837_v60  ;;  %5529 = vtanh.f32 %v4676_v44  ;;  %v4826_v41 = vadd.f32 1.0, %v5508_v55 }
 0x60b   :  { %v5512_v2 = vpop.eup %5511  ;;  %v4776_v1 = vadd.f32 1.0, %v5510_v47 }
 0x60c   :  { %v5514_v16 = vpop.eup %5513  ;;  %v4800_v38 = vadd.f32 1.0, %v5512_v2 }
 0x60d   :  { %v5516_v12 = vpop.eup %5515  ;;  %5531 = vrcp.f32 %v4776_v1  ;;  %v4827_v3 = vadd.f32 1.0, %v5514_v16 }
 0x60e   :  { %v5518_v11 = vpop.eup %5517  ;;  %5533 = vrcp.f32 %v4800_v38  ;;  %v4842_v53 = vmul.f32 %v5516_v12, %v5506_v26 }
 0x60f   :  { %v5520_v36 = vpop.eup %5519  ;;  %v4838_v54 = vmul.f32 %v5518_v11, %v7524_v17  ;;  %5535 = vtanh.f32 %v4845_v24 }
 0x610   :  { %v5522_v10 = vpop.eup %5521  ;;  %5537 = vrcp.f32 %v4826_v41 }
 0x611   :  { %v5524_v22 = vpop.eup %5523  ;;  %v4846_v23 = vadd.f32 %v4842_v53, %v4838_v54  ;;  %v4843_v27 = vmul.f32 %v5522_v10, %v5520_v36 }
 0x612   :  { %v4839_v28 = vmul.f32 %v5524_v22, %v7521_v39  ;;  %v5526_v52 = vpop.eup %5525 }
 0x613   :  { %5539 = vtanh.f32 %v4846_v23  ;;  %v5528_v48 = vpop.eup %5527 }
 0x614   :  { %v4847_v46 = vadd.f32 %v4843_v27, %v4839_v28  ;;  %5541 = vrcp.f32 %v4827_v3  ;;  %v5530_v56 = vpop.eup %5529  ;;  %v4828_v49 = vadd.f32 1.0, %v5528_v48 }
 0x616   :  { %5543 = vtanh.f32 %v4847_v46 }
 0x617   :  { %v5532_v51 = vpop.eup %5531  ;;  %5545 = vrcp.f32 %v4828_v49 }
 0x618   :  { %v5534_v13 = vpop.eup %5533  ;;  %v4844_v17 = vmul.f32 %v5532_v51, %v5530_v56 }
 0x619   :  { %v5536_v21 = vpop.eup %5535  ;;  %v4840_v45 = vmul.f32 %v5534_v13, %v7529_v61 }
 0x61a   :  { %v4853_v39 = vmul.f32 %v5536_v21, %v5526_v52  ;;  %v5538_v8 = vpop.eup %5537 }
 0x61b   :  { %v4848_v31 = vadd.f32 %v4844_v17, %v4840_v45 }
 0x61c   :  { %v4872_v59 = vmul.f32 %v4870_v57, %v4853_v39  ;;  %v4860_v34 = vmul.f32 %v4857_v15, %v4853_v39 }
 0x61d   :  { %v5540_v20 = vpop.eup %5539  ;;  %5547 = vtanh.f32 %v4848_v31 }
 0x61e   :  { %v4854_v37 = vmul.f32 %v5540_v20, %v5538_v8  ;;  %4880 = vrot.lane.b32.xlu1 %v4872_v59, %s5577_s27  ;;  %v5542_v35 = vpop.eup %5541  ;;  %v4864_v5 = vadd.f32 %v4860_v34, %v4859_v19 }
 0x620   :  { %v5544_v9 = vpop.eup %5543  ;;  %v4873_v50 = vmul.f32 %v4870_v57, %v4854_v37  ;;  %v4861_v4 = vmul.f32 %v4857_v15, %v4854_v37 }
 0x621   :  { %v4855_v63 = vmul.f32 %v5544_v9, %v5542_v35  ;;  %v5546_v61 = vpop.eup %5545 }
 0x622   :  { %4882 = vrot.lane.b32.xlu0 %v4873_v50, %s5577_s27  ;;  %v4865_v43 = vadd.f32 %v4861_v4, %v4859_v19 }
 0x623   :  { %v4874_v6 = vmul.f32 %v4870_v57, %v4855_v63  ;;  %v4862_v33 = vmul.f32 %v4857_v15, %v4855_v63 }
 0x625   :  { %4884 = vrot.lane.b32.xlu1 %v4874_v6, %s5577_s27  ;;  %v4866_v7 = vadd.f32 %v4862_v33, %v4859_v19 }
 0x627   :  { %v5548_v40 = vpop.eup %5547 }
 0x628   :  { %v4856_v32 = vmul.f32 %v5548_v40, %v5546_v61 }
 0x62a   :  { %v4875_v42 = vmul.f32 %v4870_v57, %v4856_v32  ;;  %v4863_v0 = vmul.f32 %v4857_v15, %v4856_v32 }
 0x62c   :  { %4886 = vrot.lane.b32.xlu0 %v4875_v42, %s5577_s27  ;;  %v4867_v30 = vadd.f32 %v4863_v0, %v4859_v19 }
 0x690   :  { %v4881_v18 = vpop.permute.xlu1 %4880 }
 0x691   :  { %v4892_v14 = vadd.f32 %v4881_v18, %v4864_v5 }
 0x693   :  { %4897 = vst.msk [vmem:[%s7748_s6] sm:$0x1] %vm4896_vm0, %v4892_v14 }
 0x694   :  { %v4883_v58 = vpop.permute.xlu0 %4882 }
 0x695   :  { %v4893_v29 = vadd.f32 %v4883_v58, %v4865_v43 }
 0x697   :  { %4898 = vst.msk [vmem:[%s7748_s6 + $0x1] sm:$0x1] %vm4896_vm0, %v4893_v29  ;;  %v4885_v25 = vpop.permute.xlu1 %4884 }
 0x698   :  { %v4894_v62 = vadd.f32 %v4885_v25, %v4866_v7 }
 0x69a   :  { %4899 = vst.msk [vmem:[%s7748_s6 + $0x2] sm:$0x1] %vm4896_vm0, %v4894_v62 }
 0x69e   :  { %v4887_v26 = vpop.permute.xlu0 %4886 }
 0x69f   :  { %v4895_v44 = vadd.f32 %v4887_v26, %v4867_v30 }
 0x6a1   :  { %4900 = vst.msk [vmem:[%s7748_s6 + $0x3] sm:$0x1] %vm4896_vm0, %v4895_v44 }

</bundles_post_ra>
